<compile_context>
chip_gen: v7x
topology: tpu7x:2x2x1
jax: 0.10.0
libtpu: 0.0.40
codegen_flags: <defaults>
</compile_context>

<pallas_src>
import jax
import jax.numpy as jnp
from jax import lax
from jax.experimental import pallas as pl
from jax.experimental.pallas import tpu as pltpu

LANE = 128      # per-gate / state pad width: one full vreg lane group
B_TILE = 8      # latents per grid step (one sublane group of the M dimension)


# ----------------------------- Pallas kernel --------------------------------
def _lstm_cell(pre, h_prev, c_prev, whh_bf16):
    """One LSTM step for a (B, LANE) state block.  `pre` already holds
    x @ W_ih^T + (b_ih + b_hh), gate-padded to LANE lanes per gate (PyTorch
    gate order [i, f, g, o]).  The recurrent matmul runs in bf16 on the MXU;
    all state math stays f32."""
    gates = pre + jnp.dot(h_prev.astype(jnp.bfloat16), whh_bf16,
                          preferred_element_type=jnp.float32)        # (B, 4*LANE)
    i = jax.nn.sigmoid(gates[:, 0 * LANE:1 * LANE])
    f = jax.nn.sigmoid(gates[:, 1 * LANE:2 * LANE])
    g = jnp.tanh(gates[:, 2 * LANE:3 * LANE])
    o = jax.nn.sigmoid(gates[:, 3 * LANE:4 * LANE])
    c = f * c_prev + i * g
    h = o * jnp.tanh(c)
    return h, c


def decoder_kernel(z_ref, wih1_ref, whh1_ref, b1_ref,
                   wih2_ref, whh2_ref, b2_ref,
                   wout_ref, bout_ref, y_ref):
    """z_ref  : (B_TILE, LANE)   f32  latents, lane-padded
    wih1/whh1 : (LANE, 4*LANE)   bf16 rnn1 W^T, gate-padded
    b1        : (1, 4*LANE)      f32  rnn1 b_ih + b_hh, gate-padded
    wih2/whh2 : (LANE, 4*LANE)   bf16 rnn2 W^T, gate-padded
    b2        : (1, 4*LANE)      f32
    wout      : (1, LANE)        f32  output weight (n_features == 1), lane-padded
    bout      : (1,)             f32  output bias (SMEM scalar)
    y_ref     : (B_TILE, S)      f32  per-latent decoded sequences
    """
    B = z_ref.shape[0]
    S = y_ref.shape[1]

    # Hoist all weight / bias loads out of the serial recurrence.
    w_hh1 = whh1_ref[...]
    w_ih2 = wih2_ref[...]
    w_hh2 = whh2_ref[...]
    b2 = b2_ref[...]
    wout = wout_ref[...]
    bout = bout_ref[0]

    # rnn1 sees the same latent at every time step -> one batched input matmul.
    zx1 = jnp.dot(z_ref[...].astype(jnp.bfloat16), wih1_ref[...],
                  preferred_element_type=jnp.float32) + b1_ref[...]  # (B, 4*LANE)

    h1 = jnp.zeros((B, LANE), jnp.float32)
    c1 = jnp.zeros((B, LANE), jnp.float32)
    h2 = jnp.zeros((B, LANE), jnp.float32)
    c2 = jnp.zeros((B, LANE), jnp.float32)

    # Fully unrolled (S is small & static): one basic block, so the scheduler
    # interleaves rnn1 step t+1 with rnn2 step t -- no x2_all barrier anymore.
    for t in range(S):
        h1, c1 = _lstm_cell(zx1, h1, c1, w_hh1)
        # rnn2's input pre-activation depends only on h1(t): it sits off rnn2's
        # recurrent critical path and overlaps with rnn1's next step.
        x2 = jnp.dot(h1.astype(jnp.bfloat16), w_ih2,
                     preferred_element_type=jnp.float32) + b2        # (B, 4*LANE)
        h2, c2 = _lstm_cell(x2, h2, c2, w_hh2)
        # Output head folded into the recurrence (n_features == 1): XLU lane
        # reduction + masked 1-lane store, hidden under the serial chain.
        y_ref[:, t:t + 1] = jnp.sum(h2 * wout, axis=-1, keepdims=True) + bout


# --------------------------- one-time param prep ------------------------------
def _pad_gate_matrix(w, in_dim, hid):
    """PyTorch (4*hid, in_dim) -> transposed, per-gate lane-padded (LANE, 4*LANE) bf16."""
    wt = jnp.asarray(w, jnp.float32).T                                # (in_dim, 4*hid)
    blocks = [jnp.pad(wt[:, k * hid:(k + 1) * hid],
                      ((0, LANE - in_dim), (0, LANE - hid))) for k in range(4)]
    return jnp.concatenate(blocks, axis=1).astype(jnp.bfloat16)


def _pad_gate_bias(b_ih, b_hh, hid):
    b = jnp.asarray(b_ih, jnp.float32) + jnp.asarray(b_hh, jnp.float32)   # (4*hid,)
    blocks = [jnp.pad(b[k * hid:(k + 1) * hid], (0, LANE - hid)) for k in range(4)]
    return jnp.concatenate(blocks).reshape(1, 4 * LANE)


def prepare_params(params, input_dim, n_features=1):
    """One-time weight padding / transposition / bf16 casting (hoisted out of
    the per-call path)."""
    assert n_features == 1, "kernel folds the head as a lane reduction (F == 1)"
    # TODO(synk): n_features > 1 changes PyTorch's x.repeat() input construction;
    # only the module's default n_features == 1 path is implemented.
    hidden_dim = 2 * input_dim
    assert input_dim <= LANE and hidden_dim <= LANE, "kernel assumes dims <= 128"
    (w_ih1, w_hh1, b_ih1, b_hh1,
     w_ih2, w_hh2, b_ih2, b_hh2,
     w_out, b_out) = params
    wih1 = _pad_gate_matrix(w_ih1, input_dim, input_dim)
    whh1 = _pad_gate_matrix(w_hh1, input_dim, input_dim)
    b1 = _pad_gate_bias(b_ih1, b_hh1, input_dim)
    wih2 = _pad_gate_matrix(w_ih2, input_dim, hidden_dim)
    whh2 = _pad_gate_matrix(w_hh2, hidden_dim, hidden_dim)
    b2 = _pad_gate_bias(b_ih2, b_hh2, hidden_dim)
    wout = jnp.pad(jnp.asarray(w_out, jnp.float32).reshape(1, hidden_dim),
                   ((0, 0), (0, LANE - hidden_dim)))                 # (1, LANE)
    bout = jnp.asarray(b_out, jnp.float32).reshape(1)                # (1,)
    return (wih1, whh1, b1, wih2, whh2, b2, wout, bout)


# ------------------------------- wrappers -------------------------------------
def decoder_forward_batch(xb, prepped, *, seq_len, input_dim, n_features=1):
    """Decode a batch of latents xb (B, input_dim) -> (B, seq_len, 1).
    Latents are stacked along the matmul M (sublane) dimension in chunks of
    B_TILE; the grid over chunks keeps the weights VMEM-resident and is marked
    "parallel" so v7x's two TensorCores split chunks."""
    assert n_features == 1
    B = xb.shape[0]
    n_chunks = max(1, -(-B // B_TILE))
    Bp = n_chunks * B_TILE
    z = jnp.zeros((Bp, LANE), jnp.float32)
    z = z.at[:B, :input_dim].set(jnp.asarray(xb, jnp.float32).reshape(B, input_dim))

    vmem = pl.BlockSpec(memory_space=pltpu.MemorySpace.VMEM)
    smem = pl.BlockSpec(memory_space=pltpu.MemorySpace.SMEM)
    y = pl.pallas_call(
        decoder_kernel,
        out_shape=jax.ShapeDtypeStruct((Bp, seq_len), jnp.float32),
        grid=(n_chunks,),
        in_specs=[pl.BlockSpec((B_TILE, LANE), lambda b: (b, 0)),   # z (per chunk)
                  vmem, vmem, vmem,                                 # rnn1 weights
                  vmem, vmem, vmem,                                 # rnn2 weights
                  vmem,                                             # wout
                  smem],                                            # bout (scalar)
        out_specs=pl.BlockSpec((B_TILE, seq_len), lambda b: (b, 0)),
        compiler_params=pltpu.CompilerParams(
            dimension_semantics=("parallel",)),
    )(z, *prepped)
    return y[:B].reshape(B, seq_len, n_features)


def decoder_forward(x, prepped, *, seq_len, input_dim, n_features=1):
    """Single-latent path matching Decoder.forward: x (1, input_dim) -> (seq_len, 1)."""
    xb = jnp.asarray(x, jnp.float32).reshape(1, input_dim)
    return decoder_forward_batch(xb, prepped, seq_len=seq_len,
                                 input_dim=input_dim, n_features=n_features)[0]


# --------------------------- pure-JAX reference -------------------------------
def decoder_reference(x, params, *, seq_len, input_dim, n_features=1):
    hidden_dim = 2 * input_dim
    (w_ih1, w_hh1, b_ih1, b_hh1,
     w_ih2, w_hh2, b_ih2, b_hh2,
     w_out, b_out) = params
    z = x.reshape(1, input_dim)
    xs = jnp.broadcast_to(z, (seq_len, input_dim))

    def cell(x_t, h, c, w_ih, w_hh, b_ih, b_hh, hid):
        gates = x_t @ w_ih.T + b_ih + h @ w_hh.T + b_hh
        i = jax.nn.sigmoid(gates[:, :hid])
        f = jax.nn.sigmoid(gates[:, hid:2 * hid])
        g = jnp.tanh(gates[:, 2 * hid:3 * hid])
        o = jax.nn.sigmoid(gates[:, 3 * hid:])
        c = f * c + i * g
        h = o * jnp.tanh(c)
        return h, c

    def step(carry, x_t):
        h1, c1, h2, c2 = carry
        h1, c1 = cell(x_t[None, :], h1, c1, w_ih1, w_hh1, b_ih1, b_hh1, input_dim)
        h2, c2 = cell(h1, h2, c2, w_ih2, w_hh2, b_ih2, b_hh2, hidden_dim)
        return (h1, c1, h2, c2), h2[0]

    init = (jnp.zeros((1, input_dim), jnp.float32),
            jnp.zeros((1, input_dim), jnp.float32),
            jnp.zeros((1, hidden_dim), jnp.float32),
            jnp.zeros((1, hidden_dim), jnp.float32))
    _, hs = lax.scan(step, init, xs)                  # (S, H)
    return hs @ w_out.T + b_out


# ------------------------------ param init ------------------------------------
def init_params(key, input_dim, n_features):
    hidden_dim = 2 * input_dim
    ks = jax.random.split(key, 10)

    def u(k, shape, fan):
        bound = 1.0 / jnp.sqrt(fan)
        return jax.random.uniform(k, shape, jnp.float32, -bound, bound)

    w_ih1 = u(ks[0], (4 * input_dim, input_dim), input_dim)
    w_hh1 = u(ks[1], (4 * input_dim, input_dim), input_dim)
    b_ih1 = u(ks[2], (4 * input_dim,), input_dim)
    b_hh1 = u(ks[3], (4 * input_dim,), input_dim)
    w_ih2 = u(ks[4], (4 * hidden_dim, input_dim), hidden_dim)
    w_hh2 = u(ks[5], (4 * hidden_dim, hidden_dim), hidden_dim)
    b_ih2 = u(ks[6], (4 * hidden_dim,), hidden_dim)
    b_hh2 = u(ks[7], (4 * hidden_dim,), hidden_dim)
    w_out = u(ks[8], (n_features, hidden_dim), hidden_dim)
    b_out = u(ks[9], (n_features,), hidden_dim)
    return (w_ih1, w_hh1, b_ih1, b_hh1,
            w_ih2, w_hh2, b_ih2, b_hh2,
            w_out, b_out)


if __name__ == "__main__":
    seq_len, input_dim, n_features = 8, 32, 1

    key = jax.random.PRNGKey(0)
    k_param, k_x, k_b = jax.random.split(key, 3)
    params = init_params(k_param, input_dim, n_features)
    prepped = prepare_params(params, input_dim, n_features)   # one-time prep

    # ---- single-latent path: exact Decoder.forward semantics ----
    x = jax.random.normal(k_x, (1, input_dim), jnp.float32)   # latent vector
    y = decoder_forward(x, prepped, seq_len=seq_len,
                        input_dim=input_dim, n_features=n_features)
    y = jax.block_until_ready(y)
    y_ref = decoder_reference(x, params, seq_len=seq_len,
                              input_dim=input_dim, n_features=n_features)
    assert y.shape == (seq_len, n_features)
    # Tolerance relaxed vs. the f32 reference because MXU operands are bf16
    # (element-wise state math stays f32); error accumulates over 8 LSTM steps.
    assert jnp.allclose(y, y_ref, rtol=2e-2, atol=2e-2), "mismatch vs reference"

    # ---- batched-throughput path: 16 latents -> grid=(2,) (one chunk per TC on v7x) ----
    xb = jax.random.normal(k_b, (16, input_dim), jnp.float32)
    yb = decoder_forward_batch(xb, prepped, seq_len=seq_len,
                               input_dim=input_dim, n_features=n_features)
    yb = jax.block_until_ready(yb)
    yb_ref = jnp.stack([decoder_reference(xb[i:i + 1], params, seq_len=seq_len,
                                          input_dim=input_dim,
                                          n_features=n_features)
                        for i in range(xb.shape[0])])
    assert yb.shape == (xb.shape[0], seq_len, n_features)
    assert jnp.allclose(yb, yb_ref, rtol=2e-2, atol=2e-2), "batched mismatch"

    print("KERNEL_OK")
</pallas_src>

<mosaic_0001>
module attributes {stable_mosaic.version = 11 : i64} {
  func.func @decoder_kernel(%arg0: i32, %arg1: memref<8x128xf32, #tpu.memory_space<vmem>>, %arg2: memref<128x512xbf16, #tpu.memory_space<vmem>>, %arg3: memref<128x512xbf16, #tpu.memory_space<vmem>>, %arg4: memref<1x512xf32, #tpu.memory_space<vmem>>, %arg5: memref<128x512xbf16, #tpu.memory_space<vmem>>, %arg6: memref<128x512xbf16, #tpu.memory_space<vmem>>, %arg7: memref<1x512xf32, #tpu.memory_space<vmem>>, %arg8: memref<1x128xf32, #tpu.memory_space<vmem>>, %arg9: memref<1xf32, #tpu.memory_space<smem>>, %arg10: memref<8x8xf32, #tpu.memory_space<vmem>>) attributes {dimension_semantics = [#tpu.dimension_semantics<parallel>], iteration_bounds = array<i64: 1>, scalar_prefetch = 0 : i64, scratch_operands = 0 : i64, tpu.core_type = #tpu.core_type<tc>, window_params = [{transform_indices = @transform_0, window_bounds = array<i64: 8, 128>}, {pipeline_mode = #tpu.pipeline_mode<synchronous>, transform_indices = @transform_1, window_bounds = array<i64: 128, 512>}, {pipeline_mode = #tpu.pipeline_mode<synchronous>, transform_indices = @transform_2, window_bounds = array<i64: 128, 512>}, {pipeline_mode = #tpu.pipeline_mode<synchronous>, transform_indices = @transform_3, window_bounds = array<i64: 1, 512>}, {pipeline_mode = #tpu.pipeline_mode<synchronous>, transform_indices = @transform_4, window_bounds = array<i64: 128, 512>}, {pipeline_mode = #tpu.pipeline_mode<synchronous>, transform_indices = @transform_5, window_bounds = array<i64: 128, 512>}, {pipeline_mode = #tpu.pipeline_mode<synchronous>, transform_indices = @transform_6, window_bounds = array<i64: 1, 512>}, {pipeline_mode = #tpu.pipeline_mode<synchronous>, transform_indices = @transform_7, window_bounds = array<i64: 1, 128>}, {transform_indices = @transform_8, window_bounds = array<i64: 1>}, {transform_indices = @transform_9, window_bounds = array<i64: 8, 8>}]} {
    %c0 = arith.constant 0 : index
    %c0_0 = arith.constant 0 : index
    %0 = vector.load %arg3[%c0, %c0_0] : memref<128x512xbf16, #tpu.memory_space<vmem>>, vector<128x512xbf16>
    %c0_1 = arith.constant 0 : index
    %c0_2 = arith.constant 0 : index
    %1 = vector.load %arg5[%c0_1, %c0_2] : memref<128x512xbf16, #tpu.memory_space<vmem>>, vector<128x512xbf16>
    %c0_3 = arith.constant 0 : index
    %c0_4 = arith.constant 0 : index
    %2 = vector.load %arg6[%c0_3, %c0_4] : memref<128x512xbf16, #tpu.memory_space<vmem>>, vector<128x512xbf16>
    %c0_5 = arith.constant 0 : index
    %c0_6 = arith.constant 0 : index
    %3 = vector.load %arg7[%c0_5, %c0_6] : memref<1x512xf32, #tpu.memory_space<vmem>>, vector<1x512xf32>
    %c0_7 = arith.constant 0 : index
    %c0_8 = arith.constant 0 : index
    %4 = vector.load %arg8[%c0_7, %c0_8] : memref<1x128xf32, #tpu.memory_space<vmem>>, vector<1x128xf32>
    %c0_9 = arith.constant 0 : index
    %5 = memref.load %arg9[%c0_9] : memref<1xf32, #tpu.memory_space<smem>>
    %c0_10 = arith.constant 0 : index
    %c0_11 = arith.constant 0 : index
    %6 = vector.load %arg1[%c0_10, %c0_11] : memref<8x128xf32, #tpu.memory_space<vmem>>, vector<8x128xf32>
    %7 = arith.truncf %6 : vector<8x128xf32> to vector<8x128xbf16>
    %c0_12 = arith.constant 0 : index
    %c0_13 = arith.constant 0 : index
    %8 = vector.load %arg2[%c0_12, %c0_13] : memref<128x512xbf16, #tpu.memory_space<vmem>>, vector<128x512xbf16>
    %cst = arith.constant dense<0.000000e+00> : vector<8x512xf32>
    %9 = tpu.matmul %7, %8, %cst {dimension_numbers = #tpu.dot_dimension_numbers<[1], [0], [0], [1], [0, 0, 1, 1], [], []>} : vector<8x128xbf16>, vector<128x512xbf16>, vector<8x512xf32> -> vector<8x512xf32>
    %c0_14 = arith.constant 0 : index
    %c0_15 = arith.constant 0 : index
    %10 = vector.load %arg4[%c0_14, %c0_15] : memref<1x512xf32, #tpu.memory_space<vmem>>, vector<1x512xf32>
    %11 = vector.broadcast %10 : vector<1x512xf32> to vector<8x512xf32>
    %12 = arith.addf %9, %11 : vector<8x512xf32>
    %cst_16 = arith.constant 0.000000e+00 : f32
    %13 = vector.broadcast %cst_16 : f32 to vector<8x128xf32>
    %cst_17 = arith.constant 0.000000e+00 : f32
    %14 = vector.broadcast %cst_17 : f32 to vector<8x128xf32>
    %cst_18 = arith.constant 0.000000e+00 : f32
    %15 = vector.broadcast %cst_18 : f32 to vector<8x128xf32>
    %cst_19 = arith.constant 0.000000e+00 : f32
    %16 = vector.broadcast %cst_19 : f32 to vector<8x128xf32>
    %17 = arith.truncf %13 : vector<8x128xf32> to vector<8x128xbf16>
    %cst_20 = arith.constant dense<0.000000e+00> : vector<8x512xf32>
    %18 = tpu.matmul %17, %0, %cst_20 {dimension_numbers = #tpu.dot_dimension_numbers<[1], [0], [0], [1], [0, 0, 1, 1], [], []>} : vector<8x128xbf16>, vector<128x512xbf16>, vector<8x512xf32> -> vector<8x512xf32>
    %19 = arith.addf %12, %18 : vector<8x512xf32>
    %20 = vector.extract_strided_slice %19 {offsets = [0, 0], sizes = [8, 128], strides = [1, 1]} : vector<8x512xf32> to vector<8x128xf32>
    %21 = arith.negf %20 : vector<8x128xf32>
    %22 = math.exp %21 : vector<8x128xf32>
    %cst_21 = arith.constant 1.000000e+00 : f32
    %23 = vector.broadcast %cst_21 : f32 to vector<8x128xf32>
    %24 = arith.addf %23, %22 : vector<8x128xf32>
    %25 = arith.divf %23, %24 : vector<8x128xf32>
    %26 = vector.extract_strided_slice %19 {offsets = [0, 128], sizes = [8, 128], strides = [1, 1]} : vector<8x512xf32> to vector<8x128xf32>
    %27 = arith.negf %26 : vector<8x128xf32>
    %28 = math.exp %27 : vector<8x128xf32>
    %cst_22 = arith.constant 1.000000e+00 : f32
    %29 = vector.broadcast %cst_22 : f32 to vector<8x128xf32>
    %30 = arith.addf %29, %28 : vector<8x128xf32>
    %31 = arith.divf %29, %30 : vector<8x128xf32>
    %32 = vector.extract_strided_slice %19 {offsets = [0, 256], sizes = [8, 128], strides = [1, 1]} : vector<8x512xf32> to vector<8x128xf32>
    %33 = math.tanh %32 : vector<8x128xf32>
    %34 = vector.extract_strided_slice %19 {offsets = [0, 384], sizes = [8, 128], strides = [1, 1]} : vector<8x512xf32> to vector<8x128xf32>
    %35 = arith.negf %34 : vector<8x128xf32>
    %36 = math.exp %35 : vector<8x128xf32>
    %cst_23 = arith.constant 1.000000e+00 : f32
    %37 = vector.broadcast %cst_23 : f32 to vector<8x128xf32>
    %38 = arith.addf %37, %36 : vector<8x128xf32>
    %39 = arith.divf %37, %38 : vector<8x128xf32>
    %40 = arith.mulf %31, %14 : vector<8x128xf32>
    %41 = arith.mulf %25, %33 : vector<8x128xf32>
    %42 = arith.addf %40, %41 : vector<8x128xf32>
    %43 = math.tanh %42 : vector<8x128xf32>
    %44 = arith.mulf %39, %43 : vector<8x128xf32>
    %45 = arith.truncf %44 : vector<8x128xf32> to vector<8x128xbf16>
    %cst_24 = arith.constant dense<0.000000e+00> : vector<8x512xf32>
    %46 = tpu.matmul %45, %1, %cst_24 {dimension_numbers = #tpu.dot_dimension_numbers<[1], [0], [0], [1], [0, 0, 1, 1], [], []>} : vector<8x128xbf16>, vector<128x512xbf16>, vector<8x512xf32> -> vector<8x512xf32>
    %47 = vector.broadcast %3 : vector<1x512xf32> to vector<8x512xf32>
    %48 = arith.addf %46, %47 : vector<8x512xf32>
    %49 = arith.truncf %15 : vector<8x128xf32> to vector<8x128xbf16>
    %cst_25 = arith.constant dense<0.000000e+00> : vector<8x512xf32>
    %50 = tpu.matmul %49, %2, %cst_25 {dimension_numbers = #tpu.dot_dimension_numbers<[1], [0], [0], [1], [0, 0, 1, 1], [], []>} : vector<8x128xbf16>, vector<128x512xbf16>, vector<8x512xf32> -> vector<8x512xf32>
    %51 = arith.addf %48, %50 : vector<8x512xf32>
    %52 = vector.extract_strided_slice %51 {offsets = [0, 0], sizes = [8, 128], strides = [1, 1]} : vector<8x512xf32> to vector<8x128xf32>
    %53 = arith.negf %52 : vector<8x128xf32>
    %54 = math.exp %53 : vector<8x128xf32>
    %cst_26 = arith.constant 1.000000e+00 : f32
    %55 = vector.broadcast %cst_26 : f32 to vector<8x128xf32>
    %56 = arith.addf %55, %54 : vector<8x128xf32>
    %57 = arith.divf %55, %56 : vector<8x128xf32>
    %58 = vector.extract_strided_slice %51 {offsets = [0, 128], sizes = [8, 128], strides = [1, 1]} : vector<8x512xf32> to vector<8x128xf32>
    %59 = arith.negf %58 : vector<8x128xf32>
    %60 = math.exp %59 : vector<8x128xf32>
    %cst_27 = arith.constant 1.000000e+00 : f32
    %61 = vector.broadcast %cst_27 : f32 to vector<8x128xf32>
    %62 = arith.addf %61, %60 : vector<8x128xf32>
    %63 = arith.divf %61, %62 : vector<8x128xf32>
    %64 = vector.extract_strided_slice %51 {offsets = [0, 256], sizes = [8, 128], strides = [1, 1]} : vector<8x512xf32> to vector<8x128xf32>
    %65 = math.tanh %64 : vector<8x128xf32>
    %66 = vector.extract_strided_slice %51 {offsets = [0, 384], sizes = [8, 128], strides = [1, 1]} : vector<8x512xf32> to vector<8x128xf32>
    %67 = arith.negf %66 : vector<8x128xf32>
    %68 = math.exp %67 : vector<8x128xf32>
    %cst_28 = arith.constant 1.000000e+00 : f32
    %69 = vector.broadcast %cst_28 : f32 to vector<8x128xf32>
    %70 = arith.addf %69, %68 : vector<8x128xf32>
    %71 = arith.divf %69, %70 : vector<8x128xf32>
    %72 = arith.mulf %63, %16 : vector<8x128xf32>
    %73 = arith.mulf %57, %65 : vector<8x128xf32>
    %74 = arith.addf %72, %73 : vector<8x128xf32>
    %75 = math.tanh %74 : vector<8x128xf32>
    %76 = arith.mulf %71, %75 : vector<8x128xf32>
    %77 = vector.broadcast %4 : vector<1x128xf32> to vector<8x128xf32>
    %78 = arith.mulf %76, %77 : vector<8x128xf32>
    %cst_29 = arith.constant dense<0.000000e+00> : vector<8xf32>
    %79 = vector.multi_reduction <add>, %78, %cst_29 [1] : vector<8x128xf32> to vector<8xf32>
    %80 = vector.shape_cast %79 : vector<8xf32> to vector<8x1xf32>
    %81 = vector.broadcast %5 : f32 to vector<8x1xf32>
    %82 = arith.addf %80, %81 : vector<8x1xf32>
    %c0_30 = arith.constant 0 : index
    %c0_31 = arith.constant 0 : index
    %83 = vector.load %arg10[%c0_30, %c0_31] : memref<8x8xf32, #tpu.memory_space<vmem>>, vector<8x1xf32>
    tpu.vector_store %arg10[%c0_30, %c0_31], %82 {strides = array<i32>} : memref<8x8xf32, #tpu.memory_space<vmem>>, vector<8x1xf32>,
    %84 = arith.truncf %44 : vector<8x128xf32> to vector<8x128xbf16>
    %cst_32 = arith.constant dense<0.000000e+00> : vector<8x512xf32>
    %85 = tpu.matmul %84, %0, %cst_32 {dimension_numbers = #tpu.dot_dimension_numbers<[1], [0], [0], [1], [0, 0, 1, 1], [], []>} : vector<8x128xbf16>, vector<128x512xbf16>, vector<8x512xf32> -> vector<8x512xf32>
    %86 = arith.addf %12, %85 : vector<8x512xf32>
    %87 = vector.extract_strided_slice %86 {offsets = [0, 0], sizes = [8, 128], strides = [1, 1]} : vector<8x512xf32> to vector<8x128xf32>
    %88 = arith.negf %87 : vector<8x128xf32>
    %89 = math.exp %88 : vector<8x128xf32>
    %cst_33 = arith.constant 1.000000e+00 : f32
    %90 = vector.broadcast %cst_33 : f32 to vector<8x128xf32>
    %91 = arith.addf %90, %89 : vector<8x128xf32>
    %92 = arith.divf %90, %91 : vector<8x128xf32>
    %93 = vector.extract_strided_slice %86 {offsets = [0, 128], sizes = [8, 128], strides = [1, 1]} : vector<8x512xf32> to vector<8x128xf32>
    %94 = arith.negf %93 : vector<8x128xf32>
    %95 = math.exp %94 : vector<8x128xf32>
    %cst_34 = arith.constant 1.000000e+00 : f32
    %96 = vector.broadcast %cst_34 : f32 to vector<8x128xf32>
    %97 = arith.addf %96, %95 : vector<8x128xf32>
    %98 = arith.divf %96, %97 : vector<8x128xf32>
    %99 = vector.extract_strided_slice %86 {offsets = [0, 256], sizes = [8, 128], strides = [1, 1]} : vector<8x512xf32> to vector<8x128xf32>
    %100 = math.tanh %99 : vector<8x128xf32>
    %101 = vector.extract_strided_slice %86 {offsets = [0, 384], sizes = [8, 128], strides = [1, 1]} : vector<8x512xf32> to vector<8x128xf32>
    %102 = arith.negf %101 : vector<8x128xf32>
    %103 = math.exp %102 : vector<8x128xf32>
    %cst_35 = arith.constant 1.000000e+00 : f32
    %104 = vector.broadcast %cst_35 : f32 to vector<8x128xf32>
    %105 = arith.addf %104, %103 : vector<8x128xf32>
    %106 = arith.divf %104, %105 : vector<8x128xf32>
    %107 = arith.mulf %98, %42 : vector<8x128xf32>
    %108 = arith.mulf %92, %100 : vector<8x128xf32>
    %109 = arith.addf %107, %108 : vector<8x128xf32>
    %110 = math.tanh %109 : vector<8x128xf32>
    %111 = arith.mulf %106, %110 : vector<8x128xf32>
    %112 = arith.truncf %111 : vector<8x128xf32> to vector<8x128xbf16>
    %cst_36 = arith.constant dense<0.000000e+00> : vector<8x512xf32>
    %113 = tpu.matmul %112, %1, %cst_36 {dimension_numbers = #tpu.dot_dimension_numbers<[1], [0], [0], [1], [0, 0, 1, 1], [], []>} : vector<8x128xbf16>, vector<128x512xbf16>, vector<8x512xf32> -> vector<8x512xf32>
    %114 = vector.broadcast %3 : vector<1x512xf32> to vector<8x512xf32>
    %115 = arith.addf %113, %114 : vector<8x512xf32>
    %116 = arith.truncf %76 : vector<8x128xf32> to vector<8x128xbf16>
    %cst_37 = arith.constant dense<0.000000e+00> : vector<8x512xf32>
    %117 = tpu.matmul %116, %2, %cst_37 {dimension_numbers = #tpu.dot_dimension_numbers<[1], [0], [0], [1], [0, 0, 1, 1], [], []>} : vector<8x128xbf16>, vector<128x512xbf16>, vector<8x512xf32> -> vector<8x512xf32>
    %118 = arith.addf %115, %117 : vector<8x512xf32>
    %119 = vector.extract_strided_slice %118 {offsets = [0, 0], sizes = [8, 128], strides = [1, 1]} : vector<8x512xf32> to vector<8x128xf32>
    %120 = arith.negf %119 : vector<8x128xf32>
    %121 = math.exp %120 : vector<8x128xf32>
    %cst_38 = arith.constant 1.000000e+00 : f32
    %122 = vector.broadcast %cst_38 : f32 to vector<8x128xf32>
    %123 = arith.addf %122, %121 : vector<8x128xf32>
    %124 = arith.divf %122, %123 : vector<8x128xf32>
    %125 = vector.extract_strided_slice %118 {offsets = [0, 128], sizes = [8, 128], strides = [1, 1]} : vector<8x512xf32> to vector<8x128xf32>
    %126 = arith.negf %125 : vector<8x128xf32>
    %127 = math.exp %126 : vector<8x128xf32>
    %cst_39 = arith.constant 1.000000e+00 : f32
    %128 = vector.broadcast %cst_39 : f32 to vector<8x128xf32>
    %129 = arith.addf %128, %127 : vector<8x128xf32>
    %130 = arith.divf %128, %129 : vector<8x128xf32>
    %131 = vector.extract_strided_slice %118 {offsets = [0, 256], sizes = [8, 128], strides = [1, 1]} : vector<8x512xf32> to vector<8x128xf32>
    %132 = math.tanh %131 : vector<8x128xf32>
    %133 = vector.extract_strided_slice %118 {offsets = [0, 384], sizes = [8, 128], strides = [1, 1]} : vector<8x512xf32> to vector<8x128xf32>
    %134 = arith.negf %133 : vector<8x128xf32>
    %135 = math.exp %134 : vector<8x128xf32>
    %cst_40 = arith.constant 1.000000e+00 : f32
    %136 = vector.broadcast %cst_40 : f32 to vector<8x128xf32>
    %137 = arith.addf %136, %135 : vector<8x128xf32>
    %138 = arith.divf %136, %137 : vector<8x128xf32>
    %139 = arith.mulf %130, %74 : vector<8x128xf32>
    %140 = arith.mulf %124, %132 : vector<8x128xf32>
    %141 = arith.addf %139, %140 : vector<8x128xf32>
    %142 = math.tanh %141 : vector<8x128xf32>
    %143 = arith.mulf %138, %142 : vector<8x128xf32>
    %144 = vector.broadcast %4 : vector<1x128xf32> to vector<8x128xf32>
    %145 = arith.mulf %143, %144 : vector<8x128xf32>
    %cst_41 = arith.constant dense<0.000000e+00> : vector<8xf32>
    %146 = vector.multi_reduction <add>, %145, %cst_41 [1] : vector<8x128xf32> to vector<8xf32>
    %147 = vector.shape_cast %146 : vector<8xf32> to vector<8x1xf32>
    %148 = vector.broadcast %5 : f32 to vector<8x1xf32>
    %149 = arith.addf %147, %148 : vector<8x1xf32>
    %c0_42 = arith.constant 0 : index
    %c1 = arith.constant 1 : index
    %150 = vector.load %arg10[%c0_42, %c1] : memref<8x8xf32, #tpu.memory_space<vmem>>, vector<8x1xf32>
    tpu.vector_store %arg10[%c0_42, %c1], %149 {strides = array<i32>} : memref<8x8xf32, #tpu.memory_space<vmem>>, vector<8x1xf32>,
    %151 = arith.truncf %111 : vector<8x128xf32> to vector<8x128xbf16>
    %cst_43 = arith.constant dense<0.000000e+00> : vector<8x512xf32>
    %152 = tpu.matmul %151, %0, %cst_43 {dimension_numbers = #tpu.dot_dimension_numbers<[1], [0], [0], [1], [0, 0, 1, 1], [], []>} : vector<8x128xbf16>, vector<128x512xbf16>, vector<8x512xf32> -> vector<8x512xf32>
    %153 = arith.addf %12, %152 : vector<8x512xf32>
    %154 = vector.extract_strided_slice %153 {offsets = [0, 0], sizes = [8, 128], strides = [1, 1]} : vector<8x512xf32> to vector<8x128xf32>
    %155 = arith.negf %154 : vector<8x128xf32>
    %156 = math.exp %155 : vector<8x128xf32>
    %cst_44 = arith.constant 1.000000e+00 : f32
    %157 = vector.broadcast %cst_44 : f32 to vector<8x128xf32>
    %158 = arith.addf %157, %156 : vector<8x128xf32>
    %159 = arith.divf %157, %158 : vector<8x128xf32>
    %160 = vector.extract_strided_slice %153 {offsets = [0, 128], sizes = [8, 128], strides = [1, 1]} : vector<8x512xf32> to vector<8x128xf32>
    %161 = arith.negf %160 : vector<8x128xf32>
    %162 = math.exp %161 : vector<8x128xf32>
    %cst_45 = arith.constant 1.000000e+00 : f32
    %163 = vector.broadcast %cst_45 : f32 to vector<8x128xf32>
    %164 = arith.addf %163, %162 : vector<8x128xf32>
    %165 = arith.divf %163, %164 : vector<8x128xf32>
    %166 = vector.extract_strided_slice %153 {offsets = [0, 256], sizes = [8, 128], strides = [1, 1]} : vector<8x512xf32> to vector<8x128xf32>
    %167 = math.tanh %166 : vector<8x128xf32>
    %168 = vector.extract_strided_slice %153 {offsets = [0, 384], sizes = [8, 128], strides = [1, 1]} : vector<8x512xf32> to vector<8x128xf32>
    %169 = arith.negf %168 : vector<8x128xf32>
    %170 = math.exp %169 : vector<8x128xf32>
    %cst_46 = arith.constant 1.000000e+00 : f32
    %171 = vector.broadcast %cst_46 : f32 to vector<8x128xf32>
    %172 = arith.addf %171, %170 : vector<8x128xf32>
    %173 = arith.divf %171, %172 : vector<8x128xf32>
    %174 = arith.mulf %165, %109 : vector<8x128xf32>
    %175 = arith.mulf %159, %167 : vector<8x128xf32>
    %176 = arith.addf %174, %175 : vector<8x128xf32>
    %177 = math.tanh %176 : vector<8x128xf32>
    %178 = arith.mulf %173, %177 : vector<8x128xf32>
    %179 = arith.truncf %178 : vector<8x128xf32> to vector<8x128xbf16>
    %cst_47 = arith.constant dense<0.000000e+00> : vector<8x512xf32>
    %180 = tpu.matmul %179, %1, %cst_47 {dimension_numbers = #tpu.dot_dimension_numbers<[1], [0], [0], [1], [0, 0, 1, 1], [], []>} : vector<8x128xbf16>, vector<128x512xbf16>, vector<8x512xf32> -> vector<8x512xf32>
    %181 = vector.broadcast %3 : vector<1x512xf32> to vector<8x512xf32>
    %182 = arith.addf %180, %181 : vector<8x512xf32>
    %183 = arith.truncf %143 : vector<8x128xf32> to vector<8x128xbf16>
    %cst_48 = arith.constant dense<0.000000e+00> : vector<8x512xf32>
    %184 = tpu.matmul %183, %2, %cst_48 {dimension_numbers = #tpu.dot_dimension_numbers<[1], [0], [0], [1], [0, 0, 1, 1], [], []>} : vector<8x128xbf16>, vector<128x512xbf16>, vector<8x512xf32> -> vector<8x512xf32>
    %185 = arith.addf %182, %184 : vector<8x512xf32>
    %186 = vector.extract_strided_slice %185 {offsets = [0, 0], sizes = [8, 128], strides = [1, 1]} : vector<8x512xf32> to vector<8x128xf32>
    %187 = arith.negf %186 : vector<8x128xf32>
    %188 = math.exp %187 : vector<8x128xf32>
    %cst_49 = arith.constant 1.000000e+00 : f32
    %189 = vector.broadcast %cst_49 : f32 to vector<8x128xf32>
    %190 = arith.addf %189, %188 : vector<8x128xf32>
    %191 = arith.divf %189, %190 : vector<8x128xf32>
    %192 = vector.extract_strided_slice %185 {offsets = [0, 128], sizes = [8, 128], strides = [1, 1]} : vector<8x512xf32> to vector<8x128xf32>
    %193 = arith.negf %192 : vector<8x128xf32>
    %194 = math.exp %193 : vector<8x128xf32>
    %cst_50 = arith.constant 1.000000e+00 : f32
    %195 = vector.broadcast %cst_50 : f32 to vector<8x128xf32>
    %196 = arith.addf %195, %194 : vector<8x128xf32>
    %197 = arith.divf %195, %196 : vector<8x128xf32>
    %198 = vector.extract_strided_slice %185 {offsets = [0, 256], sizes = [8, 128], strides = [1, 1]} : vector<8x512xf32> to vector<8x128xf32>
    %199 = math.tanh %198 : vector<8x128xf32>
    %200 = vector.extract_strided_slice %185 {offsets = [0, 384], sizes = [8, 128], strides = [1, 1]} : vector<8x512xf32> to vector<8x128xf32>
    %201 = arith.negf %200 : vector<8x128xf32>
    %202 = math.exp %201 : vector<8x128xf32>
    %cst_51 = arith.constant 1.000000e+00 : f32
    %203 = vector.broadcast %cst_51 : f32 to vector<8x128xf32>
    %204 = arith.addf %203, %202 : vector<8x128xf32>
    %205 = arith.divf %203, %204 : vector<8x128xf32>
    %206 = arith.mulf %197, %141 : vector<8x128xf32>
    %207 = arith.mulf %191, %199 : vector<8x128xf32>
    %208 = arith.addf %206, %207 : vector<8x128xf32>
    %209 = math.tanh %208 : vector<8x128xf32>
    %210 = arith.mulf %205, %209 : vector<8x128xf32>
    %211 = vector.broadcast %4 : vector<1x128xf32> to vector<8x128xf32>
    %212 = arith.mulf %210, %211 : vector<8x128xf32>
    %cst_52 = arith.constant dense<0.000000e+00> : vector<8xf32>
    %213 = vector.multi_reduction <add>, %212, %cst_52 [1] : vector<8x128xf32> to vector<8xf32>
    %214 = vector.shape_cast %213 : vector<8xf32> to vector<8x1xf32>
    %215 = vector.broadcast %5 : f32 to vector<8x1xf32>
    %216 = arith.addf %214, %215 : vector<8x1xf32>
    %c0_53 = arith.constant 0 : index
    %c2 = arith.constant 2 : index
    %217 = vector.load %arg10[%c0_53, %c2] : memref<8x8xf32, #tpu.memory_space<vmem>>, vector<8x1xf32>
    tpu.vector_store %arg10[%c0_53, %c2], %216 {strides = array<i32>} : memref<8x8xf32, #tpu.memory_space<vmem>>, vector<8x1xf32>,
    %218 = arith.truncf %178 : vector<8x128xf32> to vector<8x128xbf16>
    %cst_54 = arith.constant dense<0.000000e+00> : vector<8x512xf32>
    %219 = tpu.matmul %218, %0, %cst_54 {dimension_numbers = #tpu.dot_dimension_numbers<[1], [0], [0], [1], [0, 0, 1, 1], [], []>} : vector<8x128xbf16>, vector<128x512xbf16>, vector<8x512xf32> -> vector<8x512xf32>
    %220 = arith.addf %12, %219 : vector<8x512xf32>
    %221 = vector.extract_strided_slice %220 {offsets = [0, 0], sizes = [8, 128], strides = [1, 1]} : vector<8x512xf32> to vector<8x128xf32>
    %222 = arith.negf %221 : vector<8x128xf32>
    %223 = math.exp %222 : vector<8x128xf32>
    %cst_55 = arith.constant 1.000000e+00 : f32
    %224 = vector.broadcast %cst_55 : f32 to vector<8x128xf32>
    %225 = arith.addf %224, %223 : vector<8x128xf32>
    %226 = arith.divf %224, %225 : vector<8x128xf32>
    %227 = vector.extract_strided_slice %220 {offsets = [0, 128], sizes = [8, 128], strides = [1, 1]} : vector<8x512xf32> to vector<8x128xf32>
    %228 = arith.negf %227 : vector<8x128xf32>
    %229 = math.exp %228 : vector<8x128xf32>
    %cst_56 = arith.constant 1.000000e+00 : f32
    %230 = vector.broadcast %cst_56 : f32 to vector<8x128xf32>
    %231 = arith.addf %230, %229 : vector<8x128xf32>
    %232 = arith.divf %230, %231 : vector<8x128xf32>
    %233 = vector.extract_strided_slice %220 {offsets = [0, 256], sizes = [8, 128], strides = [1, 1]} : vector<8x512xf32> to vector<8x128xf32>
    %234 = math.tanh %233 : vector<8x128xf32>
    %235 = vector.extract_strided_slice %220 {offsets = [0, 384], sizes = [8, 128], strides = [1, 1]} : vector<8x512xf32> to vector<8x128xf32>
    %236 = arith.negf %235 : vector<8x128xf32>
    %237 = math.exp %236 : vector<8x128xf32>
    %cst_57 = arith.constant 1.000000e+00 : f32
    %238 = vector.broadcast %cst_57 : f32 to vector<8x128xf32>
    %239 = arith.addf %238, %237 : vector<8x128xf32>
    %240 = arith.divf %238, %239 : vector<8x128xf32>
    %241 = arith.mulf %232, %176 : vector<8x128xf32>
    %242 = arith.mulf %226, %234 : vector<8x128xf32>
    %243 = arith.addf %241, %242 : vector<8x128xf32>
    %244 = math.tanh %243 : vector<8x128xf32>
    %245 = arith.mulf %240, %244 : vector<8x128xf32>
    %246 = arith.truncf %245 : vector<8x128xf32> to vector<8x128xbf16>
    %cst_58 = arith.constant dense<0.000000e+00> : vector<8x512xf32>
    %247 = tpu.matmul %246, %1, %cst_58 {dimension_numbers = #tpu.dot_dimension_numbers<[1], [0], [0], [1], [0, 0, 1, 1], [], []>} : vector<8x128xbf16>, vector<128x512xbf16>, vector<8x512xf32> -> vector<8x512xf32>
    %248 = vector.broadcast %3 : vector<1x512xf32> to vector<8x512xf32>
    %249 = arith.addf %247, %248 : vector<8x512xf32>
    %250 = arith.truncf %210 : vector<8x128xf32> to vector<8x128xbf16>
    %cst_59 = arith.constant dense<0.000000e+00> : vector<8x512xf32>
    %251 = tpu.matmul %250, %2, %cst_59 {dimension_numbers = #tpu.dot_dimension_numbers<[1], [0], [0], [1], [0, 0, 1, 1], [], []>} : vector<8x128xbf16>, vector<128x512xbf16>, vector<8x512xf32> -> vector<8x512xf32>
    %252 = arith.addf %249, %251 : vector<8x512xf32>
    %253 = vector.extract_strided_slice %252 {offsets = [0, 0], sizes = [8, 128], strides = [1, 1]} : vector<8x512xf32> to vector<8x128xf32>
    %254 = arith.negf %253 : vector<8x128xf32>
    %255 = math.exp %254 : vector<8x128xf32>
    %cst_60 = arith.constant 1.000000e+00 : f32
    %256 = vector.broadcast %cst_60 : f32 to vector<8x128xf32>
    %257 = arith.addf %256, %255 : vector<8x128xf32>
    %258 = arith.divf %256, %257 : vector<8x128xf32>
    %259 = vector.extract_strided_slice %252 {offsets = [0, 128], sizes = [8, 128], strides = [1, 1]} : vector<8x512xf32> to vector<8x128xf32>
    %260 = arith.negf %259 : vector<8x128xf32>
    %261 = math.exp %260 : vector<8x128xf32>
    %cst_61 = arith.constant 1.000000e+00 : f32
    %262 = vector.broadcast %cst_61 : f32 to vector<8x128xf32>
    %263 = arith.addf %262, %261 : vector<8x128xf32>
    %264 = arith.divf %262, %263 : vector<8x128xf32>
    %265 = vector.extract_strided_slice %252 {offsets = [0, 256], sizes = [8, 128], strides = [1, 1]} : vector<8x512xf32> to vector<8x128xf32>
    %266 = math.tanh %265 : vector<8x128xf32>
    %267 = vector.extract_strided_slice %252 {offsets = [0, 384], sizes = [8, 128], strides = [1, 1]} : vector<8x512xf32> to vector<8x128xf32>
    %268 = arith.negf %267 : vector<8x128xf32>
    %269 = math.exp %268 : vector<8x128xf32>
    %cst_62 = arith.constant 1.000000e+00 : f32
    %270 = vector.broadcast %cst_62 : f32 to vector<8x128xf32>
    %271 = arith.addf %270, %269 : vector<8x128xf32>
    %272 = arith.divf %270, %271 : vector<8x128xf32>
    %273 = arith.mulf %264, %208 : vector<8x128xf32>
    %274 = arith.mulf %258, %266 : vector<8x128xf32>
    %275 = arith.addf %273, %274 : vector<8x128xf32>
    %276 = math.tanh %275 : vector<8x128xf32>
    %277 = arith.mulf %272, %276 : vector<8x128xf32>
    %278 = vector.broadcast %4 : vector<1x128xf32> to vector<8x128xf32>
    %279 = arith.mulf %277, %278 : vector<8x128xf32>
    %cst_63 = arith.constant dense<0.000000e+00> : vector<8xf32>
    %280 = vector.multi_reduction <add>, %279, %cst_63 [1] : vector<8x128xf32> to vector<8xf32>
    %281 = vector.shape_cast %280 : vector<8xf32> to vector<8x1xf32>
    %282 = vector.broadcast %5 : f32 to vector<8x1xf32>
    %283 = arith.addf %281, %282 : vector<8x1xf32>
    %c0_64 = arith.constant 0 : index
    %c3 = arith.constant 3 : index
    %284 = vector.load %arg10[%c0_64, %c3] : memref<8x8xf32, #tpu.memory_space<vmem>>, vector<8x1xf32>
    tpu.vector_store %arg10[%c0_64, %c3], %283 {strides = array<i32>} : memref<8x8xf32, #tpu.memory_space<vmem>>, vector<8x1xf32>,
    %285 = arith.truncf %245 : vector<8x128xf32> to vector<8x128xbf16>
    %cst_65 = arith.constant dense<0.000000e+00> : vector<8x512xf32>
    %286 = tpu.matmul %285, %0, %cst_65 {dimension_numbers = #tpu.dot_dimension_numbers<[1], [0], [0], [1], [0, 0, 1, 1], [], []>} : vector<8x128xbf16>, vector<128x512xbf16>, vector<8x512xf32> -> vector<8x512xf32>
    %287 = arith.addf %12, %286 : vector<8x512xf32>
    %288 = vector.extract_strided_slice %287 {offsets = [0, 0], sizes = [8, 128], strides = [1, 1]} : vector<8x512xf32> to vector<8x128xf32>
    %289 = arith.negf %288 : vector<8x128xf32>
    %290 = math.exp %289 : vector<8x128xf32>
    %cst_66 = arith.constant 1.000000e+00 : f32
    %291 = vector.broadcast %cst_66 : f32 to vector<8x128xf32>
    %292 = arith.addf %291, %290 : vector<8x128xf32>
    %293 = arith.divf %291, %292 : vector<8x128xf32>
    %294 = vector.extract_strided_slice %287 {offsets = [0, 128], sizes = [8, 128], strides = [1, 1]} : vector<8x512xf32> to vector<8x128xf32>
    %295 = arith.negf %294 : vector<8x128xf32>
    %296 = math.exp %295 : vector<8x128xf32>
    %cst_67 = arith.constant 1.000000e+00 : f32
    %297 = vector.broadcast %cst_67 : f32 to vector<8x128xf32>
    %298 = arith.addf %297, %296 : vector<8x128xf32>
    %299 = arith.divf %297, %298 : vector<8x128xf32>
    %300 = vector.extract_strided_slice %287 {offsets = [0, 256], sizes = [8, 128], strides = [1, 1]} : vector<8x512xf32> to vector<8x128xf32>
    %301 = math.tanh %300 : vector<8x128xf32>
    %302 = vector.extract_strided_slice %287 {offsets = [0, 384], sizes = [8, 128], strides = [1, 1]} : vector<8x512xf32> to vector<8x128xf32>
    %303 = arith.negf %302 : vector<8x128xf32>
    %304 = math.exp %303 : vector<8x128xf32>
    %cst_68 = arith.constant 1.000000e+00 : f32
    %305 = vector.broadcast %cst_68 : f32 to vector<8x128xf32>
    %306 = arith.addf %305, %304 : vector<8x128xf32>
    %307 = arith.divf %305, %306 : vector<8x128xf32>
    %308 = arith.mulf %299, %243 : vector<8x128xf32>
    %309 = arith.mulf %293, %301 : vector<8x128xf32>
    %310 = arith.addf %308, %309 : vector<8x128xf32>
    %311 = math.tanh %310 : vector<8x128xf32>
    %312 = arith.mulf %307, %311 : vector<8x128xf32>
    %313 = arith.truncf %312 : vector<8x128xf32> to vector<8x128xbf16>
    %cst_69 = arith.constant dense<0.000000e+00> : vector<8x512xf32>
    %314 = tpu.matmul %313, %1, %cst_69 {dimension_numbers = #tpu.dot_dimension_numbers<[1], [0], [0], [1], [0, 0, 1, 1], [], []>} : vector<8x128xbf16>, vector<128x512xbf16>, vector<8x512xf32> -> vector<8x512xf32>
    %315 = vector.broadcast %3 : vector<1x512xf32> to vector<8x512xf32>
    %316 = arith.addf %314, %315 : vector<8x512xf32>
    %317 = arith.truncf %277 : vector<8x128xf32> to vector<8x128xbf16>
    %cst_70 = arith.constant dense<0.000000e+00> : vector<8x512xf32>
    %318 = tpu.matmul %317, %2, %cst_70 {dimension_numbers = #tpu.dot_dimension_numbers<[1], [0], [0], [1], [0, 0, 1, 1], [], []>} : vector<8x128xbf16>, vector<128x512xbf16>, vector<8x512xf32> -> vector<8x512xf32>
    %319 = arith.addf %316, %318 : vector<8x512xf32>
    %320 = vector.extract_strided_slice %319 {offsets = [0, 0], sizes = [8, 128], strides = [1, 1]} : vector<8x512xf32> to vector<8x128xf32>
    %321 = arith.negf %320 : vector<8x128xf32>
    %322 = math.exp %321 : vector<8x128xf32>
    %cst_71 = arith.constant 1.000000e+00 : f32
    %323 = vector.broadcast %cst_71 : f32 to vector<8x128xf32>
    %324 = arith.addf %323, %322 : vector<8x128xf32>
    %325 = arith.divf %323, %324 : vector<8x128xf32>
    %326 = vector.extract_strided_slice %319 {offsets = [0, 128], sizes = [8, 128], strides = [1, 1]} : vector<8x512xf32> to vector<8x128xf32>
    %327 = arith.negf %326 : vector<8x128xf32>
    %328 = math.exp %327 : vector<8x128xf32>
    %cst_72 = arith.constant 1.000000e+00 : f32
    %329 = vector.broadcast %cst_72 : f32 to vector<8x128xf32>
    %330 = arith.addf %329, %328 : vector<8x128xf32>
    %331 = arith.divf %329, %330 : vector<8x128xf32>
    %332 = vector.extract_strided_slice %319 {offsets = [0, 256], sizes = [8, 128], strides = [1, 1]} : vector<8x512xf32> to vector<8x128xf32>
    %333 = math.tanh %332 : vector<8x128xf32>
    %334 = vector.extract_strided_slice %319 {offsets = [0, 384], sizes = [8, 128], strides = [1, 1]} : vector<8x512xf32> to vector<8x128xf32>
    %335 = arith.negf %334 : vector<8x128xf32>
    %336 = math.exp %335 : vector<8x128xf32>
    %cst_73 = arith.constant 1.000000e+00 : f32
    %337 = vector.broadcast %cst_73 : f32 to vector<8x128xf32>
    %338 = arith.addf %337, %336 : vector<8x128xf32>
    %339 = arith.divf %337, %338 : vector<8x128xf32>
    %340 = arith.mulf %331, %275 : vector<8x128xf32>
    %341 = arith.mulf %325, %333 : vector<8x128xf32>
    %342 = arith.addf %340, %341 : vector<8x128xf32>
    %343 = math.tanh %342 : vector<8x128xf32>
    %344 = arith.mulf %339, %343 : vector<8x128xf32>
    %345 = vector.broadcast %4 : vector<1x128xf32> to vector<8x128xf32>
    %346 = arith.mulf %344, %345 : vector<8x128xf32>
    %cst_74 = arith.constant dense<0.000000e+00> : vector<8xf32>
    %347 = vector.multi_reduction <add>, %346, %cst_74 [1] : vector<8x128xf32> to vector<8xf32>
    %348 = vector.shape_cast %347 : vector<8xf32> to vector<8x1xf32>
    %349 = vector.broadcast %5 : f32 to vector<8x1xf32>
    %350 = arith.addf %348, %349 : vector<8x1xf32>
    %c0_75 = arith.constant 0 : index
    %c4 = arith.constant 4 : index
    %351 = vector.load %arg10[%c0_75, %c4] : memref<8x8xf32, #tpu.memory_space<vmem>>, vector<8x1xf32>
    tpu.vector_store %arg10[%c0_75, %c4], %350 {strides = array<i32>} : memref<8x8xf32, #tpu.memory_space<vmem>>, vector<8x1xf32>,
    %352 = arith.truncf %312 : vector<8x128xf32> to vector<8x128xbf16>
    %cst_76 = arith.constant dense<0.000000e+00> : vector<8x512xf32>
    %353 = tpu.matmul %352, %0, %cst_76 {dimension_numbers = #tpu.dot_dimension_numbers<[1], [0], [0], [1], [0, 0, 1, 1], [], []>} : vector<8x128xbf16>, vector<128x512xbf16>, vector<8x512xf32> -> vector<8x512xf32>
    %354 = arith.addf %12, %353 : vector<8x512xf32>
    %355 = vector.extract_strided_slice %354 {offsets = [0, 0], sizes = [8, 128], strides = [1, 1]} : vector<8x512xf32> to vector<8x128xf32>
    %356 = arith.negf %355 : vector<8x128xf32>
    %357 = math.exp %356 : vector<8x128xf32>
    %cst_77 = arith.constant 1.000000e+00 : f32
    %358 = vector.broadcast %cst_77 : f32 to vector<8x128xf32>
    %359 = arith.addf %358, %357 : vector<8x128xf32>
    %360 = arith.divf %358, %359 : vector<8x128xf32>
    %361 = vector.extract_strided_slice %354 {offsets = [0, 128], sizes = [8, 128], strides = [1, 1]} : vector<8x512xf32> to vector<8x128xf32>
    %362 = arith.negf %361 : vector<8x128xf32>
    %363 = math.exp %362 : vector<8x128xf32>
    %cst_78 = arith.constant 1.000000e+00 : f32
    %364 = vector.broadcast %cst_78 : f32 to vector<8x128xf32>
    %365 = arith.addf %364, %363 : vector<8x128xf32>
    %366 = arith.divf %364, %365 : vector<8x128xf32>
    %367 = vector.extract_strided_slice %354 {offsets = [0, 256], sizes = [8, 128], strides = [1, 1]} : vector<8x512xf32> to vector<8x128xf32>
    %368 = math.tanh %367 : vector<8x128xf32>
    %369 = vector.extract_strided_slice %354 {offsets = [0, 384], sizes = [8, 128], strides = [1, 1]} : vector<8x512xf32> to vector<8x128xf32>
    %370 = arith.negf %369 : vector<8x128xf32>
    %371 = math.exp %370 : vector<8x128xf32>
    %cst_79 = arith.constant 1.000000e+00 : f32
    %372 = vector.broadcast %cst_79 : f32 to vector<8x128xf32>
    %373 = arith.addf %372, %371 : vector<8x128xf32>
    %374 = arith.divf %372, %373 : vector<8x128xf32>
    %375 = arith.mulf %366, %310 : vector<8x128xf32>
    %376 = arith.mulf %360, %368 : vector<8x128xf32>
    %377 = arith.addf %375, %376 : vector<8x128xf32>
    %378 = math.tanh %377 : vector<8x128xf32>
    %379 = arith.mulf %374, %378 : vector<8x128xf32>
    %380 = arith.truncf %379 : vector<8x128xf32> to vector<8x128xbf16>
    %cst_80 = arith.constant dense<0.000000e+00> : vector<8x512xf32>
    %381 = tpu.matmul %380, %1, %cst_80 {dimension_numbers = #tpu.dot_dimension_numbers<[1], [0], [0], [1], [0, 0, 1, 1], [], []>} : vector<8x128xbf16>, vector<128x512xbf16>, vector<8x512xf32> -> vector<8x512xf32>
    %382 = vector.broadcast %3 : vector<1x512xf32> to vector<8x512xf32>
    %383 = arith.addf %381, %382 : vector<8x512xf32>
    %384 = arith.truncf %344 : vector<8x128xf32> to vector<8x128xbf16>
    %cst_81 = arith.constant dense<0.000000e+00> : vector<8x512xf32>
    %385 = tpu.matmul %384, %2, %cst_81 {dimension_numbers = #tpu.dot_dimension_numbers<[1], [0], [0], [1], [0, 0, 1, 1], [], []>} : vector<8x128xbf16>, vector<128x512xbf16>, vector<8x512xf32> -> vector<8x512xf32>
    %386 = arith.addf %383, %385 : vector<8x512xf32>
    %387 = vector.extract_strided_slice %386 {offsets = [0, 0], sizes = [8, 128], strides = [1, 1]} : vector<8x512xf32> to vector<8x128xf32>
    %388 = arith.negf %387 : vector<8x128xf32>
    %389 = math.exp %388 : vector<8x128xf32>
    %cst_82 = arith.constant 1.000000e+00 : f32
    %390 = vector.broadcast %cst_82 : f32 to vector<8x128xf32>
    %391 = arith.addf %390, %389 : vector<8x128xf32>
    %392 = arith.divf %390, %391 : vector<8x128xf32>
    %393 = vector.extract_strided_slice %386 {offsets = [0, 128], sizes = [8, 128], strides = [1, 1]} : vector<8x512xf32> to vector<8x128xf32>
    %394 = arith.negf %393 : vector<8x128xf32>
    %395 = math.exp %394 : vector<8x128xf32>
    %cst_83 = arith.constant 1.000000e+00 : f32
    %396 = vector.broadcast %cst_83 : f32 to vector<8x128xf32>
    %397 = arith.addf %396, %395 : vector<8x128xf32>
    %398 = arith.divf %396, %397 : vector<8x128xf32>
    %399 = vector.extract_strided_slice %386 {offsets = [0, 256], sizes = [8, 128], strides = [1, 1]} : vector<8x512xf32> to vector<8x128xf32>
    %400 = math.tanh %399 : vector<8x128xf32>
    %401 = vector.extract_strided_slice %386 {offsets = [0, 384], sizes = [8, 128], strides = [1, 1]} : vector<8x512xf32> to vector<8x128xf32>
    %402 = arith.negf %401 : vector<8x128xf32>
    %403 = math.exp %402 : vector<8x128xf32>
    %cst_84 = arith.constant 1.000000e+00 : f32
    %404 = vector.broadcast %cst_84 : f32 to vector<8x128xf32>
    %405 = arith.addf %404, %403 : vector<8x128xf32>
    %406 = arith.divf %404, %405 : vector<8x128xf32>
    %407 = arith.mulf %398, %342 : vector<8x128xf32>
    %408 = arith.mulf %392, %400 : vector<8x128xf32>
    %409 = arith.addf %407, %408 : vector<8x128xf32>
    %410 = math.tanh %409 : vector<8x128xf32>
    %411 = arith.mulf %406, %410 : vector<8x128xf32>
    %412 = vector.broadcast %4 : vector<1x128xf32> to vector<8x128xf32>
    %413 = arith.mulf %411, %412 : vector<8x128xf32>
    %cst_85 = arith.constant dense<0.000000e+00> : vector<8xf32>
    %414 = vector.multi_reduction <add>, %413, %cst_85 [1] : vector<8x128xf32> to vector<8xf32>
    %415 = vector.shape_cast %414 : vector<8xf32> to vector<8x1xf32>
    %416 = vector.broadcast %5 : f32 to vector<8x1xf32>
    %417 = arith.addf %415, %416 : vector<8x1xf32>
    %c0_86 = arith.constant 0 : index
    %c5 = arith.constant 5 : index
    %418 = vector.load %arg10[%c0_86, %c5] : memref<8x8xf32, #tpu.memory_space<vmem>>, vector<8x1xf32>
    tpu.vector_store %arg10[%c0_86, %c5], %417 {strides = array<i32>} : memref<8x8xf32, #tpu.memory_space<vmem>>, vector<8x1xf32>,
    %419 = arith.truncf %379 : vector<8x128xf32> to vector<8x128xbf16>
    %cst_87 = arith.constant dense<0.000000e+00> : vector<8x512xf32>
    %420 = tpu.matmul %419, %0, %cst_87 {dimension_numbers = #tpu.dot_dimension_numbers<[1], [0], [0], [1], [0, 0, 1, 1], [], []>} : vector<8x128xbf16>, vector<128x512xbf16>, vector<8x512xf32> -> vector<8x512xf32>
    %421 = arith.addf %12, %420 : vector<8x512xf32>
    %422 = vector.extract_strided_slice %421 {offsets = [0, 0], sizes = [8, 128], strides = [1, 1]} : vector<8x512xf32> to vector<8x128xf32>
    %423 = arith.negf %422 : vector<8x128xf32>
    %424 = math.exp %423 : vector<8x128xf32>
    %cst_88 = arith.constant 1.000000e+00 : f32
    %425 = vector.broadcast %cst_88 : f32 to vector<8x128xf32>
    %426 = arith.addf %425, %424 : vector<8x128xf32>
    %427 = arith.divf %425, %426 : vector<8x128xf32>
    %428 = vector.extract_strided_slice %421 {offsets = [0, 128], sizes = [8, 128], strides = [1, 1]} : vector<8x512xf32> to vector<8x128xf32>
    %429 = arith.negf %428 : vector<8x128xf32>
    %430 = math.exp %429 : vector<8x128xf32>
    %cst_89 = arith.constant 1.000000e+00 : f32
    %431 = vector.broadcast %cst_89 : f32 to vector<8x128xf32>
    %432 = arith.addf %431, %430 : vector<8x128xf32>
    %433 = arith.divf %431, %432 : vector<8x128xf32>
    %434 = vector.extract_strided_slice %421 {offsets = [0, 256], sizes = [8, 128], strides = [1, 1]} : vector<8x512xf32> to vector<8x128xf32>
    %435 = math.tanh %434 : vector<8x128xf32>
    %436 = vector.extract_strided_slice %421 {offsets = [0, 384], sizes = [8, 128], strides = [1, 1]} : vector<8x512xf32> to vector<8x128xf32>
    %437 = arith.negf %436 : vector<8x128xf32>
    %438 = math.exp %437 : vector<8x128xf32>
    %cst_90 = arith.constant 1.000000e+00 : f32
    %439 = vector.broadcast %cst_90 : f32 to vector<8x128xf32>
    %440 = arith.addf %439, %438 : vector<8x128xf32>
    %441 = arith.divf %439, %440 : vector<8x128xf32>
    %442 = arith.mulf %433, %377 : vector<8x128xf32>
    %443 = arith.mulf %427, %435 : vector<8x128xf32>
    %444 = arith.addf %442, %443 : vector<8x128xf32>
    %445 = math.tanh %444 : vector<8x128xf32>
    %446 = arith.mulf %441, %445 : vector<8x128xf32>
    %447 = arith.truncf %446 : vector<8x128xf32> to vector<8x128xbf16>
    %cst_91 = arith.constant dense<0.000000e+00> : vector<8x512xf32>
    %448 = tpu.matmul %447, %1, %cst_91 {dimension_numbers = #tpu.dot_dimension_numbers<[1], [0], [0], [1], [0, 0, 1, 1], [], []>} : vector<8x128xbf16>, vector<128x512xbf16>, vector<8x512xf32> -> vector<8x512xf32>
    %449 = vector.broadcast %3 : vector<1x512xf32> to vector<8x512xf32>
    %450 = arith.addf %448, %449 : vector<8x512xf32>
    %451 = arith.truncf %411 : vector<8x128xf32> to vector<8x128xbf16>
    %cst_92 = arith.constant dense<0.000000e+00> : vector<8x512xf32>
    %452 = tpu.matmul %451, %2, %cst_92 {dimension_numbers = #tpu.dot_dimension_numbers<[1], [0], [0], [1], [0, 0, 1, 1], [], []>} : vector<8x128xbf16>, vector<128x512xbf16>, vector<8x512xf32> -> vector<8x512xf32>
    %453 = arith.addf %450, %452 : vector<8x512xf32>
    %454 = vector.extract_strided_slice %453 {offsets = [0, 0], sizes = [8, 128], strides = [1, 1]} : vector<8x512xf32> to vector<8x128xf32>
    %455 = arith.negf %454 : vector<8x128xf32>
    %456 = math.exp %455 : vector<8x128xf32>
    %cst_93 = arith.constant 1.000000e+00 : f32
    %457 = vector.broadcast %cst_93 : f32 to vector<8x128xf32>
    %458 = arith.addf %457, %456 : vector<8x128xf32>
    %459 = arith.divf %457, %458 : vector<8x128xf32>
    %460 = vector.extract_strided_slice %453 {offsets = [0, 128], sizes = [8, 128], strides = [1, 1]} : vector<8x512xf32> to vector<8x128xf32>
    %461 = arith.negf %460 : vector<8x128xf32>
    %462 = math.exp %461 : vector<8x128xf32>
    %cst_94 = arith.constant 1.000000e+00 : f32
    %463 = vector.broadcast %cst_94 : f32 to vector<8x128xf32>
    %464 = arith.addf %463, %462 : vector<8x128xf32>
    %465 = arith.divf %463, %464 : vector<8x128xf32>
    %466 = vector.extract_strided_slice %453 {offsets = [0, 256], sizes = [8, 128], strides = [1, 1]} : vector<8x512xf32> to vector<8x128xf32>
    %467 = math.tanh %466 : vector<8x128xf32>
    %468 = vector.extract_strided_slice %453 {offsets = [0, 384], sizes = [8, 128], strides = [1, 1]} : vector<8x512xf32> to vector<8x128xf32>
    %469 = arith.negf %468 : vector<8x128xf32>
    %470 = math.exp %469 : vector<8x128xf32>
    %cst_95 = arith.constant 1.000000e+00 : f32
    %471 = vector.broadcast %cst_95 : f32 to vector<8x128xf32>
    %472 = arith.addf %471, %470 : vector<8x128xf32>
    %473 = arith.divf %471, %472 : vector<8x128xf32>
    %474 = arith.mulf %465, %409 : vector<8x128xf32>
    %475 = arith.mulf %459, %467 : vector<8x128xf32>
    %476 = arith.addf %474, %475 : vector<8x128xf32>
    %477 = math.tanh %476 : vector<8x128xf32>
    %478 = arith.mulf %473, %477 : vector<8x128xf32>
    %479 = vector.broadcast %4 : vector<1x128xf32> to vector<8x128xf32>
    %480 = arith.mulf %478, %479 : vector<8x128xf32>
    %cst_96 = arith.constant dense<0.000000e+00> : vector<8xf32>
    %481 = vector.multi_reduction <add>, %480, %cst_96 [1] : vector<8x128xf32> to vector<8xf32>
    %482 = vector.shape_cast %481 : vector<8xf32> to vector<8x1xf32>
    %483 = vector.broadcast %5 : f32 to vector<8x1xf32>
    %484 = arith.addf %482, %483 : vector<8x1xf32>
    %c0_97 = arith.constant 0 : index
    %c6 = arith.constant 6 : index
    %485 = vector.load %arg10[%c0_97, %c6] : memref<8x8xf32, #tpu.memory_space<vmem>>, vector<8x1xf32>
    tpu.vector_store %arg10[%c0_97, %c6], %484 {strides = array<i32>} : memref<8x8xf32, #tpu.memory_space<vmem>>, vector<8x1xf32>,
    %486 = arith.truncf %446 : vector<8x128xf32> to vector<8x128xbf16>
    %cst_98 = arith.constant dense<0.000000e+00> : vector<8x512xf32>
    %487 = tpu.matmul %486, %0, %cst_98 {dimension_numbers = #tpu.dot_dimension_numbers<[1], [0], [0], [1], [0, 0, 1, 1], [], []>} : vector<8x128xbf16>, vector<128x512xbf16>, vector<8x512xf32> -> vector<8x512xf32>
    %488 = arith.addf %12, %487 : vector<8x512xf32>
    %489 = vector.extract_strided_slice %488 {offsets = [0, 0], sizes = [8, 128], strides = [1, 1]} : vector<8x512xf32> to vector<8x128xf32>
    %490 = arith.negf %489 : vector<8x128xf32>
    %491 = math.exp %490 : vector<8x128xf32>
    %cst_99 = arith.constant 1.000000e+00 : f32
    %492 = vector.broadcast %cst_99 : f32 to vector<8x128xf32>
    %493 = arith.addf %492, %491 : vector<8x128xf32>
    %494 = arith.divf %492, %493 : vector<8x128xf32>
    %495 = vector.extract_strided_slice %488 {offsets = [0, 128], sizes = [8, 128], strides = [1, 1]} : vector<8x512xf32> to vector<8x128xf32>
    %496 = arith.negf %495 : vector<8x128xf32>
    %497 = math.exp %496 : vector<8x128xf32>
    %cst_100 = arith.constant 1.000000e+00 : f32
    %498 = vector.broadcast %cst_100 : f32 to vector<8x128xf32>
    %499 = arith.addf %498, %497 : vector<8x128xf32>
    %500 = arith.divf %498, %499 : vector<8x128xf32>
    %501 = vector.extract_strided_slice %488 {offsets = [0, 256], sizes = [8, 128], strides = [1, 1]} : vector<8x512xf32> to vector<8x128xf32>
    %502 = math.tanh %501 : vector<8x128xf32>
    %503 = vector.extract_strided_slice %488 {offsets = [0, 384], sizes = [8, 128], strides = [1, 1]} : vector<8x512xf32> to vector<8x128xf32>
    %504 = arith.negf %503 : vector<8x128xf32>
    %505 = math.exp %504 : vector<8x128xf32>
    %cst_101 = arith.constant 1.000000e+00 : f32
    %506 = vector.broadcast %cst_101 : f32 to vector<8x128xf32>
    %507 = arith.addf %506, %505 : vector<8x128xf32>
    %508 = arith.divf %506, %507 : vector<8x128xf32>
    %509 = arith.mulf %500, %444 : vector<8x128xf32>
    %510 = arith.mulf %494, %502 : vector<8x128xf32>
    %511 = arith.addf %509, %510 : vector<8x128xf32>
    %512 = math.tanh %511 : vector<8x128xf32>
    %513 = arith.mulf %508, %512 : vector<8x128xf32>
    %514 = arith.truncf %513 : vector<8x128xf32> to vector<8x128xbf16>
    %cst_102 = arith.constant dense<0.000000e+00> : vector<8x512xf32>
    %515 = tpu.matmul %514, %1, %cst_102 {dimension_numbers = #tpu.dot_dimension_numbers<[1], [0], [0], [1], [0, 0, 1, 1], [], []>} : vector<8x128xbf16>, vector<128x512xbf16>, vector<8x512xf32> -> vector<8x512xf32>
    %516 = vector.broadcast %3 : vector<1x512xf32> to vector<8x512xf32>
    %517 = arith.addf %515, %516 : vector<8x512xf32>
    %518 = arith.truncf %478 : vector<8x128xf32> to vector<8x128xbf16>
    %cst_103 = arith.constant dense<0.000000e+00> : vector<8x512xf32>
    %519 = tpu.matmul %518, %2, %cst_103 {dimension_numbers = #tpu.dot_dimension_numbers<[1], [0], [0], [1], [0, 0, 1, 1], [], []>} : vector<8x128xbf16>, vector<128x512xbf16>, vector<8x512xf32> -> vector<8x512xf32>
    %520 = arith.addf %517, %519 : vector<8x512xf32>
    %521 = vector.extract_strided_slice %520 {offsets = [0, 0], sizes = [8, 128], strides = [1, 1]} : vector<8x512xf32> to vector<8x128xf32>
    %522 = arith.negf %521 : vector<8x128xf32>
    %523 = math.exp %522 : vector<8x128xf32>
    %cst_104 = arith.constant 1.000000e+00 : f32
    %524 = vector.broadcast %cst_104 : f32 to vector<8x128xf32>
    %525 = arith.addf %524, %523 : vector<8x128xf32>
    %526 = arith.divf %524, %525 : vector<8x128xf32>
    %527 = vector.extract_strided_slice %520 {offsets = [0, 128], sizes = [8, 128], strides = [1, 1]} : vector<8x512xf32> to vector<8x128xf32>
    %528 = arith.negf %527 : vector<8x128xf32>
    %529 = math.exp %528 : vector<8x128xf32>
    %cst_105 = arith.constant 1.000000e+00 : f32
    %530 = vector.broadcast %cst_105 : f32 to vector<8x128xf32>
    %531 = arith.addf %530, %529 : vector<8x128xf32>
    %532 = arith.divf %530, %531 : vector<8x128xf32>
    %533 = vector.extract_strided_slice %520 {offsets = [0, 256], sizes = [8, 128], strides = [1, 1]} : vector<8x512xf32> to vector<8x128xf32>
    %534 = math.tanh %533 : vector<8x128xf32>
    %535 = vector.extract_strided_slice %520 {offsets = [0, 384], sizes = [8, 128], strides = [1, 1]} : vector<8x512xf32> to vector<8x128xf32>
    %536 = arith.negf %535 : vector<8x128xf32>
    %537 = math.exp %536 : vector<8x128xf32>
    %cst_106 = arith.constant 1.000000e+00 : f32
    %538 = vector.broadcast %cst_106 : f32 to vector<8x128xf32>
    %539 = arith.addf %538, %537 : vector<8x128xf32>
    %540 = arith.divf %538, %539 : vector<8x128xf32>
    %541 = arith.mulf %532, %476 : vector<8x128xf32>
    %542 = arith.mulf %526, %534 : vector<8x128xf32>
    %543 = arith.addf %541, %542 : vector<8x128xf32>
    %544 = math.tanh %543 : vector<8x128xf32>
    %545 = arith.mulf %540, %544 : vector<8x128xf32>
    %546 = vector.broadcast %4 : vector<1x128xf32> to vector<8x128xf32>
    %547 = arith.mulf %545, %546 : vector<8x128xf32>
    %cst_107 = arith.constant dense<0.000000e+00> : vector<8xf32>
    %548 = vector.multi_reduction <add>, %547, %cst_107 [1] : vector<8x128xf32> to vector<8xf32>
    %549 = vector.shape_cast %548 : vector<8xf32> to vector<8x1xf32>
    %550 = vector.broadcast %5 : f32 to vector<8x1xf32>
    %551 = arith.addf %549, %550 : vector<8x1xf32>
    %c0_108 = arith.constant 0 : index
    %c7 = arith.constant 7 : index
    %552 = vector.load %arg10[%c0_108, %c7] : memref<8x8xf32, #tpu.memory_space<vmem>>, vector<8x1xf32>
    tpu.vector_store %arg10[%c0_108, %c7], %551 {strides = array<i32>} : memref<8x8xf32, #tpu.memory_space<vmem>>, vector<8x1xf32>,
    return
  }
  func.func @transform_0(%arg0: i32) -> (i32, i32) {
    %c0_i32 = arith.constant 0 : i32
    %c0_i32_0 = arith.constant 0 : i32
    return %arg0, %c0_i32 : i32, i32
  }
  func.func @transform_1(%arg0: i32) -> (i32, i32) {
    %c0_i32 = arith.constant 0 : i32
    %c0_i32_0 = arith.constant 0 : i32
    %c0_i32_1 = arith.constant 0 : i32
    return %c0_i32, %c0_i32_0 : i32, i32
  }
  func.func @transform_2(%arg0: i32) -> (i32, i32) {
    %c0_i32 = arith.constant 0 : i32
    %c0_i32_0 = arith.constant 0 : i32
    %c0_i32_1 = arith.constant 0 : i32
    return %c0_i32, %c0_i32_0 : i32, i32
  }
  func.func @transform_3(%arg0: i32) -> (i32, i32) {
    %c0_i32 = arith.constant 0 : i32
    %c0_i32_0 = arith.constant 0 : i32
    %c0_i32_1 = arith.constant 0 : i32
    return %c0_i32, %c0_i32_0 : i32, i32
  }
  func.func @transform_4(%arg0: i32) -> (i32, i32) {
    %c0_i32 = arith.constant 0 : i32
    %c0_i32_0 = arith.constant 0 : i32
    %c0_i32_1 = arith.constant 0 : i32
    return %c0_i32, %c0_i32_0 : i32, i32
  }
  func.func @transform_5(%arg0: i32) -> (i32, i32) {
    %c0_i32 = arith.constant 0 : i32
    %c0_i32_0 = arith.constant 0 : i32
    %c0_i32_1 = arith.constant 0 : i32
    return %c0_i32, %c0_i32_0 : i32, i32
  }
  func.func @transform_6(%arg0: i32) -> (i32, i32) {
    %c0_i32 = arith.constant 0 : i32
    %c0_i32_0 = arith.constant 0 : i32
    %c0_i32_1 = arith.constant 0 : i32
    return %c0_i32, %c0_i32_0 : i32, i32
  }
  func.func @transform_7(%arg0: i32) -> (i32, i32) {
    %c0_i32 = arith.constant 0 : i32
    %c0_i32_0 = arith.constant 0 : i32
    %c0_i32_1 = arith.constant 0 : i32
    return %c0_i32, %c0_i32_0 : i32, i32
  }
  func.func @transform_8(%arg0: i32) -> i32 {
    %c0_i32 = arith.constant 0 : i32
    %c0_i32_0 = arith.constant 0 : i32
    return %c0_i32 : i32
  }
  func.func @transform_9(%arg0: i32) -> (i32, i32) {
    %c0_i32 = arith.constant 0 : i32
    %c0_i32_0 = arith.constant 0 : i32
    return %arg0, %c0_i32 : i32, i32
  }
}

</mosaic_0001>

<bundles_post_ra>
// kernel: tpu_custom_call.1
= control target key start
LH: loop header
LB: loop body
LE: loop exit
PB: predicated region body
PF: predicated region fallthrough
CT: control target
= control target key end

     0   :  { %15 = vsyncpa [#allocation4], 0  ;;  %s6359_s0 = inlined_call_operand.hbm [shape: f32[8,128], index: 0, kind: input, shape index: {}]   ;;  %s6360_s1 = inlined_call_operand.hbm [shape: bf16[128,512], index: 1, kind: input, shape index: {}]   ;;  %s6361_s2 = inlined_call_operand.hbm [shape: bf16[128,512], index: 2, kind: input, shape index: {}]   ;;  %s6362_s3 = inlined_call_operand.vmem [shape: f32[1,512], index: 3, kind: input, shape index: {}]   ;;  %s6363_s4 = inlined_call_operand.hbm [shape: bf16[128,512], index: 4, kind: input, shape index: {}]   ;;  %s6364_s5 = inlined_call_operand.hbm [shape: bf16[128,512], index: 5, kind: input, shape index: {}]   ;;  %s6365_s6 = inlined_call_operand.vmem [shape: f32[1,512], index: 6, kind: input, shape index: {}]   ;;  %s6366_s7 = inlined_call_operand.vmem [shape: f32[1,128], index: 7, kind: input, shape index: {}]   ;;  %s6367_s8 = inlined_call_operand.<no memory space> [shape: f32[1], index: 8, kind: input, shape index: {}]   ;;  %s6368_s9 = inlined_call_operand.hbm [shape: f32[8,8], index: 9, kind: output, shape index: {}]  }
   0x1   :  { %16 = vsyncpa [#allocation7], 0 }
   0x2   :  { %17 = vsyncpa [#allocation10], 0 }
   0x3   :  { %18 = vsyncpa [#allocation5], 0  ;;  %s4566_s30 = smov [#allocation6]   ;;  %s4426_s13 = scalar_lea.hbm %s6360_s1, 4096 }
   0x4   :  { %s34_s10 = sshll.u32 %s4566_s30, 4  ;;  %p4427_p0 = scmp.ne.s32.totalorder %s6360_s1, %s4426_s13  ;;  %s35_s10 = int_to_ptr.vmem [resolvable:$true] %s34_s10 }
   0x5   :  { %p4430_p1 = scmp.lt.u32.totalorder %s4426_s13, %s6360_s1 }
   0x7   :  { %p4432_p2 = pnand %p4430_p1, %p4427_p0 }
   0x9   :  { %4435 = shalt.err (!%p4432_p2)
}
   0xa   :  { %s4436_s18 = scalar_lea.vmem %s35_s10, 4096  ;;  %p4441_p4 = scmp.lt.s32.totalorder %s35_s10, %s35_s10 }
   0xb   :  { %p4437_p3 = scmp.ne.s32.totalorder %s35_s10, %s4436_s18  ;;  %p4442_p5 = scmp.lt.s32.totalorder %s4436_s18, %s4436_s18 }
   0xd   :  { %p4443_p6 = por %p4442_p5, %p4441_p4 }
   0xf   :  { %p4444_p7 = pnand %p4443_p6, %p4437_p3 }
  0x11   :  { %4447 = shalt.err (!%p4444_p7)
}
  0x12   :  { %s4567_s19 = smov 256   ;;  %s4568_s20 = smov 16  }
  0x13   :  { %40 = dma.hbm_to_vmem [thread:$0]  %s6360_s1, 4096, %s35_s10, [#allocation7], %s4567_s19, %s4567_s19, %s4568_s20  }
  0x14   :  { %s4569_s23 = smov [#allocation9]   ;;  %s4570_s25 = smov [#allocation3]  }
  0x15   :  { %s60_s24 = sshll.u32 %s4569_s23, 4  ;;  %s25_s26 = sshll.u32 %s4570_s25, 4  ;;  %s61_s24 = int_to_ptr.vmem [resolvable:$true] %s60_s24  ;;  %s26_s26 = int_to_ptr.vmem [resolvable:$true] %s25_s26 }
  0x16   :  { %s4448_s29 = scalar_lea.hbm %s6363_s4, 4096 }
  0x17   :  { %p4449_p8 = scmp.ne.s32.totalorder %s6363_s4, %s4448_s29  ;;  %p4452_p9 = scmp.lt.u32.totalorder %s4448_s29, %s6363_s4 }
  0x19   :  { %p4454_p10 = pnand %p4452_p9, %p4449_p8 }
  0x1b   :  { %4457 = shalt.err (!%p4454_p10)
}
  0x1c   :  { %s4458_s1 = scalar_lea.vmem %s61_s24, 4096  ;;  %p4463_p12 = scmp.lt.s32.totalorder %s61_s24, %s61_s24 }
  0x1d   :  { %p4459_p11 = scmp.ne.s32.totalorder %s61_s24, %s4458_s1  ;;  %p4464_p13 = scmp.lt.s32.totalorder %s4458_s1, %s4458_s1 }
  0x1f   :  { %p4465_p0 = por %p4464_p13, %p4463_p12 }
  0x21   :  { %p4466_p1 = pnand %p4465_p0, %p4459_p11 }
  0x23   :  { %4469 = shalt.err (!%p4466_p1)
}
  0x24   :  { %66 = dma.hbm_to_vmem [thread:$0]  %s6363_s4, 4096, %s61_s24, [#allocation10], %s4567_s19, %s4567_s19, %s4568_s20  }
  0x25   :  { %s4470_s17 = scalar_lea.hbm %s6359_s0, 128 }
  0x26   :  { %p4471_p2 = scmp.ne.s32.totalorder %s6359_s0, %s4470_s17  ;;  %p4474_p3 = scmp.lt.u32.totalorder %s4470_s17, %s6359_s0 }
  0x28   :  { %p4476_p4 = pnand %p4474_p3, %p4471_p2 }
  0x2a   :  { %4479 = shalt.err (!%p4476_p4)
}
  0x2b   :  { %s4480_s25 = scalar_lea.vmem %s26_s26, 128  ;;  %p4485_p6 = scmp.lt.s32.totalorder %s26_s26, %s26_s26 }
  0x2c   :  { %p4481_p5 = scmp.ne.s32.totalorder %s26_s26, %s4480_s25  ;;  %p4486_p7 = scmp.lt.s32.totalorder %s4480_s25, %s4480_s25 }
  0x2e   :  { %p4487_p8 = por %p4486_p7, %p4485_p6 }
  0x30   :  { %p4488_p9 = pnand %p4487_p8, %p4481_p5 }
  0x32   :  { %4491 = shalt.err (!%p4488_p9)
}
  0x33   :  { %28 = dma.hbm_to_vmem [thread:$0]  %s6359_s0, 128, %s26_s26, [#allocation4]  }
  0x34   :  { %s4571_s27 = smov [#allocation8]   ;;  %s4572_s29 = smov [#allocation11]  }
  0x35   :  { %s46_s28 = sshll.u32 %s4571_s27, 4  ;;  %s72_s30 = sshll.u32 %s4572_s29, 4  ;;  %s47_s28 = int_to_ptr.vmem [resolvable:$true] %s46_s28  ;;  %s73_s30 = int_to_ptr.vmem [resolvable:$true] %s72_s30 }
  0x36   :  { %s4492_s13 = scalar_lea.hbm %s6361_s2, 4096 }
  0x37   :  { %p4493_p10 = scmp.ne.s32.totalorder %s6361_s2, %s4492_s13  ;;  %p4496_p11 = scmp.lt.u32.totalorder %s4492_s13, %s6361_s2 }
  0x39   :  { %p4498_p12 = pnand %p4496_p11, %p4493_p10 }
  0x3b   :  { %4501 = shalt.err (!%p4498_p12)
}
  0x3c   :  { %s4502_s0 = scalar_lea.vmem %s47_s28, 4096  ;;  %p4507_p0 = scmp.lt.s32.totalorder %s47_s28, %s47_s28 }
  0x3d   :  { %p4503_p13 = scmp.ne.s32.totalorder %s47_s28, %s4502_s0  ;;  %p4508_p1 = scmp.lt.s32.totalorder %s4502_s0, %s4502_s0 }
  0x3f   :  { %p4509_p2 = por %p4508_p1, %p4507_p0 }
  0x41   :  { %p4510_p3 = pnand %p4509_p2, %p4503_p13 }
  0x43   :  { %4513 = shalt.err (!%p4510_p3)
}
  0x44   :  { %52 = dma.hbm_to_vmem [thread:$0]  %s6361_s2, 4096, %s47_s28, [#allocation7], %s4567_s19, %s4567_s19, %s4568_s20  }
  0x45   :  { %s4514_s21 = scalar_lea.hbm %s6364_s5, 4096 }
  0x46   :  { %p4515_p4 = scmp.ne.s32.totalorder %s6364_s5, %s4514_s21  ;;  %p4518_p5 = scmp.lt.u32.totalorder %s4514_s21, %s6364_s5 }
  0x48   :  { %p4520_p6 = pnand %p4518_p5, %p4515_p4 }
  0x4a   :  { %4523 = shalt.err (!%p4520_p6)
}
  0x4b   :  { %s4524_s24 = scalar_lea.vmem %s73_s30, 4096  ;;  %p4529_p8 = scmp.lt.s32.totalorder %s73_s30, %s73_s30 }
  0x4c   :  { %p4525_p7 = scmp.ne.s32.totalorder %s73_s30, %s4524_s24  ;;  %p4530_p9 = scmp.lt.s32.totalorder %s4524_s24, %s4524_s24 }
  0x4e   :  { %p4531_p10 = por %p4530_p9, %p4529_p8 }
  0x50   :  { %p4532_p11 = pnand %p4531_p10, %p4525_p7 }
  0x52   :  { %4535 = shalt.err (!%p4532_p11)
}
  0x53   :  { %78 = dma.hbm_to_vmem [thread:$0]  %s6364_s5, 4096, %s73_s30, [#allocation10], %s4567_s19, %s4567_s19, %s4568_s20  }
  0x54   :  { %4558 = dma.done.wait [#allocation4], 128  }
  0x55   :  { %4559 = vsyncadd [#allocation4], 4294967168 }
  0x56   :  { %4560 = dma.done.wait [#allocation7], 8192  }
  0x57   :  { %4561 = vsyncadd [#allocation7], 4294959104 }
  0x58   :  { %4562 = dma.done.wait [#allocation10], 8192  }
  0x59   :  { %4563 = vsyncadd [#allocation10], 4294959104  ;;  %v6369_v0 = vmov 0   ;;  %v3784_v1 = vld [vmem:[#allocation6 + $0x4] ss:$16 sps:$4 sm:$0xff]   ;;  %v200_v33 = vld [vmem:[#allocation3] sm:$0xff] }
  0x5a   :  { %448 = vmatprep.mubr.bf16.mxu0 %v6369_v0  ;;  %489 = vmatprep.mubr.bf16.mxu1 %v6369_v0  ;;  %v3786_v2 = vld [vmem:[#allocation6 + $0xc] ss:$16 sps:$4 sm:$0xff]   ;;  %v3788_v3 = vld [vmem:[#allocation6] ss:$16 sps:$4 sm:$0xff]   ;;  %v3789_v4 = vld [vmem:[#allocation6 + $0x8] ss:$16 sps:$4 sm:$0xff]   ;;  %v201_v36 = vpack.c.bf16 %v200_v33, %v200_v33 }
  0x5b   :  { %416 = vmatprep.subr.bf16.mxu0 %v3784_v1  ;;  %457 = vmatprep.subr.bf16.mxu1 %v3786_v2  ;;  %v3790_v5 = vld [vmem:[#allocation6 + $0x24] ss:$16 sps:$4 sm:$0xff]   ;;  %v3792_v6 = vld [vmem:[#allocation6 + $0x2c] ss:$16 sps:$4 sm:$0xff]   ;;  %v3794_v7 = vld [vmem:[#allocation6 + $0x20] ss:$16 sps:$4 sm:$0xff]  }
  0x5c   :  { %417 = vmatpush1.bf16.msra.mxu0 %v3788_v3  ;;  %458 = vmatpush1.bf16.msra.mxu1 %v3789_v4  ;;  %v3795_v8 = vld [vmem:[#allocation6 + $0x28] ss:$16 sps:$4 sm:$0xff]   ;;  %v3796_v9 = vld [vmem:[#allocation6 + $0x44] ss:$16 sps:$4 sm:$0xff]   ;;  %v3798_v10 = vld [vmem:[#allocation6 + $0x4c] ss:$16 sps:$4 sm:$0xff]  }
  0x5d   :  { %418 = vmatprep.subr.bf16.mxu0 %v3790_v5  ;;  %459 = vmatprep.subr.bf16.mxu1 %v3792_v6  ;;  %v3800_v11 = vld [vmem:[#allocation6 + $0x40] ss:$16 sps:$4 sm:$0xff]   ;;  %v3801_v12 = vld [vmem:[#allocation6 + $0x48] ss:$16 sps:$4 sm:$0xff]   ;;  %v3802_v13 = vld [vmem:[#allocation6 + $0x64] ss:$16 sps:$4 sm:$0xff]  }
  0x5e   :  { %v3804_v14 = vld [vmem:[#allocation6 + $0x6c] ss:$16 sps:$4 sm:$0xff]   ;;  %v3806_v15 = vld [vmem:[#allocation6 + $0x60] ss:$16 sps:$4 sm:$0xff]   ;;  %v3807_v16 = vld [vmem:[#allocation6 + $0x68] ss:$16 sps:$4 sm:$0xff]  }
  0x5f   :  { %v3808_v17 = vld [vmem:[#allocation6 + $0x84] ss:$16 sps:$4 sm:$0xff]   ;;  %v3810_v18 = vld [vmem:[#allocation6 + $0x8c] ss:$16 sps:$4 sm:$0xff]   ;;  %v3812_v19 = vld [vmem:[#allocation6 + $0x80] ss:$16 sps:$4 sm:$0xff]  }
  0x60   :  { %419 = vmatpush1.bf16.msra.mxu0 %v3794_v7  ;;  %460 = vmatpush1.bf16.msra.mxu1 %v3795_v8  ;;  %v3813_v20 = vld [vmem:[#allocation6 + $0x88] ss:$16 sps:$4 sm:$0xff]   ;;  %v3814_v21 = vld [vmem:[#allocation6 + $0xa4] ss:$16 sps:$4 sm:$0xff]   ;;  %v3816_v22 = vld [vmem:[#allocation6 + $0xac] ss:$16 sps:$4 sm:$0xff]  }
  0x61   :  { %420 = vmatprep.subr.bf16.mxu0 %v3796_v9  ;;  %461 = vmatprep.subr.bf16.mxu1 %v3798_v10  ;;  %v3818_v23 = vld [vmem:[#allocation6 + $0xa0] ss:$16 sps:$4 sm:$0xff]   ;;  %v3819_v24 = vld [vmem:[#allocation6 + $0xa8] ss:$16 sps:$4 sm:$0xff]   ;;  %v3820_v25 = vld [vmem:[#allocation6 + $0xc4] ss:$16 sps:$4 sm:$0xff]  }
  0x62   :  { %v3822_v26 = vld [vmem:[#allocation6 + $0xcc] ss:$16 sps:$4 sm:$0xff]   ;;  %v3824_v27 = vld [vmem:[#allocation6 + $0xc0] ss:$16 sps:$4 sm:$0xff]   ;;  %v3825_v28 = vld [vmem:[#allocation6 + $0xc8] ss:$16 sps:$4 sm:$0xff]  }
  0x63   :  { %v3826_v29 = vld [vmem:[#allocation6 + $0xe4] ss:$16 sps:$4 sm:$0xff]   ;;  %v3828_v30 = vld [vmem:[#allocation6 + $0xec] ss:$16 sps:$4 sm:$0xff]   ;;  %v3830_v31 = vld [vmem:[#allocation6 + $0xe0] ss:$16 sps:$4 sm:$0xff]  }
  0x64   :  { %421 = vmatpush1.bf16.msra.mxu0 %v3800_v11  ;;  %462 = vmatpush1.bf16.msra.mxu1 %v3801_v12  ;;  %v3831_v32 = vld [vmem:[#allocation6 + $0xe8] ss:$16 sps:$4 sm:$0xff]   ;;  %v4699_v34 = vld [vmem:[#allocation8 + $0x4] ss:$16 sps:$4 sm:$0xff]   ;;  %v4701_v35 = vld [vmem:[#allocation8 + $0xc] ss:$16 sps:$4 sm:$0xff]  }
  0x65   :  { %422 = vmatprep.subr.bf16.mxu0 %v3802_v13  ;;  %463 = vmatprep.subr.bf16.mxu1 %v3804_v14  ;;  %v4703_v37 = vld [vmem:[#allocation8] ss:$16 sps:$4 sm:$0xff]   ;;  %v4705_v38 = vld [vmem:[#allocation8 + $0x8] ss:$16 sps:$4 sm:$0xff]   ;;  %v4707_v39 = vld [vmem:[#allocation8 + $0x24] ss:$16 sps:$4 sm:$0xff]  }
  0x66   :  { %v4711_v40 = vld [vmem:[#allocation8 + $0x2c] ss:$16 sps:$4 sm:$0xff]   ;;  %v4713_v41 = vld [vmem:[#allocation8 + $0x20] ss:$16 sps:$4 sm:$0xff]   ;;  %v4717_v42 = vld [vmem:[#allocation8 + $0x28] ss:$16 sps:$4 sm:$0xff]  }
  0x67   :  { %v4721_v43 = vld [vmem:[#allocation8 + $0x44] ss:$16 sps:$4 sm:$0xff]   ;;  %v4723_v44 = vld [vmem:[#allocation8 + $0x4c] ss:$16 sps:$4 sm:$0xff]   ;;  %v4727_v45 = vld [vmem:[#allocation8 + $0x40] ss:$16 sps:$4 sm:$0xff]  }
  0x68   :  { %423 = vmatpush1.bf16.msra.mxu0 %v3806_v15  ;;  %464 = vmatpush1.bf16.msra.mxu1 %v3807_v16  ;;  %v4729_v46 = vld [vmem:[#allocation8 + $0x48] ss:$16 sps:$4 sm:$0xff]   ;;  %v4733_v47 = vld [vmem:[#allocation8 + $0x64] ss:$16 sps:$4 sm:$0xff]   ;;  %v4737_v48 = vld [vmem:[#allocation8 + $0x6c] ss:$16 sps:$4 sm:$0xff]  }
  0x69   :  { %424 = vmatprep.subr.bf16.mxu0 %v3808_v17  ;;  %465 = vmatprep.subr.bf16.mxu1 %v3810_v18  ;;  %v4739_v49 = vld [vmem:[#allocation8 + $0x60] ss:$16 sps:$4 sm:$0xff]   ;;  %v4741_v50 = vld [vmem:[#allocation8 + $0x68] ss:$16 sps:$4 sm:$0xff]   ;;  %v4743_v51 = vld [vmem:[#allocation8 + $0x84] ss:$16 sps:$4 sm:$0xff]  }
  0x6a   :  { %v4745_v52 = vld [vmem:[#allocation8 + $0x8c] ss:$16 sps:$4 sm:$0xff]   ;;  %v4751_v53 = vld [vmem:[#allocation8 + $0x80] ss:$16 sps:$4 sm:$0xff]   ;;  %v4753_v54 = vld [vmem:[#allocation8 + $0x88] ss:$16 sps:$4 sm:$0xff]  }
  0x6b   :  { %v4755_v55 = vld [vmem:[#allocation8 + $0xa4] ss:$16 sps:$4 sm:$0xff]   ;;  %v4757_v56 = vld [vmem:[#allocation8 + $0xac] ss:$16 sps:$4 sm:$0xff]   ;;  %v4763_v57 = vld [vmem:[#allocation8 + $0xa0] ss:$16 sps:$4 sm:$0xff]  }
  0x6c   :  { %425 = vmatpush1.bf16.msra.mxu0 %v3812_v19  ;;  %466 = vmatpush1.bf16.msra.mxu1 %v3813_v20  ;;  %v4765_v58 = vld [vmem:[#allocation8 + $0xa8] ss:$16 sps:$4 sm:$0xff]   ;;  %v4767_v59 = vld [vmem:[#allocation8 + $0xc4] ss:$16 sps:$4 sm:$0xff]   ;;  %v4769_v60 = vld [vmem:[#allocation8 + $0xcc] ss:$16 sps:$4 sm:$0xff]  }
  0x6d   :  { %426 = vmatprep.subr.bf16.mxu0 %v3814_v21  ;;  %467 = vmatprep.subr.bf16.mxu1 %v3816_v22  ;;  %v4775_v61 = vld [vmem:[#allocation8 + $0xc0] ss:$16 sps:$4 sm:$0xff]   ;;  %v4777_v62 = vld [vmem:[#allocation8 + $0xc8] ss:$16 sps:$4 sm:$0xff]   ;;  %v4779_v63 = vld [vmem:[#allocation8 + $0xe4] ss:$16 sps:$4 sm:$0xff]  }
  0x6e   :  { %v4781_v1 = vld [vmem:[#allocation8 + $0xec] ss:$16 sps:$4 sm:$0xff]   ;;  %v4787_v2 = vld [vmem:[#allocation8 + $0xe0] ss:$16 sps:$4 sm:$0xff]   ;;  %v4789_v3 = vld [vmem:[#allocation8 + $0xe8] ss:$16 sps:$4 sm:$0xff]  }
  0x6f   :  { %v4801_v4 = vld [vmem:[#allocation9 + $0x4] ss:$16 sps:$4 sm:$0xff]   ;;  %v4803_v5 = vld [vmem:[#allocation9 + $0xc] ss:$16 sps:$4 sm:$0xff]   ;;  %v4805_v6 = vld [vmem:[#allocation9] ss:$16 sps:$4 sm:$0xff]  }
  0x70   :  { %427 = vmatpush1.bf16.msra.mxu0 %v3818_v23  ;;  %468 = vmatpush1.bf16.msra.mxu1 %v3819_v24  ;;  %v4807_v7 = vld [vmem:[#allocation9 + $0x8] ss:$16 sps:$4 sm:$0xff]   ;;  %v4813_v8 = vld [vmem:[#allocation9 + $0x24] ss:$16 sps:$4 sm:$0xff]   ;;  %v4815_v9 = vld [vmem:[#allocation9 + $0x2c] ss:$16 sps:$4 sm:$0xff]  }
  0x71   :  { %428 = vmatprep.subr.bf16.mxu0 %v3820_v25  ;;  %469 = vmatprep.subr.bf16.mxu1 %v3822_v26  ;;  %v4817_v10 = vld [vmem:[#allocation9 + $0x20] ss:$16 sps:$4 sm:$0xff]   ;;  %v4819_v11 = vld [vmem:[#allocation9 + $0x28] ss:$16 sps:$4 sm:$0xff]   ;;  %v4825_v12 = vld [vmem:[#allocation9 + $0x44] ss:$16 sps:$4 sm:$0xff]  }
  0x72   :  { %v4827_v13 = vld [vmem:[#allocation9 + $0x4c] ss:$16 sps:$4 sm:$0xff]   ;;  %v4829_v14 = vld [vmem:[#allocation9 + $0x40] ss:$16 sps:$4 sm:$0xff]   ;;  %v4831_v15 = vld [vmem:[#allocation9 + $0x48] ss:$16 sps:$4 sm:$0xff]  }
  0x73   :  { %6656 = vst [vmem:[#allocation17_spill] sm:$0xff] %v4829_v14  ;;  %6657 = vst [vmem:[#allocation18_spill] sm:$0xff] %v4831_v15  ;;  %v4837_v16 = vld [vmem:[#allocation9 + $0x64] ss:$16 sps:$4 sm:$0xff]   ;;  %v4839_v17 = vld [vmem:[#allocation9 + $0x6c] ss:$16 sps:$4 sm:$0xff]  }
  0x74   :  { %429 = vmatpush1.bf16.msra.mxu0 %v3824_v27  ;;  %470 = vmatpush1.bf16.msra.mxu1 %v3825_v28  ;;  %6658 = vst [vmem:[#allocation19_spill] sm:$0xff] %v4837_v16  ;;  %6659 = vst [vmem:[#allocation20_spill] sm:$0xff] %v4839_v17  ;;  %v4841_v18 = vld [vmem:[#allocation9 + $0x60] ss:$16 sps:$4 sm:$0xff]   ;;  %v4843_v19 = vld [vmem:[#allocation9 + $0x68] ss:$16 sps:$4 sm:$0xff]  }
  0x75   :  { %430 = vmatprep.subr.bf16.mxu0 %v3826_v29  ;;  %471 = vmatprep.subr.bf16.mxu1 %v3828_v30  ;;  %6660 = vst [vmem:[#allocation21_spill] sm:$0xff] %v4841_v18  ;;  %6661 = vst [vmem:[#allocation22_spill] sm:$0xff] %v4843_v19  ;;  %v4849_v20 = vld [vmem:[#allocation9 + $0x84] ss:$16 sps:$4 sm:$0xff]   ;;  %v4851_v21 = vld [vmem:[#allocation9 + $0x8c] ss:$16 sps:$4 sm:$0xff]  }
  0x76   :  { %6662 = vst [vmem:[#allocation23_spill] sm:$0xff] %v4849_v20  ;;  %6663 = vst [vmem:[#allocation24_spill] sm:$0xff] %v4851_v21  ;;  %v4853_v22 = vld [vmem:[#allocation9 + $0x80] ss:$16 sps:$4 sm:$0xff]   ;;  %v4855_v23 = vld [vmem:[#allocation9 + $0x88] ss:$16 sps:$4 sm:$0xff]  }
  0x77   :  { %6664 = vst [vmem:[#allocation25_spill] sm:$0xff] %v4853_v22  ;;  %6665 = vst [vmem:[#allocation26_spill] sm:$0xff] %v4855_v23  ;;  %v4861_v24 = vld [vmem:[#allocation9 + $0xa4] ss:$16 sps:$4 sm:$0xff]   ;;  %v4863_v25 = vld [vmem:[#allocation9 + $0xac] ss:$16 sps:$4 sm:$0xff]  }
  0x78   :  { %431 = vmatpush1.bf16.msra.mxu0 %v3830_v31  ;;  %472 = vmatpush1.bf16.msra.mxu1 %v3831_v32  ;;  %6666 = vst [vmem:[#allocation27_spill] sm:$0xff] %v4861_v24  ;;  %6667 = vst [vmem:[#allocation28_spill] sm:$0xff] %v4863_v25  ;;  %v4865_v26 = vld [vmem:[#allocation9 + $0xa0] ss:$16 sps:$4 sm:$0xff]   ;;  %v4867_v27 = vld [vmem:[#allocation9 + $0xa8] ss:$16 sps:$4 sm:$0xff]  }
  0x79   :  { %658 = vmatprep.subr.bf16.mxu0 %v4699_v34  ;;  %699 = vmatprep.subr.bf16.mxu1 %v4701_v35  ;;  %6668 = vst [vmem:[#allocation29_spill] sm:$0xff] %v4865_v26  ;;  %6669 = vst [vmem:[#allocation30_spill] sm:$0xff] %v4867_v27  ;;  %v4869_v28 = vld [vmem:[#allocation9 + $0xc4] ss:$16 sps:$4 sm:$0xff]   ;;  %v4871_v29 = vld [vmem:[#allocation9 + $0xcc] ss:$16 sps:$4 sm:$0xff]  }
  0x7a   :  { %6670 = vst [vmem:[#allocation31_spill] sm:$0xff] %v4869_v28  ;;  %6671 = vst [vmem:[#allocation32_spill] sm:$0xff] %v4871_v29  ;;  %v4877_v30 = vld [vmem:[#allocation9 + $0xc0] ss:$16 sps:$4 sm:$0xff]   ;;  %v4879_v31 = vld [vmem:[#allocation9 + $0xc8] ss:$16 sps:$4 sm:$0xff]  }
  0x7b   :  { %449 = vmatmul.mubr.bf16.vlgmr.msra.gmra.mrb[0].mxu0 %v201_v36  ;;  %490 = vmatmul.mubr.bf16.vlgmr.msra.gmra.mrb[0].mxu1 %v201_v36  ;;  %6672 = vst [vmem:[#allocation33_spill] sm:$0xff] %v4877_v30  ;;  %6673 = vst [vmem:[#allocation34_spill] sm:$0xff] %v4879_v31  ;;  %v4883_v32 = vld [vmem:[#allocation9 + $0xe4] ss:$16 sps:$4 sm:$0xff]   ;;  %v4885_v33 = vld [vmem:[#allocation9 + $0xec] ss:$16 sps:$4 sm:$0xff]  }
  0x7c   :  { %659 = vmatpush1.bf16.msra.mxu0 %v4703_v37  ;;  %700 = vmatpush1.bf16.msra.mxu1 %v4705_v38  ;;  %6674 = vst [vmem:[#allocation35_spill] sm:$0xff] %v4883_v32  ;;  %6675 = vst [vmem:[#allocation36_spill] sm:$0xff] %v4885_v33  ;;  %v4889_v36 = vld [vmem:[#allocation9 + $0xe0] ss:$16 sps:$4 sm:$0xff]   ;;  %vm1313_vm0 = vcmask 7168   ;;  %vm1623_vm1 = vcmask 15368  }
  0x7d   :  { %660 = vmatprep.subr.bf16.mxu0 %v4707_v39  ;;  %701 = vmatprep.subr.bf16.mxu1 %v4711_v40  ;;  %6676 = vst [vmem:[#allocation37_spill] sm:$0xff] %v4889_v36  ;;  %vm1933_vm2 = vcmask 23568   ;;  %vm2243_vm3 = vcmask 31768   ;;  %vm2553_vm4 = vcmask 39968   ;;  %vm2863_vm5 = vcmask 48168  }
  0x7e   :  { %690 = vmatprep.mubr.bf16.mxu0 %v6369_v0  ;;  %731 = vmatprep.mubr.bf16.mxu1 %v6369_v0  ;;  %vm3173_vm6 = vcmask 56368   ;;  %vm3483_vm7 = vcmask 64568  }
  0x80   :  { %661 = vmatpush1.bf16.msra.mxu0 %v4713_v41  ;;  %702 = vmatpush1.bf16.msra.mxu1 %v4717_v42 }
  0x81   :  { %662 = vmatprep.subr.bf16.mxu0 %v4721_v43  ;;  %703 = vmatprep.subr.bf16.mxu1 %v4723_v44 }
  0x84   :  { %663 = vmatpush1.bf16.msra.mxu0 %v4727_v45  ;;  %704 = vmatpush1.bf16.msra.mxu1 %v4729_v46 }
  0x85   :  { %664 = vmatprep.subr.bf16.mxu0 %v4733_v47  ;;  %705 = vmatprep.subr.bf16.mxu1 %v4737_v48 }
  0x88   :  { %665 = vmatpush1.bf16.msra.mxu0 %v4739_v49  ;;  %706 = vmatpush1.bf16.msra.mxu1 %v4741_v50 }
  0x89   :  { %666 = vmatprep.subr.bf16.mxu0 %v4743_v51  ;;  %707 = vmatprep.subr.bf16.mxu1 %v4745_v52 }
  0x8c   :  { %667 = vmatpush1.bf16.msra.mxu0 %v4751_v53  ;;  %708 = vmatpush1.bf16.msra.mxu1 %v4753_v54 }
  0x8d   :  { %668 = vmatprep.subr.bf16.mxu0 %v4755_v55  ;;  %709 = vmatprep.subr.bf16.mxu1 %v4757_v56 }
  0x90   :  { %669 = vmatpush1.bf16.msra.mxu0 %v4763_v57  ;;  %710 = vmatpush1.bf16.msra.mxu1 %v4765_v58 }
  0x91   :  { %670 = vmatprep.subr.bf16.mxu0 %v4767_v59  ;;  %711 = vmatprep.subr.bf16.mxu1 %v4769_v60 }
  0x94   :  { %671 = vmatpush1.bf16.msra.mxu0 %v4775_v61  ;;  %712 = vmatpush1.bf16.msra.mxu1 %v4777_v62 }
  0x95   :  { %672 = vmatprep.subr.bf16.mxu0 %v4779_v63  ;;  %713 = vmatprep.subr.bf16.mxu1 %v4781_v1 }
  0x98   :  { %673 = vmatpush1.bf16.msra.mxu0 %v4787_v2  ;;  %714 = vmatpush1.bf16.msra.mxu1 %v4789_v3 }
  0x99   :  { %950 = vmatprep.subr.bf16.mxu0 %v4801_v4  ;;  %991 = vmatprep.subr.bf16.mxu1 %v4803_v5 }
  0x9b   :  { %691 = vmatmul.mubr.bf16.vlgmr.msra.gmra.mrb[4].mxu0 %v6369_v0  ;;  %732 = vmatmul.mubr.bf16.vlgmr.msra.gmra.mrb[4].mxu1 %v6369_v0 }
  0x9c   :  { %982 = vmatprep.mubr.bf16.mxu0 %v6369_v0  ;;  %1023 = vmatprep.mubr.bf16.mxu1 %v6369_v0  ;;  %v4891_v0 = vld [vmem:[#allocation9 + $0xe8] ss:$16 sps:$4 sm:$0xff]  }
  0x9d   :  { %951 = vmatpush1.bf16.msra.mxu0 %v4805_v6  ;;  %992 = vmatpush1.bf16.msra.mxu1 %v4807_v7  ;;  %6677 = vst [vmem:[#allocation38_spill] sm:$0xff] %v4891_v0 }
  0x9e   :  { %952 = vmatprep.subr.bf16.mxu0 %v4813_v8  ;;  %993 = vmatprep.subr.bf16.mxu1 %v4815_v9 }
  0xa1   :  { %953 = vmatpush1.bf16.msra.mxu0 %v4817_v10  ;;  %994 = vmatpush1.bf16.msra.mxu1 %v4819_v11 }
  0xa2   :  { %954 = vmatprep.subr.bf16.mxu0 %v4825_v12  ;;  %995 = vmatprep.subr.bf16.mxu1 %v4827_v13 }
  0xa5   :  { %955 = vmatpush1.bf16.msra.mxu0 %v4829_v14  ;;  %996 = vmatpush1.bf16.msra.mxu1 %v4831_v15 }
  0xa6   :  { %956 = vmatprep.subr.bf16.mxu0 %v4837_v16  ;;  %997 = vmatprep.subr.bf16.mxu1 %v4839_v17 }
  0xa9   :  { %957 = vmatpush1.bf16.msra.mxu0 %v4841_v18  ;;  %998 = vmatpush1.bf16.msra.mxu1 %v4843_v19 }
  0xaa   :  { %958 = vmatprep.subr.bf16.mxu0 %v4849_v20  ;;  %999 = vmatprep.subr.bf16.mxu1 %v4851_v21 }
  0xad   :  { %959 = vmatpush1.bf16.msra.mxu0 %v4853_v22  ;;  %1000 = vmatpush1.bf16.msra.mxu1 %v4855_v23  ;;  %v236_v23 = vlaneseq }
  0xae   :  { %960 = vmatprep.subr.bf16.mxu0 %v4861_v24  ;;  %1001 = vmatprep.subr.bf16.mxu1 %v4863_v25 }
  0xaf   :  { %v4903_v22 = vshrl.u32 %v236_v23, 7 }
  0xb1   :  { %961 = vmatpush1.bf16.msra.mxu0 %v4865_v26  ;;  %1002 = vmatpush1.bf16.msra.mxu1 %v4867_v27  ;;  %v4895_v27 = vld [vmem:[#allocation11 + $0x4] ss:$16 sps:$4 sm:$0xff]   ;;  %v6413_v21 = vsub.s32 0, %v4903_v22 }
  0xb2   :  { %962 = vmatprep.subr.bf16.mxu0 %v4869_v28  ;;  %1003 = vmatprep.subr.bf16.mxu1 %v4871_v29  ;;  %6678 = vst [vmem:[#allocation39_spill] sm:$0xff] %v4895_v27  ;;  %v4897_v28 = vld [vmem:[#allocation11 + $0xc] ss:$16 sps:$4 sm:$0xff]  }
  0xb3   :  { %6679 = vst [vmem:[#allocation40_spill] sm:$0xff] %v4897_v28 }
  0xb5   :  { %963 = vmatpush1.bf16.msra.mxu0 %v4877_v30  ;;  %1004 = vmatpush1.bf16.msra.mxu1 %v4879_v31 }
  0xb6   :  { %964 = vmatprep.subr.bf16.mxu0 %v4883_v32  ;;  %1005 = vmatprep.subr.bf16.mxu1 %v4885_v33 }
  0xb9   :  { %965 = vmatpush1.bf16.msra.mxu0 %v4889_v36  ;;  %1006 = vmatpush1.bf16.msra.mxu1 %v4891_v0  ;;  %v234_v0 = vld [vmem:[%s6362_s3] sm:$0xf] }
  0xba   :  { %1192 = vmatprep.subr.bf16.mxu0 %v4895_v27  ;;  %1233 = vmatprep.subr.bf16.mxu1 %v4897_v28  ;;  %v6418_v27 = vsub.s32 1, %v4903_v22  ;;  %v239_v28 = vrot.slane %v234_v0, %v6413_v21 }
 0x14e   :  { %v450_v31 = vpop.f32.mrb[0].mxu0  ;;  %v491_v30 = vpop.f32.mrb[0].mxu1 }
 0x14f   :  { %v452_v29 = vpop.f32.mrb[1].mxu0  ;;  %v493_v26 = vpop.f32.mrb[1].mxu1 }
 0x150   :  { %v454_v25 = vpop.f32.mrb[2].mxu0  ;;  %v495_v32 = vpop.f32.mrb[2].mxu1 }
 0x151   :  { %v455_v24 = vpop.f32.mrb[3].mxu0  ;;  %v496_v33 = vpop.f32.mrb[3].mxu1  ;;  %v243_v25 = vrot.slane %v234_v0, %v6418_v27  ;;  %v4915_v32 = vadd.f32 %v450_v31, %v239_v28  ;;  %v6426_v27 = vsub.s32 2, %v4903_v22 }
 0x152   :  { %v6423_v24 = vsub.s32 3, %v4903_v22 }
 0x153   :  { %6680 = vst [vmem:[#allocation41_spill] sm:$0xff] %v4915_v32  ;;  %v4917_v23 = vadd.f32 %v452_v29, %v243_v25 }
 0x154   :  { %v251_v17 = vrot.slane %v234_v0, %v6423_v24 }
 0x155   :  { %6681 = vst [vmem:[#allocation42_spill] sm:$0xff] %v4917_v23 }
 0x156   :  { %v4924_v25 = vadd.f32 %v493_v26, %v251_v17 }
 0x158   :  { %6682 = vst [vmem:[#allocation43_spill] sm:$0xff] %v4924_v25 }
 0x16e   :  { %v692_v33 = vpop.f32.mrb[4].mxu0  ;;  %v733_v36 = vpop.f32.mrb[4].mxu1 }
 0x16f   :  { %v740_v20 = vadd.f32 %v692_v33, %v4915_v32  ;;  %v694_v19 = vpop.f32.mrb[5].mxu0  ;;  %v735_v18 = vpop.f32.mrb[5].mxu1  ;;  %v247_v33 = vrot.slane %v234_v0, %v6426_v27  ;;  %v4983_v27 = vld [vmem:[#allocation11 + $0x8c] ss:$16 sps:$4 sm:$0xff]  }
 0x170   :  { %v741_v21 = vadd.f32 %v694_v19, %v4917_v23  ;;  %v696_v16 = vpop.f32.mrb[6].mxu0  ;;  %v737_v15 = vpop.f32.mrb[6].mxu1  ;;  %v743_v32 = vadd.f32 %v735_v18, %v4924_v25  ;;  %6692 = vst [vmem:[#allocation52_spill] sm:$0xff] %v4983_v27 }
 0x171   :  { %v3566_v14 = vmul.f32 -1.442695, %v740_v20  ;;  %v697_v28 = vpop.f32.mrb[7].mxu0  ;;  %v738_v31 = vpop.f32.mrb[7].mxu1  ;;  %v4929_v24 = vadd.f32 %v491_v30, %v247_v33  ;;  %v4935_v33 = vld [vmem:[#allocation11] ss:$16 sps:$4 sm:$0xff]  }
 0x172   :  { %v3567_v29 = vmul.f32 -1.442695, %v741_v21  ;;  %v3568_v19 = vmul.f32 -1.442695, %v743_v32 }
 0x173   :  { %3976 = vpow2.f32 %v3566_v14  ;;  %v742_v15 = vadd.f32 %v733_v36, %v4929_v24 }
 0x174   :  { %3978 = vpow2.f32 %v3567_v29 }
 0x175   :  { %3980 = vpow2.f32 %v3568_v19 }
 0x176   :  { %3982 = vtanh.f32 %v742_v15  ;;  %v4941_v15 = vld [vmem:[#allocation11 + $0x24] ss:$16 sps:$4 sm:$0xff]  }
 0x17d   :  { %v3977_v16 = vpop.eup %3976 }
 0x17e   :  { %v3979_v23 = vpop.eup %3978  ;;  %v747_v20 = vadd.f32 1.0, %v3977_v16  ;;  %v4943_v16 = vld [vmem:[#allocation11 + $0x2c] ss:$16 sps:$4 sm:$0xff]  }
 0x17f   :  { %v753_v21 = vadd.f32 1.0, %v3979_v23  ;;  %v3981_v14 = vpop.eup %3980  ;;  %v4937_v23 = vld [vmem:[#allocation11 + $0x8] ss:$16 sps:$4 sm:$0xff]  }
 0x180   :  { %3984 = vrcp.f32 %v747_v20  ;;  %v3983_v17 = vpop.eup %3982  ;;  %v760_v31 = vadd.f32 1.0, %v3981_v14  ;;  %v4949_v20 = vld [vmem:[#allocation11 + $0x20] ss:$16 sps:$4 sm:$0xff]   ;;  %v4955_v14 = vld [vmem:[#allocation11 + $0x44] ss:$16 sps:$4 sm:$0xff]  }
 0x181   :  { %3986 = vrcp.f32 %v753_v21  ;;  %v4951_v21 = vld [vmem:[#allocation11 + $0x28] ss:$16 sps:$4 sm:$0xff]  }
 0x182   :  { %3988 = vrcp.f32 %v760_v31  ;;  %v4969_v31 = vld [vmem:[#allocation11 + $0x64] ss:$16 sps:$4 sm:$0xff]  }
 0x183   :  { %6687 = vst [vmem:[#allocation47_spill] sm:$0xff] %v4969_v31 }
 0x18a   :  { %v3985_v26 = vpop.eup %3984 }
 0x18b   :  { %v3987_v28 = vpop.eup %3986  ;;  %v764_v0 = vmul.f32 %v3985_v26, %v3983_v17  ;;  %v4957_v17 = vld [vmem:[#allocation11 + $0x4c] ss:$16 sps:$4 sm:$0xff]   ;;  %v6684_v26 = vmov 0  }
 0x18c   :  { %v763_v18 = vmul.f32 0.0, %v3987_v28  ;;  %v3989_v36 = vpop.eup %3988  ;;  %6683 = vst [vmem:[#allocation44_spill] sm:$0xff] %v4957_v17  ;;  %v4963_v28 = vld [vmem:[#allocation11 + $0x40] ss:$16 sps:$4 sm:$0xff]  }
 0x18d   :  { %6685 = vst [vmem:[#allocation45_spill] sm:$0xff] %v4963_v28 }
 0x18e   :  { %v4932_v30 = vadd.f32 %v764_v0, %v763_v18  ;;  %v4965_v0 = vld [vmem:[#allocation11 + $0x48] ss:$16 sps:$4 sm:$0xff]   ;;  %v4971_v18 = vld [vmem:[#allocation11 + $0x6c] ss:$16 sps:$4 sm:$0xff]  }
 0x18f   :  { %6686 = vst [vmem:[#allocation46_spill] sm:$0xff] %v4965_v0  ;;  %6688 = vst [vmem:[#allocation48_spill] sm:$0xff] %v4971_v18 }
 0x190   :  { %3990 = vtanh.f32 %v4932_v30 }
 0x19a   :  { %v3991_v32 = vpop.eup %3990 }
 0x19b   :  { %v767_v29 = vmul.f32 %v3991_v32, %v3989_v36  ;;  %v4975_v36 = vld [vmem:[#allocation11 + $0x60] ss:$16 sps:$4 sm:$0xff]   ;;  %v4977_v32 = vld [vmem:[#allocation11 + $0x68] ss:$16 sps:$4 sm:$0xff]  }
 0x19c   :  { %6689 = vst [vmem:[#allocation49_spill] sm:$0xff] %v4975_v36  ;;  %6690 = vst [vmem:[#allocation50_spill] sm:$0xff] %v4977_v32 }
 0x19d   :  { %v4939_v19 = vpack.c.bf16 %v767_v29, %v767_v29  ;;  %v4981_v29 = vld [vmem:[#allocation11 + $0x84] ss:$16 sps:$4 sm:$0xff]  }
 0x19e   :  { %6691 = vst [vmem:[#allocation51_spill] sm:$0xff] %v4981_v29 }
 0x19f   :  { %983 = vmatmul.mubr.bf16.vlgmr.msra.gmra.mrb[8].mxu0 %v4939_v19  ;;  %1024 = vmatmul.mubr.bf16.vlgmr.msra.gmra.mrb[8].mxu1 %v4939_v19 }
 0x1a0   :  { %1193 = vmatpush1.bf16.msra.mxu0 %v4935_v33  ;;  %1234 = vmatpush1.bf16.msra.mxu1 %v4937_v23 }
 0x1a1   :  { %1194 = vmatprep.subr.bf16.mxu0 %v4941_v15  ;;  %1235 = vmatprep.subr.bf16.mxu1 %v4943_v16 }
 0x1a2   :  { %1224 = vmatprep.mubr.bf16.mxu0 %v6684_v26  ;;  %1265 = vmatprep.mubr.bf16.mxu1 %v6684_v26 }
 0x1a4   :  { %1195 = vmatpush1.bf16.msra.mxu0 %v4949_v20  ;;  %1236 = vmatpush1.bf16.msra.mxu1 %v4951_v21 }
 0x1a5   :  { %1196 = vmatprep.subr.bf16.mxu0 %v4955_v14  ;;  %1237 = vmatprep.subr.bf16.mxu1 %v4957_v17  ;;  %v4987_v17 = vld [vmem:[#allocation11 + $0x80] ss:$16 sps:$4 sm:$0xff]  }
 0x1a6   :  { %6693 = vst [vmem:[#allocation53_spill] sm:$0xff] %v4987_v17 }
 0x1a8   :  { %1197 = vmatpush1.bf16.msra.mxu0 %v4963_v28  ;;  %1238 = vmatpush1.bf16.msra.mxu1 %v4965_v0  ;;  %v4989_v28 = vld [vmem:[#allocation11 + $0x88] ss:$16 sps:$4 sm:$0xff]   ;;  %v4993_v0 = vld [vmem:[#allocation11 + $0xa4] ss:$16 sps:$4 sm:$0xff]  }
 0x1a9   :  { %1198 = vmatprep.subr.bf16.mxu0 %v4969_v31  ;;  %1239 = vmatprep.subr.bf16.mxu1 %v4971_v18  ;;  %6694 = vst [vmem:[#allocation54_spill] sm:$0xff] %v4989_v28  ;;  %6695 = vst [vmem:[#allocation55_spill] sm:$0xff] %v4993_v0  ;;  %v4995_v31 = vld [vmem:[#allocation11 + $0xac] ss:$16 sps:$4 sm:$0xff]   ;;  %v4999_v18 = vld [vmem:[#allocation11 + $0xa0] ss:$16 sps:$4 sm:$0xff]  }
 0x1aa   :  { %6696 = vst [vmem:[#allocation56_spill] sm:$0xff] %v4995_v31  ;;  %6697 = vst [vmem:[#allocation57_spill] sm:$0xff] %v4999_v18 }
 0x1ac   :  { %1199 = vmatpush1.bf16.msra.mxu0 %v4975_v36  ;;  %1240 = vmatpush1.bf16.msra.mxu1 %v4977_v32  ;;  %v5001_v36 = vld [vmem:[#allocation11 + $0xa8] ss:$16 sps:$4 sm:$0xff]   ;;  %v5005_v32 = vld [vmem:[#allocation11 + $0xc4] ss:$16 sps:$4 sm:$0xff]  }
 0x1ad   :  { %1200 = vmatprep.subr.bf16.mxu0 %v4981_v29  ;;  %1241 = vmatprep.subr.bf16.mxu1 %v4983_v27  ;;  %6698 = vst [vmem:[#allocation58_spill] sm:$0xff] %v5005_v32  ;;  %v5007_v29 = vld [vmem:[#allocation11 + $0xcc] ss:$16 sps:$4 sm:$0xff]   ;;  %v5011_v27 = vld [vmem:[#allocation11 + $0xc0] ss:$16 sps:$4 sm:$0xff]  }
 0x1b0   :  { %1201 = vmatpush1.bf16.msra.mxu0 %v4987_v17  ;;  %1242 = vmatpush1.bf16.msra.mxu1 %v4989_v28  ;;  %v5013_v17 = vld [vmem:[#allocation11 + $0xc8] ss:$16 sps:$4 sm:$0xff]   ;;  %v5017_v28 = vld [vmem:[#allocation11 + $0xe4] ss:$16 sps:$4 sm:$0xff]  }
 0x1b1   :  { %1202 = vmatprep.subr.bf16.mxu0 %v4993_v0  ;;  %1243 = vmatprep.subr.bf16.mxu1 %v4995_v31  ;;  %6699 = vst [vmem:[#allocation59_spill] sm:$0xff] %v5013_v17  ;;  %v5019_v0 = vld [vmem:[#allocation11 + $0xec] ss:$16 sps:$4 sm:$0xff]   ;;  %v5023_v31 = vld [vmem:[#allocation11 + $0xe0] ss:$16 sps:$4 sm:$0xff]  }
 0x1b2   :  { %6700 = vst [vmem:[#allocation60_spill] sm:$0xff] %v5019_v0 }
 0x1b4   :  { %1203 = vmatpush1.bf16.msra.mxu0 %v4999_v18  ;;  %1244 = vmatpush1.bf16.msra.mxu1 %v5001_v36  ;;  %v5025_v18 = vld [vmem:[#allocation11 + $0xe8] ss:$16 sps:$4 sm:$0xff]  }
 0x1b5   :  { %1204 = vmatprep.subr.bf16.mxu0 %v5005_v32  ;;  %1245 = vmatprep.subr.bf16.mxu1 %v5007_v29  ;;  %6701 = vst [vmem:[#allocation61_spill] sm:$0xff] %v5025_v18 }
 0x1b8   :  { %1205 = vmatpush1.bf16.msra.mxu0 %v5011_v27  ;;  %1246 = vmatpush1.bf16.msra.mxu1 %v5013_v17 }
 0x1b9   :  { %1206 = vmatprep.subr.bf16.mxu0 %v5017_v28  ;;  %1247 = vmatprep.subr.bf16.mxu1 %v5019_v0 }
 0x1bc   :  { %1207 = vmatpush1.bf16.msra.mxu0 %v5023_v31  ;;  %1248 = vmatpush1.bf16.msra.mxu1 %v5025_v18 }
 0x1bd   :  { %1315 = vmatprep.subr.bf16.mxu0 %v4699_v34  ;;  %1356 = vmatprep.subr.bf16.mxu1 %v4701_v35  ;;  %v6702_v34 = vld [vmem:[#allocation17_spill] sm:$0xff]  ;;  %v6703_v35 = vld [vmem:[#allocation18_spill] sm:$0xff] }
 0x1bf   :  { %1225 = vmatmul.mubr.bf16.vlgmr.msra.gmra.mrb[8].mxu0 %v6684_v26  ;;  %1266 = vmatmul.mubr.bf16.vlgmr.msra.gmra.mrb[8].mxu1 %v6684_v26 }
 0x1c0   :  { %1316 = vmatpush1.bf16.msra.mxu0 %v4703_v37  ;;  %1357 = vmatpush1.bf16.msra.mxu1 %v4705_v38  ;;  %v6704_v37 = vld [vmem:[#allocation19_spill] sm:$0xff]  ;;  %v6705_v38 = vld [vmem:[#allocation20_spill] sm:$0xff] }
 0x1c1   :  { %1317 = vmatprep.subr.bf16.mxu0 %v4707_v39  ;;  %1358 = vmatprep.subr.bf16.mxu1 %v4711_v40  ;;  %v6706_v39 = vld [vmem:[#allocation21_spill] sm:$0xff]  ;;  %v6707_v40 = vld [vmem:[#allocation22_spill] sm:$0xff] }
 0x1c2   :  { %1347 = vmatprep.mubr.bf16.mxu0 %v6684_v26  ;;  %1388 = vmatprep.mubr.bf16.mxu1 %v6684_v26 }
 0x1c4   :  { %1318 = vmatpush1.bf16.msra.mxu0 %v4713_v41  ;;  %1359 = vmatpush1.bf16.msra.mxu1 %v4717_v42  ;;  %v6708_v41 = vld [vmem:[#allocation23_spill] sm:$0xff]  ;;  %v6709_v42 = vld [vmem:[#allocation24_spill] sm:$0xff] }
 0x1c5   :  { %1319 = vmatprep.subr.bf16.mxu0 %v4721_v43  ;;  %1360 = vmatprep.subr.bf16.mxu1 %v4723_v44  ;;  %v6710_v43 = vld [vmem:[#allocation25_spill] sm:$0xff]  ;;  %v6711_v44 = vld [vmem:[#allocation26_spill] sm:$0xff] }
 0x1c8   :  { %1320 = vmatpush1.bf16.msra.mxu0 %v4727_v45  ;;  %1361 = vmatpush1.bf16.msra.mxu1 %v4729_v46  ;;  %v6712_v45 = vld [vmem:[#allocation27_spill] sm:$0xff]  ;;  %v6713_v46 = vld [vmem:[#allocation28_spill] sm:$0xff] }
 0x1c9   :  { %1321 = vmatprep.subr.bf16.mxu0 %v4733_v47  ;;  %1362 = vmatprep.subr.bf16.mxu1 %v4737_v48  ;;  %v6714_v47 = vld [vmem:[#allocation29_spill] sm:$0xff]  ;;  %v6715_v48 = vld [vmem:[#allocation30_spill] sm:$0xff] }
 0x1cc   :  { %1322 = vmatpush1.bf16.msra.mxu0 %v4739_v49  ;;  %1363 = vmatpush1.bf16.msra.mxu1 %v4741_v50  ;;  %v6716_v49 = vld [vmem:[#allocation31_spill] sm:$0xff]  ;;  %v6717_v50 = vld [vmem:[#allocation32_spill] sm:$0xff] }
 0x1cd   :  { %1323 = vmatprep.subr.bf16.mxu0 %v4743_v51  ;;  %1364 = vmatprep.subr.bf16.mxu1 %v4745_v52  ;;  %v6718_v51 = vld [vmem:[#allocation33_spill] sm:$0xff]  ;;  %v6719_v52 = vld [vmem:[#allocation34_spill] sm:$0xff] }
 0x1d0   :  { %1324 = vmatpush1.bf16.msra.mxu0 %v4751_v53  ;;  %1365 = vmatpush1.bf16.msra.mxu1 %v4753_v54 }
 0x1d1   :  { %1325 = vmatprep.subr.bf16.mxu0 %v4755_v55  ;;  %1366 = vmatprep.subr.bf16.mxu1 %v4757_v56 }
 0x1d4   :  { %1326 = vmatpush1.bf16.msra.mxu0 %v4763_v57  ;;  %1367 = vmatpush1.bf16.msra.mxu1 %v4765_v58 }
 0x1d5   :  { %1327 = vmatprep.subr.bf16.mxu0 %v4767_v59  ;;  %1368 = vmatprep.subr.bf16.mxu1 %v4769_v60 }
 0x1d8   :  { %1328 = vmatpush1.bf16.msra.mxu0 %v4775_v61  ;;  %1369 = vmatpush1.bf16.msra.mxu1 %v4777_v62 }
 0x1d9   :  { %1329 = vmatprep.subr.bf16.mxu0 %v4779_v63  ;;  %1370 = vmatprep.subr.bf16.mxu1 %v4781_v1 }
 0x1dc   :  { %1330 = vmatpush1.bf16.msra.mxu0 %v4787_v2  ;;  %1371 = vmatpush1.bf16.msra.mxu1 %v4789_v3 }
 0x1dd   :  { %1426 = vmatprep.subr.bf16.mxu0 %v4801_v4  ;;  %1467 = vmatprep.subr.bf16.mxu1 %v4803_v5 }
 0x1df   :  { %1348 = vmatmul.mubr.bf16.vlgmr.msra.gmra.mrb[12].mxu0 %v4939_v19  ;;  %1389 = vmatmul.mubr.bf16.vlgmr.msra.gmra.mrb[12].mxu1 %v4939_v19  ;;  %v6720_v19 = vld [vmem:[#allocation35_spill] sm:$0xff] }
 0x1e0   :  { %1427 = vmatpush1.bf16.msra.mxu0 %v4805_v6  ;;  %1468 = vmatpush1.bf16.msra.mxu1 %v4807_v7 }
 0x1e1   :  { %1428 = vmatprep.subr.bf16.mxu0 %v4813_v8  ;;  %1469 = vmatprep.subr.bf16.mxu1 %v4815_v9 }
 0x1e2   :  { %1458 = vmatprep.mubr.bf16.mxu0 %v6684_v26  ;;  %1499 = vmatprep.mubr.bf16.mxu1 %v6684_v26 }
 0x1e4   :  { %1429 = vmatpush1.bf16.msra.mxu0 %v4817_v10  ;;  %1470 = vmatpush1.bf16.msra.mxu1 %v4819_v11 }
 0x1e5   :  { %1430 = vmatprep.subr.bf16.mxu0 %v4825_v12  ;;  %1471 = vmatprep.subr.bf16.mxu1 %v4827_v13 }
 0x1e8   :  { %1431 = vmatpush1.bf16.msra.mxu0 %v6702_v34  ;;  %1472 = vmatpush1.bf16.msra.mxu1 %v6703_v35 }
 0x1e9   :  { %1432 = vmatprep.subr.bf16.mxu0 %v6704_v37  ;;  %1473 = vmatprep.subr.bf16.mxu1 %v6705_v38 }
 0x1ec   :  { %1433 = vmatpush1.bf16.msra.mxu0 %v6706_v39  ;;  %1474 = vmatpush1.bf16.msra.mxu1 %v6707_v40 }
 0x1ed   :  { %1434 = vmatprep.subr.bf16.mxu0 %v6708_v41  ;;  %1475 = vmatprep.subr.bf16.mxu1 %v6709_v42 }
 0x1f0   :  { %1435 = vmatpush1.bf16.msra.mxu0 %v6710_v43  ;;  %1476 = vmatpush1.bf16.msra.mxu1 %v6711_v44  ;;  %v6721_v43 = vld [vmem:[#allocation36_spill] sm:$0xff]  ;;  %v6722_v44 = vld [vmem:[#allocation37_spill] sm:$0xff] }
 0x1f1   :  { %1436 = vmatprep.subr.bf16.mxu0 %v6712_v45  ;;  %1477 = vmatprep.subr.bf16.mxu1 %v6713_v46  ;;  %v6723_v45 = vld [vmem:[#allocation38_spill] sm:$0xff]  ;;  %v6724_v46 = vld [vmem:[#allocation39_spill] sm:$0xff] }
 0x1f4   :  { %1437 = vmatpush1.bf16.msra.mxu0 %v6714_v47  ;;  %1478 = vmatpush1.bf16.msra.mxu1 %v6715_v48  ;;  %v6725_v47 = vld [vmem:[#allocation40_spill] sm:$0xff] }
 0x1f5   :  { %1438 = vmatprep.subr.bf16.mxu0 %v6716_v49  ;;  %1479 = vmatprep.subr.bf16.mxu1 %v6717_v50  ;;  %v197_v50 = vld [vmem:[%s6365_s6] sm:$0xf] }
 0x1f8   :  { %1439 = vmatpush1.bf16.msra.mxu0 %v6718_v51  ;;  %1480 = vmatpush1.bf16.msra.mxu1 %v6719_v52  ;;  %v6726_v51 = vsub.s32 0, %v4903_v22 }
 0x1f9   :  { %1440 = vmatprep.subr.bf16.mxu0 %v6720_v19  ;;  %1481 = vmatprep.subr.bf16.mxu1 %v6721_v43  ;;  %v6728_v19 = vsub.s32 1, %v4903_v22 }
 0x1fa   :  { %v5110_v49 = vrot.slane %v197_v50, %v6726_v51  ;;  %v6730_v51 = vsub.s32 3, %v4903_v22 }
 0x1fb   :  { %v5114_v52 = vrot.slane %v197_v50, %v6728_v19 }
 0x1fc   :  { %1441 = vmatpush1.bf16.msra.mxu0 %v6722_v44  ;;  %1482 = vmatpush1.bf16.msra.mxu1 %v6723_v45  ;;  %6727 = vst [vmem:[#allocation62_spill] sm:$0xff] %v5110_v49  ;;  %v5120_v37 = vrot.slane %v197_v50, %v6730_v51 }
 0x1fd   :  { %1509 = vmatprep.subr.bf16.mxu0 %v6724_v46  ;;  %1550 = vmatprep.subr.bf16.mxu1 %v6725_v47  ;;  %6729 = vst [vmem:[#allocation63_spill] sm:$0xff] %v5114_v52 }
 0x1fe   :  { %6731 = vst [vmem:[#allocation64_spill] sm:$0xff] %v5120_v37 }
 0x292   :  { %v1226_v43 = vpop.f32.mrb[8].mxu0  ;;  %v1267_v44 = vpop.f32.mrb[8].mxu1 }
 0x293   :  { %v3679_v45 = vadd.f32 %v1226_v43, %v5110_v49  ;;  %v1228_v48 = vpop.f32.mrb[9].mxu0  ;;  %v1269_v46 = vpop.f32.mrb[9].mxu1  ;;  %v6732_v43 = vsub.s32 2, %v4903_v22 }
 0x294   :  { %v3680_v47 = vadd.f32 %v1228_v48, %v5114_v52  ;;  %v1230_v42 = vpop.f32.mrb[10].mxu0  ;;  %v1271_v41 = vpop.f32.mrb[10].mxu1  ;;  %v3682_v19 = vadd.f32 %v1269_v46, %v5120_v37 }
 0x295   :  { %v3633_v40 = vmul.f32 -1.442695, %v3679_v45  ;;  %v1231_v39 = vpop.f32.mrb[11].mxu0  ;;  %v1272_v38 = vpop.f32.mrb[11].mxu1  ;;  %v5125_v49 = vrot.slane %v197_v50, %v6732_v43 }
 0x296   :  { %v3634_v35 = vmul.f32 -1.442695, %v3680_v47  ;;  %v3635_v34 = vmul.f32 -1.442695, %v3682_v19 }
 0x297   :  { %3992 = vpow2.f32 %v3633_v40  ;;  %6733 = vst [vmem:[#allocation65_spill] sm:$0xff] %v5125_v49  ;;  %v3681_v42 = vadd.f32 %v1267_v44, %v5125_v49  ;;  %v6734_v44 = vld [vmem:[#allocation41_spill] sm:$0xff] }
 0x298   :  { %3994 = vpow2.f32 %v3634_v35 }
 0x299   :  { %3996 = vpow2.f32 %v3635_v34 }
 0x29a   :  { %3998 = vtanh.f32 %v3681_v42  ;;  %v6735_v42 = vld [vmem:[#allocation42_spill] sm:$0xff] }
 0x2a1   :  { %v3993_v41 = vpop.eup %3992 }
 0x2a2   :  { %v3995_v45 = vpop.eup %3994  ;;  %v1281_v39 = vadd.f32 1.0, %v3993_v41 }
 0x2a3   :  { %v1287_v38 = vadd.f32 1.0, %v3995_v45  ;;  %v3997_v47 = vpop.eup %3996 }
 0x2a4   :  { %4000 = vrcp.f32 %v1281_v39  ;;  %v3999_v40 = vpop.eup %3998  ;;  %v1294_v51 = vadd.f32 1.0, %v3997_v47 }
 0x2a5   :  { %4002 = vrcp.f32 %v1287_v38 }
 0x2a6   :  { %4004 = vrcp.f32 %v1294_v51 }
 0x2ae   :  { %v4001_v35 = vpop.eup %4000 }
 0x2af   :  { %v4003_v48 = vpop.eup %4002  ;;  %v1298_v46 = vmul.f32 %v4001_v35, %v3999_v40 }
 0x2b0   :  { %v1297_v22 = vmul.f32 0.0, %v4003_v48  ;;  %v4005_v48 = vpop.eup %4004 }
 0x2b2   :  { %v5128_v50 = vadd.f32 %v1298_v46, %v1297_v22  ;;  %v1349_v19 = vpop.f32.mrb[12].mxu0  ;;  %v1390_v43 = vpop.f32.mrb[12].mxu1  ;;  %v5137_v22 = vld [vmem:[%s6366_s7] ss:$0 sm:$0xff] }
 0x2b3   :  { %v1397_v49 = vadd.f32 %v1349_v19, %v6734_v44  ;;  %v1351_v41 = vpop.f32.mrb[13].mxu0  ;;  %v1392_v34 = vpop.f32.mrb[13].mxu1  ;;  %v1399_v19 = vadd.f32 %v1390_v43, %v4929_v24 }
 0x2b4   :  { %4006 = vtanh.f32 %v5128_v50  ;;  %v1398_v45 = vadd.f32 %v1351_v41, %v6735_v42  ;;  %v1353_v39 = vpop.f32.mrb[14].mxu0  ;;  %v1394_v38 = vpop.f32.mrb[14].mxu1  ;;  %v1400_v35 = vadd.f32 %v1392_v34, %v4924_v25 }
 0x2b5   :  { %v3637_v37 = vmul.f32 -1.442695, %v1397_v49  ;;  %v1354_v52 = vpop.f32.mrb[15].mxu0  ;;  %v1395_v40 = vpop.f32.mrb[15].mxu1 }
 0x2b6   :  { %v3638_v47 = vmul.f32 -1.442695, %v1398_v45  ;;  %v3639_v51 = vmul.f32 -1.442695, %v1400_v35 }
 0x2b7   :  { %4008 = vpow2.f32 %v3637_v37 }
 0x2b8   :  { %4010 = vpow2.f32 %v3638_v47 }
 0x2b9   :  { %4012 = vpow2.f32 %v3639_v51 }
 0x2ba   :  { %4014 = vtanh.f32 %v1399_v19 }
 0x2be   :  { %v4007_v46 = vpop.eup %4006 }
 0x2bf   :  { %v1301_v41 = vmul.f32 %v4007_v46, %v4005_v48 }
 0x2c1   :  { %v4009_v39 = vpop.eup %4008  ;;  %v1308_v49 = vmul.f32 %v5137_v22, %v1301_v41 }
 0x2c2   :  { %v4011_v52 = vpop.eup %4010  ;;  %v1404_v45 = vadd.f32 1.0, %v4009_v39 }
 0x2c3   :  { %v1410_v37 = vadd.f32 1.0, %v4011_v52  ;;  %1309 = vadd.xlane.f32.xlu0 %v1308_v49  ;;  %v4013_v34 = vpop.eup %4012  ;;  %v6738_v49 = vld [vmem:[#allocation46_spill] sm:$0xff]  ;;  %v6739_v52 = vld [vmem:[#allocation47_spill] sm:$0xff] }
 0x2c4   :  { %4016 = vrcp.f32 %v1404_v45  ;;  %v4015_v38 = vpop.eup %4014  ;;  %v1417_v25 = vadd.f32 1.0, %v4013_v34  ;;  %v6740_v45 = vld [vmem:[#allocation48_spill] sm:$0xff]  ;;  %v6742_v34 = vld [vmem:[#allocation50_spill] sm:$0xff] }
 0x2c5   :  { %4018 = vrcp.f32 %v1410_v37  ;;  %v6741_v37 = vld [vmem:[#allocation49_spill] sm:$0xff] }
 0x2c6   :  { %4020 = vrcp.f32 %v1417_v25  ;;  %v6736_v25 = vld [vmem:[#allocation44_spill] sm:$0xff] }
 0x2ce   :  { %v4017_v40 = vpop.eup %4016 }
 0x2cf   :  { %v4019_v47 = vpop.eup %4018  ;;  %v1421_v35 = vmul.f32 %v4017_v40, %v4015_v38  ;;  %v6743_v38 = vld [vmem:[#allocation51_spill] sm:$0xff]  ;;  %v6744_v40 = vld [vmem:[#allocation52_spill] sm:$0xff] }
 0x2d0   :  { %v1420_v43 = vmul.f32 %v4019_v47, %v4932_v30  ;;  %v4021_v46 = vpop.eup %4020  ;;  %v6737_v30 = vld [vmem:[#allocation45_spill] sm:$0xff] }
 0x2d1   :  { %v6745_v47 = vld [vmem:[#allocation53_spill] sm:$0xff] }
 0x2d2   :  { %v5142_v48 = vadd.f32 %v1421_v35, %v1420_v43  ;;  %v6746_v35 = vld [vmem:[#allocation54_spill] sm:$0xff]  ;;  %v6747_v43 = vld [vmem:[#allocation55_spill] sm:$0xff] }
 0x2d4   :  { %4022 = vtanh.f32 %v5142_v48 }
 0x2de   :  { %v4023_v51 = vpop.eup %4022 }
 0x2df   :  { %v1424_v19 = vmul.f32 %v4023_v51, %v4021_v46  ;;  %v6748_v46 = vld [vmem:[#allocation56_spill] sm:$0xff]  ;;  %v6749_v51 = vld [vmem:[#allocation57_spill] sm:$0xff] }
 0x2e1   :  { %v5145_v39 = vpack.c.bf16 %v1424_v19, %v1424_v19  ;;  %v1508_v19 = vpack.c.bf16 %v1301_v41, %v1301_v41  ;;  %v5196_v41 = vld [vmem:[#allocation8 + $0x2c] ss:$16 sps:$4 sm:$0xff]  }
 0x2e2   :  { %6754 = vst [vmem:[#allocation46_spill] sm:$0xff] %v5196_v41 }
 0x2e3   :  { %1459 = vmatmul.mubr.bf16.vlgmr.msra.gmra.mrb[16].mxu0 %v5145_v39  ;;  %1500 = vmatmul.mubr.bf16.vlgmr.msra.gmra.mrb[16].mxu1 %v5145_v39 }
 0x2e4   :  { %1510 = vmatpush1.bf16.msra.mxu0 %v4935_v33  ;;  %1551 = vmatpush1.bf16.msra.mxu1 %v4937_v23 }
 0x2e5   :  { %1511 = vmatprep.subr.bf16.mxu0 %v4941_v15  ;;  %1552 = vmatprep.subr.bf16.mxu1 %v4943_v16 }
 0x2e6   :  { %1541 = vmatprep.mubr.bf16.mxu0 %v6684_v26  ;;  %1582 = vmatprep.mubr.bf16.mxu1 %v6684_v26 }
 0x2e8   :  { %1512 = vmatpush1.bf16.msra.mxu0 %v4949_v20  ;;  %1553 = vmatpush1.bf16.msra.mxu1 %v4951_v21 }
 0x2e9   :  { %1513 = vmatprep.subr.bf16.mxu0 %v4955_v14  ;;  %1554 = vmatprep.subr.bf16.mxu1 %v6736_v25 }
 0x2ec   :  { %1514 = vmatpush1.bf16.msra.mxu0 %v6737_v30  ;;  %1555 = vmatpush1.bf16.msra.mxu1 %v6738_v49 }
 0x2ed   :  { %1515 = vmatprep.subr.bf16.mxu0 %v6739_v52  ;;  %1556 = vmatprep.subr.bf16.mxu1 %v6740_v45 }
 0x2f0   :  { %1516 = vmatpush1.bf16.msra.mxu0 %v6741_v37  ;;  %1557 = vmatpush1.bf16.msra.mxu1 %v6742_v34 }
 0x2f1   :  { %1517 = vmatprep.subr.bf16.mxu0 %v6743_v38  ;;  %1558 = vmatprep.subr.bf16.mxu1 %v6744_v40 }
 0x2f4   :  { %1518 = vmatpush1.bf16.msra.mxu0 %v6745_v47  ;;  %1559 = vmatpush1.bf16.msra.mxu1 %v6746_v35 }
 0x2f5   :  { %1519 = vmatprep.subr.bf16.mxu0 %v6747_v43  ;;  %1560 = vmatprep.subr.bf16.mxu1 %v6748_v46 }
 0x2f8   :  { %1520 = vmatpush1.bf16.msra.mxu0 %v6749_v51  ;;  %1561 = vmatpush1.bf16.msra.mxu1 %v5001_v36  ;;  %v5181_v51 = vld [vmem:[#allocation8 + $0x4] ss:$16 sps:$4 sm:$0xff]  }
 0x2f9   :  { %1521 = vmatprep.subr.bf16.mxu0 %v5005_v32  ;;  %1562 = vmatprep.subr.bf16.mxu1 %v5007_v29  ;;  %v5184_v32 = vld [vmem:[#allocation8 + $0xc] ss:$16 sps:$4 sm:$0xff]  }
 0x2fa   :  { %6750 = vst [vmem:[#allocation41_spill] sm:$0xff] %v5184_v32 }
 0x2fc   :  { %1522 = vmatpush1.bf16.msra.mxu0 %v5011_v27  ;;  %1563 = vmatpush1.bf16.msra.mxu1 %v5013_v17  ;;  %v5187_v17 = vld [vmem:[#allocation8] ss:$16 sps:$4 sm:$0xff]  }
 0x2fd   :  { %1523 = vmatprep.subr.bf16.mxu0 %v5017_v28  ;;  %1564 = vmatprep.subr.bf16.mxu1 %v5019_v0  ;;  %6751 = vst [vmem:[#allocation42_spill] sm:$0xff] %v5187_v17  ;;  %v5190_v0 = vld [vmem:[#allocation8 + $0x8] ss:$16 sps:$4 sm:$0xff]  }
 0x2fe   :  { %6752 = vst [vmem:[#allocation44_spill] sm:$0xff] %v5190_v0 }
 0x300   :  { %1524 = vmatpush1.bf16.msra.mxu0 %v5023_v31  ;;  %1565 = vmatpush1.bf16.msra.mxu1 %v5025_v18  ;;  %v5193_v18 = vld [vmem:[#allocation8 + $0x24] ss:$16 sps:$4 sm:$0xff]  }
 0x301   :  { %1625 = vmatprep.subr.bf16.mxu0 %v5181_v51  ;;  %1666 = vmatprep.subr.bf16.mxu1 %v5184_v32  ;;  %6753 = vst [vmem:[#allocation45_spill] sm:$0xff] %v5193_v18  ;;  %v5216_v32 = vld [vmem:[#allocation8 + $0x48] ss:$16 sps:$4 sm:$0xff]  }
 0x302   :  { %6760 = vst [vmem:[#allocation52_spill] sm:$0xff] %v5216_v32 }
 0x303   :  { %1542 = vmatmul.mubr.bf16.vlgmr.msra.gmra.mrb[16].mxu0 %v1508_v19  ;;  %1583 = vmatmul.mubr.bf16.vlgmr.msra.gmra.mrb[16].mxu1 %v1508_v19  ;;  %v5201_v19 = vld [vmem:[#allocation8 + $0x20] ss:$16 sps:$4 sm:$0xff]  }
 0x304   :  { %1626 = vmatpush1.bf16.msra.mxu0 %v5187_v17  ;;  %1667 = vmatpush1.bf16.msra.mxu1 %v5190_v0  ;;  %6755 = vst [vmem:[#allocation47_spill] sm:$0xff] %v5201_v19  ;;  %v5204_v17 = vld [vmem:[#allocation8 + $0x28] ss:$16 sps:$4 sm:$0xff]   ;;  %v5207_v0 = vld [vmem:[#allocation8 + $0x44] ss:$16 sps:$4 sm:$0xff]  }
 0x305   :  { %1627 = vmatprep.subr.bf16.mxu0 %v5193_v18  ;;  %1668 = vmatprep.subr.bf16.mxu1 %v5196_v41  ;;  %6756 = vst [vmem:[#allocation48_spill] sm:$0xff] %v5204_v17  ;;  %6757 = vst [vmem:[#allocation49_spill] sm:$0xff] %v5207_v0  ;;  %v5210_v18 = vld [vmem:[#allocation8 + $0x4c] ss:$16 sps:$4 sm:$0xff]   ;;  %v5213_v41 = vld [vmem:[#allocation8 + $0x40] ss:$16 sps:$4 sm:$0xff]  }
 0x306   :  { %1657 = vmatprep.mubr.bf16.mxu0 %v6684_v26  ;;  %1698 = vmatprep.mubr.bf16.mxu1 %v6684_v26  ;;  %6758 = vst [vmem:[#allocation50_spill] sm:$0xff] %v5210_v18  ;;  %6759 = vst [vmem:[#allocation51_spill] sm:$0xff] %v5213_v41 }
 0x308   :  { %1628 = vmatpush1.bf16.msra.mxu0 %v5201_v19  ;;  %1669 = vmatpush1.bf16.msra.mxu1 %v5204_v17  ;;  %v5219_v19 = vld [vmem:[#allocation8 + $0x64] ss:$16 sps:$4 sm:$0xff]   ;;  %v5222_v17 = vld [vmem:[#allocation8 + $0x6c] ss:$16 sps:$4 sm:$0xff]  }
 0x309   :  { %1629 = vmatprep.subr.bf16.mxu0 %v5207_v0  ;;  %1670 = vmatprep.subr.bf16.mxu1 %v5210_v18  ;;  %v5225_v0 = vld [vmem:[#allocation8 + $0x60] ss:$16 sps:$4 sm:$0xff]   ;;  %v5228_v18 = vld [vmem:[#allocation8 + $0x68] ss:$16 sps:$4 sm:$0xff]  }
 0x30c   :  { %1630 = vmatpush1.bf16.msra.mxu0 %v5213_v41  ;;  %1671 = vmatpush1.bf16.msra.mxu1 %v5216_v32  ;;  %v5231_v41 = vld [vmem:[#allocation8 + $0x84] ss:$16 sps:$4 sm:$0xff]   ;;  %v5234_v32 = vld [vmem:[#allocation8 + $0x8c] ss:$16 sps:$4 sm:$0xff]  }
 0x30d   :  { %1631 = vmatprep.subr.bf16.mxu0 %v5219_v19  ;;  %1672 = vmatprep.subr.bf16.mxu1 %v5222_v17 }
 0x310   :  { %1632 = vmatpush1.bf16.msra.mxu0 %v5225_v0  ;;  %1673 = vmatpush1.bf16.msra.mxu1 %v5228_v18 }
 0x311   :  { %1633 = vmatprep.subr.bf16.mxu0 %v5231_v41  ;;  %1674 = vmatprep.subr.bf16.mxu1 %v5234_v32 }
 0x314   :  { %1634 = vmatpush1.bf16.msra.mxu0 %v4751_v53  ;;  %1675 = vmatpush1.bf16.msra.mxu1 %v4753_v54  ;;  %v6761_v53 = vld [vmem:[#allocation17_spill] sm:$0xff]  ;;  %v6762_v54 = vld [vmem:[#allocation18_spill] sm:$0xff] }
 0x315   :  { %1635 = vmatprep.subr.bf16.mxu0 %v4755_v55  ;;  %1676 = vmatprep.subr.bf16.mxu1 %v4757_v56  ;;  %v6763_v55 = vld [vmem:[#allocation19_spill] sm:$0xff]  ;;  %v6764_v56 = vld [vmem:[#allocation20_spill] sm:$0xff] }
 0x318   :  { %1636 = vmatpush1.bf16.msra.mxu0 %v4763_v57  ;;  %1677 = vmatpush1.bf16.msra.mxu1 %v4765_v58  ;;  %v6765_v57 = vld [vmem:[#allocation21_spill] sm:$0xff]  ;;  %v6766_v58 = vld [vmem:[#allocation22_spill] sm:$0xff] }
 0x319   :  { %1637 = vmatprep.subr.bf16.mxu0 %v4767_v59  ;;  %1678 = vmatprep.subr.bf16.mxu1 %v4769_v60  ;;  %v6767_v59 = vld [vmem:[#allocation23_spill] sm:$0xff]  ;;  %v6768_v60 = vld [vmem:[#allocation24_spill] sm:$0xff] }
 0x31c   :  { %1638 = vmatpush1.bf16.msra.mxu0 %v4775_v61  ;;  %1679 = vmatpush1.bf16.msra.mxu1 %v4777_v62  ;;  %v6769_v61 = vld [vmem:[#allocation25_spill] sm:$0xff]  ;;  %v6770_v62 = vld [vmem:[#allocation26_spill] sm:$0xff] }
 0x31d   :  { %1639 = vmatprep.subr.bf16.mxu0 %v4779_v63  ;;  %1680 = vmatprep.subr.bf16.mxu1 %v4781_v1  ;;  %v6771_v63 = vld [vmem:[#allocation27_spill] sm:$0xff]  ;;  %v6772_v1 = vld [vmem:[#allocation28_spill] sm:$0xff] }
 0x320   :  { %1640 = vmatpush1.bf16.msra.mxu0 %v4787_v2  ;;  %1681 = vmatpush1.bf16.msra.mxu1 %v4789_v3  ;;  %v6773_v2 = vld [vmem:[#allocation29_spill] sm:$0xff]  ;;  %v6774_v3 = vld [vmem:[#allocation30_spill] sm:$0xff] }
 0x321   :  { %1736 = vmatprep.subr.bf16.mxu0 %v4801_v4  ;;  %1777 = vmatprep.subr.bf16.mxu1 %v4803_v5  ;;  %v6775_v4 = vld [vmem:[#allocation31_spill] sm:$0xff]  ;;  %v6776_v5 = vld [vmem:[#allocation32_spill] sm:$0xff] }
 0x323   :  { %1658 = vmatmul.mubr.bf16.vlgmr.msra.gmra.mrb[20].mxu0 %v5145_v39  ;;  %1699 = vmatmul.mubr.bf16.vlgmr.msra.gmra.mrb[20].mxu1 %v5145_v39  ;;  %v5292_v39 = vstv %s6367_s8 }
 0x324   :  { %1737 = vmatpush1.bf16.msra.mxu0 %v4805_v6  ;;  %1778 = vmatpush1.bf16.msra.mxu1 %v4807_v7  ;;  %v6777_v6 = vld [vmem:[#allocation33_spill] sm:$0xff]  ;;  %v6778_v7 = vld [vmem:[#allocation34_spill] sm:$0xff]  ;;  %6785 = vst [vmem:[#allocation53_spill] sm:$0xff] %v5292_v39 }
 0x325   :  { %1738 = vmatprep.subr.bf16.mxu0 %v4813_v8  ;;  %1779 = vmatprep.subr.bf16.mxu1 %v4815_v9  ;;  %v6779_v8 = vld [vmem:[#allocation35_spill] sm:$0xff]  ;;  %v6780_v9 = vld [vmem:[#allocation36_spill] sm:$0xff] }
 0x326   :  { %1768 = vmatprep.mubr.bf16.mxu0 %v6684_v26  ;;  %1809 = vmatprep.mubr.bf16.mxu1 %v6684_v26 }
 0x328   :  { %1739 = vmatpush1.bf16.msra.mxu0 %v4817_v10  ;;  %1780 = vmatpush1.bf16.msra.mxu1 %v4819_v11  ;;  %v6781_v10 = vld [vmem:[#allocation37_spill] sm:$0xff]  ;;  %v6782_v11 = vld [vmem:[#allocation38_spill] sm:$0xff] }
 0x329   :  { %1740 = vmatprep.subr.bf16.mxu0 %v4825_v12  ;;  %1781 = vmatprep.subr.bf16.mxu1 %v4827_v13  ;;  %v6783_v12 = vld [vmem:[#allocation39_spill] sm:$0xff]  ;;  %v6784_v13 = vld [vmem:[#allocation40_spill] sm:$0xff] }
 0x32c   :  { %1741 = vmatpush1.bf16.msra.mxu0 %v6761_v53  ;;  %1782 = vmatpush1.bf16.msra.mxu1 %v6762_v54 }
 0x32d   :  { %1742 = vmatprep.subr.bf16.mxu0 %v6763_v55  ;;  %1783 = vmatprep.subr.bf16.mxu1 %v6764_v56 }
 0x330   :  { %1743 = vmatpush1.bf16.msra.mxu0 %v6765_v57  ;;  %1784 = vmatpush1.bf16.msra.mxu1 %v6766_v58  ;;  %v6786_v57 = vld [vmem:[#allocation62_spill] sm:$0xff] }
 0x331   :  { %1744 = vmatprep.subr.bf16.mxu0 %v6767_v59  ;;  %1785 = vmatprep.subr.bf16.mxu1 %v6768_v60 }
 0x334   :  { %1745 = vmatpush1.bf16.msra.mxu0 %v6769_v61  ;;  %1786 = vmatpush1.bf16.msra.mxu1 %v6770_v62  ;;  %v6787_v61 = vld [vmem:[#allocation63_spill] sm:$0xff] }
 0x335   :  { %1746 = vmatprep.subr.bf16.mxu0 %v6771_v63  ;;  %1787 = vmatprep.subr.bf16.mxu1 %v6772_v1 }
 0x338   :  { %1747 = vmatpush1.bf16.msra.mxu0 %v6773_v2  ;;  %1788 = vmatpush1.bf16.msra.mxu1 %v6774_v3 }
 0x339   :  { %1748 = vmatprep.subr.bf16.mxu0 %v6775_v4  ;;  %1789 = vmatprep.subr.bf16.mxu1 %v6776_v5 }
 0x33c   :  { %1749 = vmatpush1.bf16.msra.mxu0 %v6777_v6  ;;  %1790 = vmatpush1.bf16.msra.mxu1 %v6778_v7  ;;  %v6788_v6 = vld [vmem:[#allocation64_spill] sm:$0xff] }
 0x33d   :  { %1750 = vmatprep.subr.bf16.mxu0 %v6779_v8  ;;  %1791 = vmatprep.subr.bf16.mxu1 %v6780_v9  ;;  %v6789_v9 = vld [vmem:[#allocation65_spill] sm:$0xff] }
 0x340   :  { %1751 = vmatpush1.bf16.msra.mxu0 %v6781_v10  ;;  %1792 = vmatpush1.bf16.msra.mxu1 %v6782_v11 }
 0x341   :  { %1819 = vmatprep.subr.bf16.mxu0 %v6783_v12  ;;  %1860 = vmatprep.subr.bf16.mxu1 %v6784_v13 }
 0x350   :  { %v1310_v53 = vpop.xlane.xlu0 %1309 }
 0x351   :  { %v1312_v54 = vadd.f32 %v5292_v39, %v1310_v53 }
 0x353   :  { %1314 = vst.msk [vmem:[#allocation12] sm:$0xff] %vm1313_vm0, %v1312_v54 }
 0x3d6   :  { %v1543_v55 = vpop.f32.mrb[16].mxu0  ;;  %v1584_v56 = vpop.f32.mrb[16].mxu1 }
 0x3d7   :  { %v3683_v58 = vadd.f32 %v1543_v55, %v6786_v57  ;;  %v1545_v59 = vpop.f32.mrb[17].mxu0  ;;  %v1586_v60 = vpop.f32.mrb[17].mxu1  ;;  %v3685_v10 = vadd.f32 %v1584_v56, %v6789_v9 }
 0x3d8   :  { %v3684_v62 = vadd.f32 %v1545_v59, %v6787_v61  ;;  %v1547_v63 = vpop.f32.mrb[18].mxu0  ;;  %v1588_v1 = vpop.f32.mrb[18].mxu1  ;;  %v3686_v7 = vadd.f32 %v1586_v60, %v6788_v6 }
 0x3d9   :  { %v3640_v2 = vmul.f32 -1.442695, %v3683_v58  ;;  %v1548_v3 = vpop.f32.mrb[19].mxu0  ;;  %v1589_v4 = vpop.f32.mrb[19].mxu1 }
 0x3da   :  { %v3641_v5 = vmul.f32 -1.442695, %v3684_v62  ;;  %v3642_v8 = vmul.f32 -1.442695, %v3686_v7 }
 0x3db   :  { %4024 = vpow2.f32 %v3640_v2 }
 0x3dc   :  { %4026 = vpow2.f32 %v3641_v5 }
 0x3dd   :  { %4028 = vpow2.f32 %v3642_v8 }
 0x3de   :  { %4030 = vtanh.f32 %v3685_v10 }
 0x3e5   :  { %v4025_v11 = vpop.eup %4024 }
 0x3e6   :  { %v4027_v12 = vpop.eup %4026  ;;  %v1598_v13 = vadd.f32 1.0, %v4025_v11 }
 0x3e7   :  { %v1604_v53 = vadd.f32 1.0, %v4027_v12  ;;  %v4029_v54 = vpop.eup %4028 }
 0x3e8   :  { %4032 = vrcp.f32 %v1598_v13  ;;  %v4031_v55 = vpop.eup %4030  ;;  %v1611_v63 = vadd.f32 1.0, %v4029_v54 }
 0x3e9   :  { %4034 = vrcp.f32 %v1604_v53 }
 0x3ea   :  { %4036 = vrcp.f32 %v1611_v63 }
 0x3f2   :  { %v4033_v58 = vpop.eup %4032 }
 0x3f3   :  { %v4035_v59 = vpop.eup %4034  ;;  %v1615_v62 = vmul.f32 %v4033_v58, %v4031_v55 }
 0x3f4   :  { %v1614_v1 = vmul.f32 %v4035_v59, %v5128_v50  ;;  %v6790_v50 = vld [vmem:[#allocation43_spill] sm:$0xff]  ;;  %v4037_v55 = vpop.eup %4036 }
 0x3f6   :  { %v1659_v60 = vpop.f32.mrb[20].mxu0  ;;  %v1700_v2 = vpop.f32.mrb[20].mxu1  ;;  %v5300_v3 = vadd.f32 %v1615_v62, %v1614_v1 }
 0x3f7   :  { %v1707_v56 = vadd.f32 %v1659_v60, %v6734_v44  ;;  %v1661_v4 = vpop.f32.mrb[21].mxu0  ;;  %v1702_v5 = vpop.f32.mrb[21].mxu1  ;;  %v1709_v62 = vadd.f32 %v1700_v2, %v4929_v24 }
 0x3f8   :  { %v1708_v7 = vadd.f32 %v1661_v4, %v6735_v42  ;;  %v1663_v8 = vpop.f32.mrb[22].mxu0  ;;  %v1704_v10 = vpop.f32.mrb[22].mxu1  ;;  %4038 = vtanh.f32 %v5300_v3  ;;  %v1710_v54 = vadd.f32 %v1702_v5, %v6790_v50 }
 0x3f9   :  { %v3643_v11 = vmul.f32 -1.442695, %v1707_v56  ;;  %v1664_v12 = vpop.f32.mrb[23].mxu0  ;;  %v1705_v13 = vpop.f32.mrb[23].mxu1 }
 0x3fa   :  { %v3644_v53 = vmul.f32 -1.442695, %v1708_v7  ;;  %v3645_v59 = vmul.f32 -1.442695, %v1710_v54 }
 0x3fb   :  { %4040 = vpow2.f32 %v3643_v11 }
 0x3fc   :  { %4042 = vpow2.f32 %v3644_v53 }
 0x3fd   :  { %4044 = vpow2.f32 %v3645_v59 }
 0x3fe   :  { %4046 = vtanh.f32 %v1709_v62  ;;  %v5395_v62 = vld [vmem:[#allocation8 + $0xc8] ss:$16 sps:$4 sm:$0xff]  }
 0x402   :  { %v4039_v58 = vpop.eup %4038 }
 0x403   :  { %v1618_v63 = vmul.f32 %v4039_v58, %v4037_v55 }
 0x405   :  { %v4041_v1 = vpop.eup %4040  ;;  %v1619_v60 = vmul.f32 %v5137_v22, %v1618_v63 }
 0x406   :  { %v4043_v4 = vpop.eup %4042  ;;  %v1714_v8 = vadd.f32 1.0, %v4041_v1  ;;  %v5401_v1 = vld [vmem:[#allocation8 + $0xec] ss:$16 sps:$4 sm:$0xff]  }
 0x407   :  { %v1720_v56 = vadd.f32 1.0, %v4043_v4  ;;  %1620 = vadd.xlane.f32.xlu0 %v1619_v60  ;;  %v4045_v7 = vpop.eup %4044  ;;  %v5404_v60 = vld [vmem:[#allocation8 + $0xe0] ss:$16 sps:$4 sm:$0xff]   ;;  %v5407_v4 = vld [vmem:[#allocation8 + $0xe8] ss:$16 sps:$4 sm:$0xff]  }
 0x408   :  { %4048 = vrcp.f32 %v1714_v8  ;;  %v4047_v10 = vpop.eup %4046  ;;  %v1727_v13 = vadd.f32 1.0, %v4045_v7  ;;  %v5410_v8 = vld [vmem:[#allocation9 + $0x4] ss:$16 sps:$4 sm:$0xff]   ;;  %v5418_v7 = vld [vmem:[#allocation9] ss:$16 sps:$4 sm:$0xff]  }
 0x409   :  { %4050 = vrcp.f32 %v1720_v56  ;;  %v5413_v56 = vld [vmem:[#allocation9 + $0xc] ss:$16 sps:$4 sm:$0xff]  }
 0x40a   :  { %4052 = vrcp.f32 %v1727_v13  ;;  %v5435_v13 = vld [vmem:[#allocation9 + $0x28] ss:$16 sps:$4 sm:$0xff]  }
 0x40b   :  { %6811 = vst [vmem:[#allocation18_spill] sm:$0xff] %v5435_v13 }
 0x412   :  { %v4049_v5 = vpop.eup %4048 }
 0x413   :  { %v4051_v11 = vpop.eup %4050  ;;  %v1731_v12 = vmul.f32 %v4049_v5, %v4047_v10  ;;  %v5421_v10 = vld [vmem:[#allocation9 + $0x8] ss:$16 sps:$4 sm:$0xff]   ;;  %v5424_v5 = vld [vmem:[#allocation9 + $0x24] ss:$16 sps:$4 sm:$0xff]  }
 0x414   :  { %v1730_v2 = vmul.f32 %v4051_v11, %v5142_v48  ;;  %v4053_v54 = vpop.eup %4052  ;;  %v6802_v48 = vld [vmem:[#allocation48_spill] sm:$0xff]  ;;  %6807 = vst [vmem:[#allocation54_spill] sm:$0xff] %v5421_v10  ;;  %6808 = vst [vmem:[#allocation55_spill] sm:$0xff] %v5424_v5  ;;  %v5427_v11 = vld [vmem:[#allocation9 + $0x2c] ss:$16 sps:$4 sm:$0xff]  }
 0x415   :  { %6809 = vst [vmem:[#allocation56_spill] sm:$0xff] %v5427_v11 }
 0x416   :  { %v5309_v53 = vadd.f32 %v1731_v12, %v1730_v2  ;;  %v5432_v12 = vld [vmem:[#allocation9 + $0x20] ss:$16 sps:$4 sm:$0xff]   ;;  %v5438_v2 = vld [vmem:[#allocation9 + $0x44] ss:$16 sps:$4 sm:$0xff]  }
 0x417   :  { %6810 = vst [vmem:[#allocation17_spill] sm:$0xff] %v5432_v12  ;;  %6812 = vst [vmem:[#allocation19_spill] sm:$0xff] %v5438_v2 }
 0x418   :  { %4054 = vtanh.f32 %v5309_v53 }
 0x422   :  { %v4055_v55 = vpop.eup %4054 }
 0x423   :  { %v1734_v58 = vmul.f32 %v4055_v55, %v4053_v54  ;;  %v5441_v54 = vld [vmem:[#allocation9 + $0x4c] ss:$16 sps:$4 sm:$0xff]   ;;  %v5444_v55 = vld [vmem:[#allocation9 + $0x40] ss:$16 sps:$4 sm:$0xff]  }
 0x424   :  { %6813 = vst [vmem:[#allocation20_spill] sm:$0xff] %v5441_v54  ;;  %6814 = vst [vmem:[#allocation21_spill] sm:$0xff] %v5444_v55 }
 0x425   :  { %v5312_v59 = vpack.c.bf16 %v1734_v58, %v1734_v58  ;;  %v5447_v58 = vld [vmem:[#allocation9 + $0x48] ss:$16 sps:$4 sm:$0xff]  }
 0x426   :  { %6815 = vst [vmem:[#allocation22_spill] sm:$0xff] %v5447_v58 }
 0x427   :  { %1769 = vmatmul.mubr.bf16.vlgmr.msra.gmra.mrb[24].mxu0 %v5312_v59  ;;  %1810 = vmatmul.mubr.bf16.vlgmr.msra.gmra.mrb[24].mxu1 %v5312_v59 }
 0x428   :  { %1820 = vmatpush1.bf16.msra.mxu0 %v4935_v33  ;;  %1861 = vmatpush1.bf16.msra.mxu1 %v4937_v23  ;;  %v6791_v33 = vld [vmem:[#allocation57_spill] sm:$0xff]  ;;  %v6792_v23 = vld [vmem:[#allocation58_spill] sm:$0xff] }
 0x429   :  { %1821 = vmatprep.subr.bf16.mxu0 %v4941_v15  ;;  %1862 = vmatprep.subr.bf16.mxu1 %v4943_v16  ;;  %v6793_v15 = vld [vmem:[#allocation59_spill] sm:$0xff]  ;;  %v6794_v16 = vld [vmem:[#allocation60_spill] sm:$0xff] }
 0x42a   :  { %1851 = vmatprep.mubr.bf16.mxu0 %v6684_v26  ;;  %1892 = vmatprep.mubr.bf16.mxu1 %v6684_v26 }
 0x42c   :  { %1822 = vmatpush1.bf16.msra.mxu0 %v4949_v20  ;;  %1863 = vmatpush1.bf16.msra.mxu1 %v4951_v21  ;;  %v6795_v20 = vld [vmem:[#allocation61_spill] sm:$0xff]  ;;  %v1818_v21 = vpack.c.bf16 %v1618_v63, %v1618_v63  ;;  %v5398_v63 = vld [vmem:[#allocation8 + $0xe4] ss:$16 sps:$4 sm:$0xff]  }
 0x42d   :  { %1823 = vmatprep.subr.bf16.mxu0 %v4955_v14  ;;  %1864 = vmatprep.subr.bf16.mxu1 %v6736_v25  ;;  %v6796_v14 = vld [vmem:[#allocation41_spill] sm:$0xff] }
 0x42e   :  { %v6803_v25 = vld [vmem:[#allocation49_spill] sm:$0xff] }
 0x430   :  { %1824 = vmatpush1.bf16.msra.mxu0 %v6737_v30  ;;  %1865 = vmatpush1.bf16.msra.mxu1 %v6738_v49  ;;  %v6804_v30 = vld [vmem:[#allocation50_spill] sm:$0xff]  ;;  %v6805_v49 = vld [vmem:[#allocation51_spill] sm:$0xff] }
 0x431   :  { %1825 = vmatprep.subr.bf16.mxu0 %v6739_v52  ;;  %1866 = vmatprep.subr.bf16.mxu1 %v6740_v45  ;;  %v6806_v52 = vld [vmem:[#allocation52_spill] sm:$0xff] }
 0x432   :  { %v5368_v45 = vld [vmem:[#allocation8 + $0x80] ss:$16 sps:$4 sm:$0xff]  }
 0x434   :  { %1826 = vmatpush1.bf16.msra.mxu0 %v6741_v37  ;;  %1867 = vmatpush1.bf16.msra.mxu1 %v6742_v34  ;;  %v5371_v37 = vld [vmem:[#allocation8 + $0x88] ss:$16 sps:$4 sm:$0xff]   ;;  %v5374_v34 = vld [vmem:[#allocation8 + $0xa4] ss:$16 sps:$4 sm:$0xff]  }
 0x435   :  { %1827 = vmatprep.subr.bf16.mxu0 %v6743_v38  ;;  %1868 = vmatprep.subr.bf16.mxu1 %v6744_v40  ;;  %v5377_v38 = vld [vmem:[#allocation8 + $0xac] ss:$16 sps:$4 sm:$0xff]   ;;  %v5380_v40 = vld [vmem:[#allocation8 + $0xa0] ss:$16 sps:$4 sm:$0xff]  }
 0x438   :  { %1828 = vmatpush1.bf16.msra.mxu0 %v6745_v47  ;;  %1869 = vmatpush1.bf16.msra.mxu1 %v6746_v35  ;;  %v5383_v47 = vld [vmem:[#allocation8 + $0xa8] ss:$16 sps:$4 sm:$0xff]   ;;  %v5386_v35 = vld [vmem:[#allocation8 + $0xc4] ss:$16 sps:$4 sm:$0xff]  }
 0x439   :  { %1829 = vmatprep.subr.bf16.mxu0 %v6747_v43  ;;  %1870 = vmatprep.subr.bf16.mxu1 %v6748_v46  ;;  %v5389_v43 = vld [vmem:[#allocation8 + $0xcc] ss:$16 sps:$4 sm:$0xff]   ;;  %v5392_v46 = vld [vmem:[#allocation8 + $0xc0] ss:$16 sps:$4 sm:$0xff]  }
 0x43c   :  { %1830 = vmatpush1.bf16.msra.mxu0 %v6791_v33  ;;  %1871 = vmatpush1.bf16.msra.mxu1 %v5001_v36  ;;  %v6797_v36 = vld [vmem:[#allocation42_spill] sm:$0xff]  ;;  %v5453_v33 = vld [vmem:[#allocation9 + $0x6c] ss:$16 sps:$4 sm:$0xff]  }
 0x43d   :  { %1831 = vmatprep.subr.bf16.mxu0 %v6792_v23  ;;  %1872 = vmatprep.subr.bf16.mxu1 %v5007_v29  ;;  %v6799_v29 = vld [vmem:[#allocation45_spill] sm:$0xff]  ;;  %6817 = vst [vmem:[#allocation24_spill] sm:$0xff] %v5453_v33  ;;  %v5456_v23 = vld [vmem:[#allocation9 + $0x60] ss:$16 sps:$4 sm:$0xff]  }
 0x43e   :  { %6818 = vst [vmem:[#allocation25_spill] sm:$0xff] %v5456_v23 }
 0x440   :  { %1832 = vmatpush1.bf16.msra.mxu0 %v5011_v27  ;;  %1873 = vmatpush1.bf16.msra.mxu1 %v6793_v15  ;;  %v6798_v27 = vld [vmem:[#allocation44_spill] sm:$0xff]  ;;  %v5459_v15 = vld [vmem:[#allocation9 + $0x68] ss:$16 sps:$4 sm:$0xff]  }
 0x441   :  { %1833 = vmatprep.subr.bf16.mxu0 %v5017_v28  ;;  %1874 = vmatprep.subr.bf16.mxu1 %v6794_v16  ;;  %v6800_v28 = vld [vmem:[#allocation46_spill] sm:$0xff]  ;;  %6819 = vst [vmem:[#allocation26_spill] sm:$0xff] %v5459_v15 }
 0x442   :  { %v5462_v16 = vld [vmem:[#allocation9 + $0x84] ss:$16 sps:$4 sm:$0xff]  }
 0x443   :  { %6820 = vst [vmem:[#allocation27_spill] sm:$0xff] %v5462_v16 }
 0x444   :  { %1834 = vmatpush1.bf16.msra.mxu0 %v5023_v31  ;;  %1875 = vmatpush1.bf16.msra.mxu1 %v6795_v20  ;;  %v6801_v31 = vld [vmem:[#allocation47_spill] sm:$0xff] }
 0x445   :  { %1935 = vmatprep.subr.bf16.mxu0 %v5181_v51  ;;  %1976 = vmatprep.subr.bf16.mxu1 %v6796_v14  ;;  %v5465_v20 = vld [vmem:[#allocation9 + $0x8c] ss:$16 sps:$4 sm:$0xff]  }
 0x446   :  { %6821 = vst [vmem:[#allocation28_spill] sm:$0xff] %v5465_v20 }
 0x447   :  { %1852 = vmatmul.mubr.bf16.vlgmr.msra.gmra.mrb[24].mxu0 %v1818_v21  ;;  %1893 = vmatmul.mubr.bf16.vlgmr.msra.gmra.mrb[24].mxu1 %v1818_v21  ;;  %v5468_v21 = vld [vmem:[#allocation9 + $0x80] ss:$16 sps:$4 sm:$0xff]  }
 0x448   :  { %1936 = vmatpush1.bf16.msra.mxu0 %v6797_v36  ;;  %1977 = vmatpush1.bf16.msra.mxu1 %v6798_v27  ;;  %6822 = vst [vmem:[#allocation29_spill] sm:$0xff] %v5468_v21 }
 0x449   :  { %1937 = vmatprep.subr.bf16.mxu0 %v6799_v29  ;;  %1978 = vmatprep.subr.bf16.mxu1 %v6800_v28 }
 0x44a   :  { %1967 = vmatprep.mubr.bf16.mxu0 %v6684_v26  ;;  %2008 = vmatprep.mubr.bf16.mxu1 %v6684_v26 }
 0x44c   :  { %1938 = vmatpush1.bf16.msra.mxu0 %v6801_v31  ;;  %1979 = vmatpush1.bf16.msra.mxu1 %v6802_v48 }
 0x44d   :  { %1939 = vmatprep.subr.bf16.mxu0 %v6803_v25  ;;  %1980 = vmatprep.subr.bf16.mxu1 %v6804_v30 }
 0x450   :  { %1940 = vmatpush1.bf16.msra.mxu0 %v6805_v49  ;;  %1981 = vmatpush1.bf16.msra.mxu1 %v6806_v52 }
 0x451   :  { %1941 = vmatprep.subr.bf16.mxu0 %v5219_v19  ;;  %1982 = vmatprep.subr.bf16.mxu1 %v5222_v17 }
 0x454   :  { %1942 = vmatpush1.bf16.msra.mxu0 %v5225_v0  ;;  %1983 = vmatpush1.bf16.msra.mxu1 %v5228_v18 }
 0x455   :  { %1943 = vmatprep.subr.bf16.mxu0 %v5231_v41  ;;  %1984 = vmatprep.subr.bf16.mxu1 %v5234_v32 }
 0x458   :  { %1944 = vmatpush1.bf16.msra.mxu0 %v5368_v45  ;;  %1985 = vmatpush1.bf16.msra.mxu1 %v5371_v37 }
 0x459   :  { %1945 = vmatprep.subr.bf16.mxu0 %v5374_v34  ;;  %1986 = vmatprep.subr.bf16.mxu1 %v5377_v38 }
 0x45c   :  { %1946 = vmatpush1.bf16.msra.mxu0 %v5380_v40  ;;  %1987 = vmatpush1.bf16.msra.mxu1 %v5383_v47 }
 0x45d   :  { %1947 = vmatprep.subr.bf16.mxu0 %v5386_v35  ;;  %1988 = vmatprep.subr.bf16.mxu1 %v5389_v43 }
 0x460   :  { %1948 = vmatpush1.bf16.msra.mxu0 %v5392_v46  ;;  %1989 = vmatpush1.bf16.msra.mxu1 %v5395_v62 }
 0x461   :  { %1949 = vmatprep.subr.bf16.mxu0 %v5398_v63  ;;  %1990 = vmatprep.subr.bf16.mxu1 %v5401_v1 }
 0x464   :  { %1950 = vmatpush1.bf16.msra.mxu0 %v5404_v60  ;;  %1991 = vmatpush1.bf16.msra.mxu1 %v5407_v4 }
 0x465   :  { %2046 = vmatprep.subr.bf16.mxu0 %v5410_v8  ;;  %2087 = vmatprep.subr.bf16.mxu1 %v5413_v56 }
 0x467   :  { %1968 = vmatmul.mubr.bf16.vlgmr.msra.gmra.mrb[28].mxu0 %v5312_v59  ;;  %2009 = vmatmul.mubr.bf16.vlgmr.msra.gmra.mrb[28].mxu1 %v5312_v59  ;;  %v5450_v59 = vld [vmem:[#allocation9 + $0x64] ss:$16 sps:$4 sm:$0xff]  }
 0x468   :  { %2047 = vmatpush1.bf16.msra.mxu0 %v5418_v7  ;;  %2088 = vmatpush1.bf16.msra.mxu1 %v5421_v10  ;;  %6816 = vst [vmem:[#allocation23_spill] sm:$0xff] %v5450_v59 }
 0x469   :  { %2048 = vmatprep.subr.bf16.mxu0 %v5424_v5  ;;  %2089 = vmatprep.subr.bf16.mxu1 %v5427_v11 }
 0x46a   :  { %2078 = vmatprep.mubr.bf16.mxu0 %v6684_v26  ;;  %2119 = vmatprep.mubr.bf16.mxu1 %v6684_v26 }
 0x46c   :  { %2049 = vmatpush1.bf16.msra.mxu0 %v5432_v12  ;;  %2090 = vmatpush1.bf16.msra.mxu1 %v5435_v13 }
 0x46d   :  { %2050 = vmatprep.subr.bf16.mxu0 %v5438_v2  ;;  %2091 = vmatprep.subr.bf16.mxu1 %v5441_v54 }
 0x470   :  { %2051 = vmatpush1.bf16.msra.mxu0 %v5444_v55  ;;  %2092 = vmatpush1.bf16.msra.mxu1 %v5447_v58 }
 0x471   :  { %2052 = vmatprep.subr.bf16.mxu0 %v5450_v59  ;;  %2093 = vmatprep.subr.bf16.mxu1 %v5453_v33  ;;  %v5471_v33 = vld [vmem:[#allocation9 + $0x88] ss:$16 sps:$4 sm:$0xff]  }
 0x472   :  { %6823 = vst [vmem:[#allocation30_spill] sm:$0xff] %v5471_v33 }
 0x474   :  { %2053 = vmatpush1.bf16.msra.mxu0 %v5456_v23  ;;  %2094 = vmatpush1.bf16.msra.mxu1 %v5459_v15  ;;  %v5474_v23 = vld [vmem:[#allocation9 + $0xa4] ss:$16 sps:$4 sm:$0xff]   ;;  %v5477_v15 = vld [vmem:[#allocation9 + $0xac] ss:$16 sps:$4 sm:$0xff]  }
 0x475   :  { %2054 = vmatprep.subr.bf16.mxu0 %v5462_v16  ;;  %2095 = vmatprep.subr.bf16.mxu1 %v5465_v20  ;;  %6824 = vst [vmem:[#allocation31_spill] sm:$0xff] %v5474_v23  ;;  %6825 = vst [vmem:[#allocation32_spill] sm:$0xff] %v5477_v15  ;;  %v5480_v16 = vld [vmem:[#allocation9 + $0xa0] ss:$16 sps:$4 sm:$0xff]   ;;  %v5483_v20 = vld [vmem:[#allocation9 + $0xa8] ss:$16 sps:$4 sm:$0xff]  }
 0x476   :  { %6826 = vst [vmem:[#allocation33_spill] sm:$0xff] %v5480_v16  ;;  %6827 = vst [vmem:[#allocation34_spill] sm:$0xff] %v5483_v20 }
 0x478   :  { %2055 = vmatpush1.bf16.msra.mxu0 %v5468_v21  ;;  %2096 = vmatpush1.bf16.msra.mxu1 %v5471_v33  ;;  %v5486_v21 = vld [vmem:[#allocation9 + $0xc4] ss:$16 sps:$4 sm:$0xff]   ;;  %v5489_v33 = vld [vmem:[#allocation9 + $0xcc] ss:$16 sps:$4 sm:$0xff]  }
 0x479   :  { %2056 = vmatprep.subr.bf16.mxu0 %v5474_v23  ;;  %2097 = vmatprep.subr.bf16.mxu1 %v5477_v15  ;;  %6828 = vst [vmem:[#allocation35_spill] sm:$0xff] %v5486_v21  ;;  %6829 = vst [vmem:[#allocation36_spill] sm:$0xff] %v5489_v33  ;;  %v5492_v23 = vld [vmem:[#allocation9 + $0xc0] ss:$16 sps:$4 sm:$0xff]   ;;  %v5495_v15 = vld [vmem:[#allocation9 + $0xc8] ss:$16 sps:$4 sm:$0xff]  }
 0x47a   :  { %6830 = vst [vmem:[#allocation37_spill] sm:$0xff] %v5492_v23  ;;  %6831 = vst [vmem:[#allocation38_spill] sm:$0xff] %v5495_v15 }
 0x47c   :  { %2057 = vmatpush1.bf16.msra.mxu0 %v5480_v16  ;;  %2098 = vmatpush1.bf16.msra.mxu1 %v5483_v20  ;;  %v5498_v16 = vld [vmem:[#allocation9 + $0xe4] ss:$16 sps:$4 sm:$0xff]   ;;  %v5501_v20 = vld [vmem:[#allocation9 + $0xec] ss:$16 sps:$4 sm:$0xff]  }
 0x47d   :  { %2058 = vmatprep.subr.bf16.mxu0 %v5486_v21  ;;  %2099 = vmatprep.subr.bf16.mxu1 %v5489_v33  ;;  %6832 = vst [vmem:[#allocation39_spill] sm:$0xff] %v5498_v16  ;;  %6833 = vst [vmem:[#allocation40_spill] sm:$0xff] %v5501_v20  ;;  %v5504_v21 = vld [vmem:[#allocation9 + $0xe0] ss:$16 sps:$4 sm:$0xff]   ;;  %v5507_v33 = vld [vmem:[#allocation9 + $0xe8] ss:$16 sps:$4 sm:$0xff]  }
 0x47e   :  { %6834 = vst [vmem:[#allocation63_spill] sm:$0xff] %v5504_v21  ;;  %6835 = vst [vmem:[#allocation64_spill] sm:$0xff] %v5507_v33 }
 0x480   :  { %2059 = vmatpush1.bf16.msra.mxu0 %v5492_v23  ;;  %2100 = vmatpush1.bf16.msra.mxu1 %v5495_v15  ;;  %v5510_v23 = vld [vmem:[#allocation11 + $0x4] ss:$16 sps:$4 sm:$0xff]   ;;  %v5513_v15 = vld [vmem:[#allocation11 + $0xc] ss:$16 sps:$4 sm:$0xff]  }
 0x481   :  { %2060 = vmatprep.subr.bf16.mxu0 %v5498_v16  ;;  %2101 = vmatprep.subr.bf16.mxu1 %v5501_v20  ;;  %6836 = vst [vmem:[#allocation65_spill] sm:$0xff] %v5510_v23  ;;  %6837 = vst [vmem:[#allocation43_spill] sm:$0xff] %v5513_v15 }
 0x484   :  { %2061 = vmatpush1.bf16.msra.mxu0 %v5504_v21  ;;  %2102 = vmatpush1.bf16.msra.mxu1 %v5507_v33 }
 0x485   :  { %2129 = vmatprep.subr.bf16.mxu0 %v5510_v23  ;;  %2170 = vmatprep.subr.bf16.mxu1 %v5513_v15 }
 0x494   :  { %v1621_v16 = vpop.xlane.xlu0 %1620 }
 0x495   :  { %v1622_v20 = vadd.f32 %v1621_v16, %v5292_v39 }
 0x497   :  { %1624 = vst.msk [vmem:[#allocation12] sm:$0xff] %vm1623_vm1, %v1622_v20 }
 0x51a   :  { %v1853_v59 = vpop.f32.mrb[24].mxu0  ;;  %v1894_v58 = vpop.f32.mrb[24].mxu1 }
 0x51b   :  { %v3687_v21 = vadd.f32 %v1853_v59, %v6786_v57  ;;  %v1855_v55 = vpop.f32.mrb[25].mxu0  ;;  %v1896_v54 = vpop.f32.mrb[25].mxu1  ;;  %v3689_v20 = vadd.f32 %v1894_v58, %v6789_v9 }
 0x51c   :  { %v3688_v33 = vadd.f32 %v1855_v55, %v6787_v61  ;;  %v1857_v2 = vpop.f32.mrb[26].mxu0  ;;  %v1898_v13 = vpop.f32.mrb[26].mxu1  ;;  %v3690_v15 = vadd.f32 %v1896_v54, %v6788_v6 }
 0x51d   :  { %v3646_v23 = vmul.f32 -1.442695, %v3687_v21  ;;  %v1858_v12 = vpop.f32.mrb[27].mxu0  ;;  %v1899_v11 = vpop.f32.mrb[27].mxu1 }
 0x51e   :  { %v3647_v5 = vmul.f32 -1.442695, %v3688_v33  ;;  %v3648_v16 = vmul.f32 -1.442695, %v3690_v15 }
 0x51f   :  { %4056 = vpow2.f32 %v3646_v23 }
 0x520   :  { %4058 = vpow2.f32 %v3647_v5 }
 0x521   :  { %4060 = vpow2.f32 %v3648_v16 }
 0x522   :  { %4062 = vtanh.f32 %v3689_v20 }
 0x529   :  { %v4057_v39 = vpop.eup %4056 }
 0x52a   :  { %v4059_v10 = vpop.eup %4058  ;;  %v1908_v59 = vadd.f32 1.0, %v4057_v39 }
 0x52b   :  { %v1914_v57 = vadd.f32 1.0, %v4059_v10  ;;  %v4061_v13 = vpop.eup %4060 }
 0x52c   :  { %4064 = vrcp.f32 %v1908_v59  ;;  %v4063_v2 = vpop.eup %4062  ;;  %v1921_v33 = vadd.f32 1.0, %v4061_v13 }
 0x52d   :  { %4066 = vrcp.f32 %v1914_v57 }
 0x52e   :  { %4068 = vrcp.f32 %v1921_v33 }
 0x536   :  { %v4065_v12 = vpop.eup %4064 }
 0x537   :  { %v4067_v11 = vpop.eup %4066  ;;  %v1925_v55 = vmul.f32 %v4065_v12, %v4063_v2 }
 0x538   :  { %v1924_v5 = vmul.f32 %v4067_v11, %v5300_v3  ;;  %v4069_v12 = vpop.eup %4068 }
 0x53a   :  { %v1969_v54 = vpop.f32.mrb[28].mxu0  ;;  %v2010_v23 = vpop.f32.mrb[28].mxu1  ;;  %v5522_v15 = vadd.f32 %v1925_v55, %v1924_v5 }
 0x53b   :  { %v2017_v39 = vadd.f32 %v1969_v54, %v6734_v44  ;;  %v1971_v58 = vpop.f32.mrb[29].mxu0  ;;  %v2012_v21 = vpop.f32.mrb[29].mxu1  ;;  %v2019_v33 = vadd.f32 %v2010_v23, %v4929_v24 }
 0x53c   :  { %v2018_v10 = vadd.f32 %v1971_v58, %v6735_v42  ;;  %v1973_v57 = vpop.f32.mrb[30].mxu0  ;;  %v2014_v16 = vpop.f32.mrb[30].mxu1  ;;  %4070 = vtanh.f32 %v5522_v15  ;;  %v2020_v3 = vadd.f32 %v2012_v21, %v6790_v50 }
 0x53d   :  { %v3649_v20 = vmul.f32 -1.442695, %v2017_v39  ;;  %v1974_v59 = vpop.f32.mrb[31].mxu0  ;;  %v2015_v13 = vpop.f32.mrb[31].mxu1 }
 0x53e   :  { %v3650_v2 = vmul.f32 -1.442695, %v2018_v10  ;;  %v3651_v55 = vmul.f32 -1.442695, %v2020_v3 }
 0x53f   :  { %4072 = vpow2.f32 %v3649_v20 }
 0x540   :  { %4074 = vpow2.f32 %v3650_v2 }
 0x541   :  { %4076 = vpow2.f32 %v3651_v55 }
 0x542   :  { %4078 = vtanh.f32 %v2019_v33  ;;  %v5541_v33 = vld [vmem:[#allocation11] ss:$16 sps:$4 sm:$0xff]  }
 0x546   :  { %v4071_v11 = vpop.eup %4070 }
 0x547   :  { %v5529_v5 = vmul.f32 %v4071_v11, %v4069_v12 }
 0x549   :  { %v4073_v54 = vpop.eup %4072  ;;  %v1929_v58 = vmul.f32 %v5137_v22, %v5529_v5 }
 0x54a   :  { %v4075_v57 = vpop.eup %4074  ;;  %v2024_v39 = vadd.f32 1.0, %v4073_v54  ;;  %v5544_v54 = vld [vmem:[#allocation11 + $0x8] ss:$16 sps:$4 sm:$0xff]  }
 0x54b   :  { %v2030_v10 = vadd.f32 1.0, %v4075_v57  ;;  %1930 = vadd.xlane.f32.xlu1 %v1929_v58  ;;  %v4077_v21 = vpop.eup %4076  ;;  %v5550_v58 = vld [vmem:[#allocation11 + $0x2c] ss:$16 sps:$4 sm:$0xff]   ;;  %v5555_v57 = vld [vmem:[#allocation11 + $0x20] ss:$16 sps:$4 sm:$0xff]  }
 0x54c   :  { %4080 = vrcp.f32 %v2024_v39  ;;  %v4079_v16 = vpop.eup %4078  ;;  %v2037_v23 = vadd.f32 1.0, %v4077_v21  ;;  %v5558_v39 = vld [vmem:[#allocation11 + $0x28] ss:$16 sps:$4 sm:$0xff]   ;;  %v5564_v21 = vld [vmem:[#allocation11 + $0x4c] ss:$16 sps:$4 sm:$0xff]  }
 0x54d   :  { %4082 = vrcp.f32 %v2030_v10  ;;  %v5561_v10 = vld [vmem:[#allocation11 + $0x44] ss:$16 sps:$4 sm:$0xff]  }
 0x54e   :  { %4084 = vrcp.f32 %v2037_v23  ;;  %v5579_v23 = vld [vmem:[#allocation11 + $0x60] ss:$16 sps:$4 sm:$0xff]  }
 0x54f   :  { %6839 = vst [vmem:[#allocation58_spill] sm:$0xff] %v5579_v23 }
 0x556   :  { %v4081_v20 = vpop.eup %4080 }
 0x557   :  { %v4083_v59 = vpop.eup %4082  ;;  %v2041_v13 = vmul.f32 %v4081_v20, %v4079_v16  ;;  %v5567_v16 = vld [vmem:[#allocation11 + $0x40] ss:$16 sps:$4 sm:$0xff]   ;;  %v5570_v20 = vld [vmem:[#allocation11 + $0x48] ss:$16 sps:$4 sm:$0xff]  }
 0x558   :  { %v2040_v2 = vmul.f32 %v4083_v59, %v5309_v53  ;;  %v4085_v22 = vpop.eup %4084  ;;  %v5547_v53 = vld [vmem:[#allocation11 + $0x24] ss:$16 sps:$4 sm:$0xff]  }
 0x559   :  { %v5573_v59 = vld [vmem:[#allocation11 + $0x64] ss:$16 sps:$4 sm:$0xff]  }
 0x55a   :  { %v5534_v3 = vadd.f32 %v2041_v13, %v2040_v2  ;;  %v5576_v13 = vld [vmem:[#allocation11 + $0x6c] ss:$16 sps:$4 sm:$0xff]   ;;  %v5582_v2 = vld [vmem:[#allocation11 + $0x68] ss:$16 sps:$4 sm:$0xff]  }
 0x55b   :  { %6838 = vst [vmem:[#allocation57_spill] sm:$0xff] %v5576_v13  ;;  %6840 = vst [vmem:[#allocation59_spill] sm:$0xff] %v5582_v2 }
 0x55c   :  { %4086 = vtanh.f32 %v5534_v3 }
 0x566   :  { %v4087_v12 = vpop.eup %4086 }
 0x567   :  { %v2044_v11 = vmul.f32 %v4087_v12, %v4085_v22  ;;  %v5585_v22 = vld [vmem:[#allocation11 + $0x84] ss:$16 sps:$4 sm:$0xff]   ;;  %v5588_v12 = vld [vmem:[#allocation11 + $0x8c] ss:$16 sps:$4 sm:$0xff]  }
 0x568   :  { %6841 = vst [vmem:[#allocation60_spill] sm:$0xff] %v5585_v22  ;;  %6842 = vst [vmem:[#allocation61_spill] sm:$0xff] %v5588_v12 }
 0x569   :  { %v5537_v55 = vpack.c.bf16 %v2044_v11, %v2044_v11  ;;  %v5591_v11 = vld [vmem:[#allocation11 + $0x80] ss:$16 sps:$4 sm:$0xff]  }
 0x56a   :  { %6843 = vst [vmem:[#allocation41_spill] sm:$0xff] %v5591_v11 }
 0x56b   :  { %2079 = vmatmul.mubr.bf16.vlgmr.msra.gmra.mrb[32].mxu0 %v5537_v55  ;;  %2120 = vmatmul.mubr.bf16.vlgmr.msra.gmra.mrb[32].mxu1 %v5537_v55 }
 0x56c   :  { %2130 = vmatpush1.bf16.msra.mxu0 %v5541_v33  ;;  %2171 = vmatpush1.bf16.msra.mxu1 %v5544_v54 }
 0x56d   :  { %2131 = vmatprep.subr.bf16.mxu0 %v5547_v53  ;;  %2172 = vmatprep.subr.bf16.mxu1 %v5550_v58 }
 0x56e   :  { %2161 = vmatprep.mubr.bf16.mxu0 %v6684_v26  ;;  %2202 = vmatprep.mubr.bf16.mxu1 %v6684_v26 }
 0x570   :  { %2132 = vmatpush1.bf16.msra.mxu0 %v5555_v57  ;;  %2173 = vmatpush1.bf16.msra.mxu1 %v5558_v39 }
 0x571   :  { %2133 = vmatprep.subr.bf16.mxu0 %v5561_v10  ;;  %2174 = vmatprep.subr.bf16.mxu1 %v5564_v21 }
 0x574   :  { %2134 = vmatpush1.bf16.msra.mxu0 %v5567_v16  ;;  %2175 = vmatpush1.bf16.msra.mxu1 %v5570_v20 }
 0x575   :  { %2135 = vmatprep.subr.bf16.mxu0 %v5573_v59  ;;  %2176 = vmatprep.subr.bf16.mxu1 %v5576_v13  ;;  %v5594_v13 = vld [vmem:[#allocation11 + $0x88] ss:$16 sps:$4 sm:$0xff]  }
 0x576   :  { %6844 = vst [vmem:[#allocation42_spill] sm:$0xff] %v5594_v13 }
 0x578   :  { %2136 = vmatpush1.bf16.msra.mxu0 %v5579_v23  ;;  %2177 = vmatpush1.bf16.msra.mxu1 %v5582_v2  ;;  %v5597_v23 = vld [vmem:[#allocation11 + $0xa4] ss:$16 sps:$4 sm:$0xff]   ;;  %v5600_v2 = vld [vmem:[#allocation11 + $0xac] ss:$16 sps:$4 sm:$0xff]  }
 0x579   :  { %2137 = vmatprep.subr.bf16.mxu0 %v5585_v22  ;;  %2178 = vmatprep.subr.bf16.mxu1 %v5588_v12  ;;  %6845 = vst [vmem:[#allocation44_spill] sm:$0xff] %v5597_v23  ;;  %6846 = vst [vmem:[#allocation45_spill] sm:$0xff] %v5600_v2  ;;  %v5603_v22 = vld [vmem:[#allocation11 + $0xa0] ss:$16 sps:$4 sm:$0xff]   ;;  %v5606_v12 = vld [vmem:[#allocation11 + $0xa8] ss:$16 sps:$4 sm:$0xff]  }
 0x57a   :  { %6847 = vst [vmem:[#allocation46_spill] sm:$0xff] %v5603_v22  ;;  %6848 = vst [vmem:[#allocation47_spill] sm:$0xff] %v5606_v12 }
 0x57c   :  { %2138 = vmatpush1.bf16.msra.mxu0 %v5591_v11  ;;  %2179 = vmatpush1.bf16.msra.mxu1 %v5594_v13  ;;  %v5609_v11 = vld [vmem:[#allocation11 + $0xc4] ss:$16 sps:$4 sm:$0xff]   ;;  %v5612_v13 = vld [vmem:[#allocation11 + $0xcc] ss:$16 sps:$4 sm:$0xff]  }
 0x57d   :  { %2139 = vmatprep.subr.bf16.mxu0 %v5597_v23  ;;  %2180 = vmatprep.subr.bf16.mxu1 %v5600_v2  ;;  %6849 = vst [vmem:[#allocation48_spill] sm:$0xff] %v5609_v11  ;;  %6850 = vst [vmem:[#allocation49_spill] sm:$0xff] %v5612_v13  ;;  %v5615_v23 = vld [vmem:[#allocation11 + $0xc0] ss:$16 sps:$4 sm:$0xff]   ;;  %v5618_v2 = vld [vmem:[#allocation11 + $0xc8] ss:$16 sps:$4 sm:$0xff]  }
 0x57e   :  { %6851 = vst [vmem:[#allocation50_spill] sm:$0xff] %v5615_v23  ;;  %6852 = vst [vmem:[#allocation51_spill] sm:$0xff] %v5618_v2 }
 0x580   :  { %2140 = vmatpush1.bf16.msra.mxu0 %v5603_v22  ;;  %2181 = vmatpush1.bf16.msra.mxu1 %v5606_v12  ;;  %v5621_v22 = vld [vmem:[#allocation11 + $0xe4] ss:$16 sps:$4 sm:$0xff]   ;;  %v5624_v12 = vld [vmem:[#allocation11 + $0xec] ss:$16 sps:$4 sm:$0xff]  }
 0x581   :  { %2141 = vmatprep.subr.bf16.mxu0 %v5609_v11  ;;  %2182 = vmatprep.subr.bf16.mxu1 %v5612_v13  ;;  %6853 = vst [vmem:[#allocation52_spill] sm:$0xff] %v5624_v12  ;;  %v5627_v11 = vld [vmem:[#allocation11 + $0xe0] ss:$16 sps:$4 sm:$0xff]   ;;  %v5630_v13 = vld [vmem:[#allocation11 + $0xe8] ss:$16 sps:$4 sm:$0xff]  }
 0x582   :  { %6854 = vst [vmem:[#allocation66_spill] sm:$0xff] %v5630_v13 }
 0x584   :  { %2142 = vmatpush1.bf16.msra.mxu0 %v5615_v23  ;;  %2183 = vmatpush1.bf16.msra.mxu1 %v5618_v2  ;;  %v2128_v23 = vpack.c.bf16 %v5529_v5, %v5529_v5  ;;  %v6873_v5 = vld [vmem:[#allocation32_spill] sm:$0xff] }
 0x585   :  { %2143 = vmatprep.subr.bf16.mxu0 %v5621_v22  ;;  %2184 = vmatprep.subr.bf16.mxu1 %v5624_v12 }
 0x588   :  { %2144 = vmatpush1.bf16.msra.mxu0 %v5627_v11  ;;  %2185 = vmatpush1.bf16.msra.mxu1 %v5630_v13 }
 0x589   :  { %2245 = vmatprep.subr.bf16.mxu0 %v5181_v51  ;;  %2286 = vmatprep.subr.bf16.mxu1 %v6796_v14  ;;  %v6859_v51 = vld [vmem:[#allocation18_spill] sm:$0xff]  ;;  %v6862_v14 = vld [vmem:[#allocation21_spill] sm:$0xff] }
 0x58b   :  { %2162 = vmatmul.mubr.bf16.vlgmr.msra.gmra.mrb[32].mxu0 %v2128_v23  ;;  %2203 = vmatmul.mubr.bf16.vlgmr.msra.gmra.mrb[32].mxu1 %v2128_v23  ;;  %v6875_v23 = vld [vmem:[#allocation34_spill] sm:$0xff] }
 0x58c   :  { %2246 = vmatpush1.bf16.msra.mxu0 %v6797_v36  ;;  %2287 = vmatpush1.bf16.msra.mxu1 %v6798_v27  ;;  %v6863_v36 = vld [vmem:[#allocation22_spill] sm:$0xff]  ;;  %v6864_v27 = vld [vmem:[#allocation23_spill] sm:$0xff] }
 0x58d   :  { %2247 = vmatprep.subr.bf16.mxu0 %v6799_v29  ;;  %2288 = vmatprep.subr.bf16.mxu1 %v6800_v28  ;;  %v6865_v29 = vld [vmem:[#allocation24_spill] sm:$0xff]  ;;  %v6866_v28 = vld [vmem:[#allocation25_spill] sm:$0xff] }
 0x58e   :  { %2277 = vmatprep.mubr.bf16.mxu0 %v6684_v26  ;;  %2318 = vmatprep.mubr.bf16.mxu1 %v6684_v26 }
 0x590   :  { %2248 = vmatpush1.bf16.msra.mxu0 %v6801_v31  ;;  %2289 = vmatpush1.bf16.msra.mxu1 %v6802_v48  ;;  %v6867_v31 = vld [vmem:[#allocation26_spill] sm:$0xff]  ;;  %v6868_v48 = vld [vmem:[#allocation27_spill] sm:$0xff] }
 0x591   :  { %2249 = vmatprep.subr.bf16.mxu0 %v6803_v25  ;;  %2290 = vmatprep.subr.bf16.mxu1 %v6804_v30  ;;  %v6869_v25 = vld [vmem:[#allocation28_spill] sm:$0xff]  ;;  %v6870_v30 = vld [vmem:[#allocation29_spill] sm:$0xff] }
 0x594   :  { %2250 = vmatpush1.bf16.msra.mxu0 %v6805_v49  ;;  %2291 = vmatpush1.bf16.msra.mxu1 %v6806_v52  ;;  %v6871_v49 = vld [vmem:[#allocation30_spill] sm:$0xff]  ;;  %v6872_v52 = vld [vmem:[#allocation31_spill] sm:$0xff] }
 0x595   :  { %2251 = vmatprep.subr.bf16.mxu0 %v5219_v19  ;;  %2292 = vmatprep.subr.bf16.mxu1 %v5222_v17  ;;  %v6855_v17 = vld [vmem:[#allocation54_spill] sm:$0xff]  ;;  %v6861_v19 = vld [vmem:[#allocation20_spill] sm:$0xff] }
 0x598   :  { %2252 = vmatpush1.bf16.msra.mxu0 %v5225_v0  ;;  %2293 = vmatpush1.bf16.msra.mxu1 %v5228_v18  ;;  %v6856_v0 = vld [vmem:[#allocation55_spill] sm:$0xff]  ;;  %v6857_v18 = vld [vmem:[#allocation56_spill] sm:$0xff] }
 0x599   :  { %2253 = vmatprep.subr.bf16.mxu0 %v5231_v41  ;;  %2294 = vmatprep.subr.bf16.mxu1 %v5234_v32  ;;  %v6858_v32 = vld [vmem:[#allocation17_spill] sm:$0xff]  ;;  %v6860_v41 = vld [vmem:[#allocation19_spill] sm:$0xff] }
 0x59c   :  { %2254 = vmatpush1.bf16.msra.mxu0 %v5368_v45  ;;  %2295 = vmatpush1.bf16.msra.mxu1 %v5371_v37 }
 0x59d   :  { %2255 = vmatprep.subr.bf16.mxu0 %v5374_v34  ;;  %2296 = vmatprep.subr.bf16.mxu1 %v5377_v38 }
 0x5a0   :  { %2256 = vmatpush1.bf16.msra.mxu0 %v5380_v40  ;;  %2297 = vmatpush1.bf16.msra.mxu1 %v5383_v47 }
 0x5a1   :  { %2257 = vmatprep.subr.bf16.mxu0 %v5386_v35  ;;  %2298 = vmatprep.subr.bf16.mxu1 %v5389_v43 }
 0x5a4   :  { %2258 = vmatpush1.bf16.msra.mxu0 %v5392_v46  ;;  %2299 = vmatpush1.bf16.msra.mxu1 %v5395_v62 }
 0x5a5   :  { %2259 = vmatprep.subr.bf16.mxu0 %v5398_v63  ;;  %2300 = vmatprep.subr.bf16.mxu1 %v5401_v1 }
 0x5a8   :  { %2260 = vmatpush1.bf16.msra.mxu0 %v5404_v60  ;;  %2301 = vmatpush1.bf16.msra.mxu1 %v5407_v4 }
 0x5a9   :  { %2356 = vmatprep.subr.bf16.mxu0 %v5410_v8  ;;  %2397 = vmatprep.subr.bf16.mxu1 %v5413_v56 }
 0x5ab   :  { %2278 = vmatmul.mubr.bf16.vlgmr.msra.gmra.mrb[36].mxu0 %v5537_v55  ;;  %2319 = vmatmul.mubr.bf16.vlgmr.msra.gmra.mrb[36].mxu1 %v5537_v55  ;;  %v6874_v55 = vld [vmem:[#allocation33_spill] sm:$0xff] }
 0x5ac   :  { %2357 = vmatpush1.bf16.msra.mxu0 %v5418_v7  ;;  %2398 = vmatpush1.bf16.msra.mxu1 %v6855_v17 }
 0x5ad   :  { %2358 = vmatprep.subr.bf16.mxu0 %v6856_v0  ;;  %2399 = vmatprep.subr.bf16.mxu1 %v6857_v18 }
 0x5ae   :  { %2388 = vmatprep.mubr.bf16.mxu0 %v6684_v26  ;;  %2429 = vmatprep.mubr.bf16.mxu1 %v6684_v26 }
 0x5b0   :  { %2359 = vmatpush1.bf16.msra.mxu0 %v6858_v32  ;;  %2400 = vmatpush1.bf16.msra.mxu1 %v6859_v51 }
 0x5b1   :  { %2360 = vmatprep.subr.bf16.mxu0 %v6860_v41  ;;  %2401 = vmatprep.subr.bf16.mxu1 %v6861_v19 }
 0x5b4   :  { %2361 = vmatpush1.bf16.msra.mxu0 %v6862_v14  ;;  %2402 = vmatpush1.bf16.msra.mxu1 %v6863_v36 }
 0x5b5   :  { %2362 = vmatprep.subr.bf16.mxu0 %v6864_v27  ;;  %2403 = vmatprep.subr.bf16.mxu1 %v6865_v29  ;;  %v6876_v29 = vld [vmem:[#allocation35_spill] sm:$0xff] }
 0x5b8   :  { %2363 = vmatpush1.bf16.msra.mxu0 %v6866_v28  ;;  %2404 = vmatpush1.bf16.msra.mxu1 %v6867_v31  ;;  %v6877_v28 = vld [vmem:[#allocation36_spill] sm:$0xff]  ;;  %v6878_v31 = vld [vmem:[#allocation37_spill] sm:$0xff] }
 0x5b9   :  { %2364 = vmatprep.subr.bf16.mxu0 %v6868_v48  ;;  %2405 = vmatprep.subr.bf16.mxu1 %v6869_v25  ;;  %v6879_v48 = vld [vmem:[#allocation38_spill] sm:$0xff]  ;;  %v6880_v25 = vld [vmem:[#allocation39_spill] sm:$0xff] }
 0x5bc   :  { %2365 = vmatpush1.bf16.msra.mxu0 %v6870_v30  ;;  %2406 = vmatpush1.bf16.msra.mxu1 %v6871_v49  ;;  %v6881_v30 = vld [vmem:[#allocation40_spill] sm:$0xff]  ;;  %v6882_v49 = vld [vmem:[#allocation63_spill] sm:$0xff] }
 0x5bd   :  { %2366 = vmatprep.subr.bf16.mxu0 %v6872_v52  ;;  %2407 = vmatprep.subr.bf16.mxu1 %v6873_v5  ;;  %v6883_v52 = vld [vmem:[#allocation64_spill] sm:$0xff]  ;;  %v6884_v5 = vld [vmem:[#allocation65_spill] sm:$0xff] }
 0x5c0   :  { %2367 = vmatpush1.bf16.msra.mxu0 %v6874_v55  ;;  %2408 = vmatpush1.bf16.msra.mxu1 %v6875_v23  ;;  %v6885_v55 = vld [vmem:[#allocation43_spill] sm:$0xff]  ;;  %v6886_v23 = vld [vmem:[#allocation53_spill] sm:$0xff] }
 0x5c1   :  { %2368 = vmatprep.subr.bf16.mxu0 %v6876_v29  ;;  %2409 = vmatprep.subr.bf16.mxu1 %v6877_v28 }
 0x5c4   :  { %2369 = vmatpush1.bf16.msra.mxu0 %v6878_v31  ;;  %2410 = vmatpush1.bf16.msra.mxu1 %v6879_v48  ;;  %v6887_v48 = vld [vmem:[#allocation62_spill] sm:$0xff] }
 0x5c5   :  { %2370 = vmatprep.subr.bf16.mxu0 %v6880_v25  ;;  %2411 = vmatprep.subr.bf16.mxu1 %v6881_v30 }
 0x5c8   :  { %2371 = vmatpush1.bf16.msra.mxu0 %v6882_v49  ;;  %2412 = vmatpush1.bf16.msra.mxu1 %v6883_v52 }
 0x5c9   :  { %2439 = vmatprep.subr.bf16.mxu0 %v6884_v5  ;;  %2480 = vmatprep.subr.bf16.mxu1 %v6885_v55 }
 0x5d8   :  { %v1931_v29 = vpop.xlane.xlu1 %1930 }
 0x5d9   :  { %v1932_v28 = vadd.f32 %v1931_v29, %v6886_v23 }
 0x5db   :  { %1934 = vst.msk [vmem:[#allocation12] sm:$0xff] %vm1933_vm2, %v1932_v28 }
 0x65e   :  { %v2163_v31 = vpop.f32.mrb[32].mxu0  ;;  %v2204_v27 = vpop.f32.mrb[32].mxu1 }
 0x65f   :  { %v3691_v36 = vadd.f32 %v2163_v31, %v6887_v48  ;;  %v2165_v25 = vpop.f32.mrb[33].mxu0  ;;  %v2206_v14 = vpop.f32.mrb[33].mxu1  ;;  %v3693_v28 = vadd.f32 %v2204_v27, %v6789_v9 }
 0x660   :  { %v3692_v30 = vadd.f32 %v2165_v25, %v6787_v61  ;;  %v2167_v49 = vpop.f32.mrb[34].mxu0  ;;  %v2208_v19 = vpop.f32.mrb[34].mxu1  ;;  %v3694_v55 = vadd.f32 %v2206_v14, %v6788_v6 }
 0x661   :  { %v3652_v52 = vmul.f32 -1.442695, %v3691_v36  ;;  %v2168_v41 = vpop.f32.mrb[35].mxu0  ;;  %v2209_v5 = vpop.f32.mrb[35].mxu1 }
 0x662   :  { %v3653_v51 = vmul.f32 -1.442695, %v3692_v30  ;;  %v3654_v29 = vmul.f32 -1.442695, %v3694_v55 }
 0x663   :  { %4088 = vpow2.f32 %v3652_v52 }
 0x664   :  { %4090 = vpow2.f32 %v3653_v51 }
 0x665   :  { %4092 = vpow2.f32 %v3654_v29 }
 0x666   :  { %4094 = vtanh.f32 %v3693_v28 }
 0x66d   :  { %v4089_v23 = vpop.eup %4088 }
 0x66e   :  { %v4091_v32 = vpop.eup %4090  ;;  %v2218_v31 = vadd.f32 1.0, %v4089_v23 }
 0x66f   :  { %v2224_v48 = vadd.f32 1.0, %v4091_v32  ;;  %v4093_v19 = vpop.eup %4092 }
 0x670   :  { %4096 = vrcp.f32 %v2218_v31  ;;  %v4095_v36 = vpop.eup %4094  ;;  %v2231_v49 = vadd.f32 1.0, %v4093_v19 }
 0x671   :  { %4098 = vrcp.f32 %v2224_v48 }
 0x672   :  { %4100 = vrcp.f32 %v2231_v49 }
 0x67a   :  { %v4097_v41 = vpop.eup %4096 }
 0x67b   :  { %v4099_v25 = vpop.eup %4098  ;;  %v2235_v30 = vmul.f32 %v4097_v41, %v4095_v36 }
 0x67c   :  { %v2234_v51 = vmul.f32 %v4099_v25, %v5522_v15  ;;  %v4101_v41 = vpop.eup %4100 }
 0x67e   :  { %v2279_v14 = vpop.f32.mrb[36].mxu0  ;;  %v2320_v52 = vpop.f32.mrb[36].mxu1  ;;  %v5713_v5 = vadd.f32 %v2235_v30, %v2234_v51 }
 0x67f   :  { %v2327_v27 = vadd.f32 %v2279_v14, %v6734_v44  ;;  %v2281_v55 = vpop.f32.mrb[37].mxu0  ;;  %v2322_v23 = vpop.f32.mrb[37].mxu1  ;;  %v2329_v49 = vadd.f32 %v2320_v52, %v4929_v24 }
 0x680   :  { %v2328_v32 = vadd.f32 %v2281_v55, %v6735_v42  ;;  %v2283_v48 = vpop.f32.mrb[38].mxu0  ;;  %v2324_v29 = vpop.f32.mrb[38].mxu1  ;;  %4102 = vtanh.f32 %v5713_v5  ;;  %v2330_v15 = vadd.f32 %v2322_v23, %v6790_v50  ;;  %v5723_v55 = vld [vmem:[%s6366_s7] ss:$0 sm:$0xff] }
 0x681   :  { %v3655_v28 = vmul.f32 -1.442695, %v2327_v27  ;;  %v2284_v31 = vpop.f32.mrb[39].mxu0  ;;  %v2325_v19 = vpop.f32.mrb[39].mxu1 }
 0x682   :  { %v3656_v36 = vmul.f32 -1.442695, %v2328_v32  ;;  %v3657_v30 = vmul.f32 -1.442695, %v2330_v15 }
 0x683   :  { %4104 = vpow2.f32 %v3655_v28 }
 0x684   :  { %4106 = vpow2.f32 %v3656_v36 }
 0x685   :  { %4108 = vpow2.f32 %v3657_v30 }
 0x686   :  { %4110 = vtanh.f32 %v2329_v49 }
 0x68a   :  { %v4103_v25 = vpop.eup %4102 }
 0x68b   :  { %v2238_v51 = vmul.f32 %v4103_v25, %v4101_v41 }
 0x68d   :  { %v4105_v14 = vpop.eup %4104  ;;  %v2239_v27 = vmul.f32 %v5723_v55, %v2238_v51 }
 0x68e   :  { %v4107_v48 = vpop.eup %4106  ;;  %v2334_v32 = vadd.f32 1.0, %v4105_v14 }
 0x68f   :  { %v2340_v29 = vadd.f32 1.0, %v4107_v48  ;;  %2240 = vadd.xlane.f32.xlu1 %v2239_v27  ;;  %v4109_v23 = vpop.eup %4108  ;;  %v6889_v27 = vld [vmem:[#allocation58_spill] sm:$0xff]  ;;  %v6890_v48 = vld [vmem:[#allocation59_spill] sm:$0xff] }
 0x690   :  { %4112 = vrcp.f32 %v2334_v32  ;;  %v4111_v28 = vpop.eup %4110  ;;  %v2347_v36 = vadd.f32 1.0, %v4109_v23  ;;  %v6891_v32 = vld [vmem:[#allocation60_spill] sm:$0xff]  ;;  %v6893_v23 = vld [vmem:[#allocation41_spill] sm:$0xff] }
 0x691   :  { %4114 = vrcp.f32 %v2340_v29  ;;  %v6892_v29 = vld [vmem:[#allocation61_spill] sm:$0xff] }
 0x692   :  { %4116 = vrcp.f32 %v2347_v36  ;;  %v6898_v36 = vld [vmem:[#allocation47_spill] sm:$0xff] }
 0x69a   :  { %v4113_v52 = vpop.eup %4112 }
 0x69b   :  { %v4115_v31 = vpop.eup %4114  ;;  %v2351_v19 = vmul.f32 %v4113_v52, %v4111_v28  ;;  %v6894_v28 = vld [vmem:[#allocation42_spill] sm:$0xff]  ;;  %v6895_v52 = vld [vmem:[#allocation44_spill] sm:$0xff] }
 0x69c   :  { %v2350_v15 = vmul.f32 %v4115_v31, %v5534_v3  ;;  %v4117_v25 = vpop.eup %4116  ;;  %v6888_v3 = vld [vmem:[#allocation57_spill] sm:$0xff] }
 0x69d   :  { %v6896_v31 = vld [vmem:[#allocation45_spill] sm:$0xff] }
 0x69e   :  { %v5727_v41 = vadd.f32 %v2351_v19, %v2350_v15  ;;  %v6897_v19 = vld [vmem:[#allocation46_spill] sm:$0xff]  ;;  %v6899_v15 = vld [vmem:[#allocation48_spill] sm:$0xff] }
 0x6a0   :  { %4118 = vtanh.f32 %v5727_v41 }
 0x6aa   :  { %v4119_v30 = vpop.eup %4118 }
 0x6ab   :  { %v2354_v49 = vmul.f32 %v4119_v30, %v4117_v25  ;;  %v6900_v25 = vld [vmem:[#allocation49_spill] sm:$0xff]  ;;  %v6901_v30 = vld [vmem:[#allocation50_spill] sm:$0xff] }
 0x6ad   :  { %v5730_v14 = vpack.c.bf16 %v2354_v49, %v2354_v49  ;;  %v2438_v49 = vpack.c.bf16 %v2238_v51, %v2238_v51  ;;  %v5781_v51 = vld [vmem:[#allocation8 + $0x2c] ss:$16 sps:$4 sm:$0xff]  }
 0x6ae   :  { %6906 = vst [vmem:[#allocation58_spill] sm:$0xff] %v5781_v51 }
 0x6af   :  { %2389 = vmatmul.mubr.bf16.vlgmr.msra.gmra.mrb[40].mxu0 %v5730_v14  ;;  %2430 = vmatmul.mubr.bf16.vlgmr.msra.gmra.mrb[40].mxu1 %v5730_v14 }
 0x6b0   :  { %2440 = vmatpush1.bf16.msra.mxu0 %v5541_v33  ;;  %2481 = vmatpush1.bf16.msra.mxu1 %v5544_v54 }
 0x6b1   :  { %2441 = vmatprep.subr.bf16.mxu0 %v5547_v53  ;;  %2482 = vmatprep.subr.bf16.mxu1 %v5550_v58 }
 0x6b2   :  { %2471 = vmatprep.mubr.bf16.mxu0 %v6684_v26  ;;  %2512 = vmatprep.mubr.bf16.mxu1 %v6684_v26 }
 0x6b4   :  { %2442 = vmatpush1.bf16.msra.mxu0 %v5555_v57  ;;  %2483 = vmatpush1.bf16.msra.mxu1 %v5558_v39 }
 0x6b5   :  { %2443 = vmatprep.subr.bf16.mxu0 %v5561_v10  ;;  %2484 = vmatprep.subr.bf16.mxu1 %v5564_v21 }
 0x6b8   :  { %2444 = vmatpush1.bf16.msra.mxu0 %v5567_v16  ;;  %2485 = vmatpush1.bf16.msra.mxu1 %v5570_v20 }
 0x6b9   :  { %2445 = vmatprep.subr.bf16.mxu0 %v5573_v59  ;;  %2486 = vmatprep.subr.bf16.mxu1 %v6888_v3 }
 0x6bc   :  { %2446 = vmatpush1.bf16.msra.mxu0 %v6889_v27  ;;  %2487 = vmatpush1.bf16.msra.mxu1 %v6890_v48 }
 0x6bd   :  { %2447 = vmatprep.subr.bf16.mxu0 %v6891_v32  ;;  %2488 = vmatprep.subr.bf16.mxu1 %v6892_v29 }
 0x6c0   :  { %2448 = vmatpush1.bf16.msra.mxu0 %v6893_v23  ;;  %2489 = vmatpush1.bf16.msra.mxu1 %v6894_v28 }
 0x6c1   :  { %2449 = vmatprep.subr.bf16.mxu0 %v6895_v52  ;;  %2490 = vmatprep.subr.bf16.mxu1 %v6896_v31 }
 0x6c4   :  { %2450 = vmatpush1.bf16.msra.mxu0 %v6897_v19  ;;  %2491 = vmatpush1.bf16.msra.mxu1 %v6898_v36  ;;  %v5766_v19 = vld [vmem:[#allocation8 + $0x4] ss:$16 sps:$4 sm:$0xff]  }
 0x6c5   :  { %2451 = vmatprep.subr.bf16.mxu0 %v6899_v15  ;;  %2492 = vmatprep.subr.bf16.mxu1 %v6900_v25  ;;  %v5769_v15 = vld [vmem:[#allocation8 + $0xc] ss:$16 sps:$4 sm:$0xff]  }
 0x6c6   :  { %6902 = vst [vmem:[#allocation54_spill] sm:$0xff] %v5769_v15 }
 0x6c8   :  { %2452 = vmatpush1.bf16.msra.mxu0 %v6901_v30  ;;  %2493 = vmatpush1.bf16.msra.mxu1 %v5618_v2  ;;  %v5772_v2 = vld [vmem:[#allocation8] ss:$16 sps:$4 sm:$0xff]  }
 0x6c9   :  { %2453 = vmatprep.subr.bf16.mxu0 %v5621_v22  ;;  %2494 = vmatprep.subr.bf16.mxu1 %v5624_v12  ;;  %6903 = vst [vmem:[#allocation55_spill] sm:$0xff] %v5772_v2  ;;  %v5775_v12 = vld [vmem:[#allocation8 + $0x8] ss:$16 sps:$4 sm:$0xff]  }
 0x6ca   :  { %6904 = vst [vmem:[#allocation56_spill] sm:$0xff] %v5775_v12 }
 0x6cc   :  { %2454 = vmatpush1.bf16.msra.mxu0 %v5627_v11  ;;  %2495 = vmatpush1.bf16.msra.mxu1 %v5630_v13  ;;  %v5778_v13 = vld [vmem:[#allocation8 + $0x24] ss:$16 sps:$4 sm:$0xff]  }
 0x6cd   :  { %2555 = vmatprep.subr.bf16.mxu0 %v5766_v19  ;;  %2596 = vmatprep.subr.bf16.mxu1 %v5769_v15  ;;  %6905 = vst [vmem:[#allocation57_spill] sm:$0xff] %v5778_v13  ;;  %v5801_v15 = vld [vmem:[#allocation8 + $0x48] ss:$16 sps:$4 sm:$0xff]  }
 0x6ce   :  { %6912 = vst [vmem:[#allocation44_spill] sm:$0xff] %v5801_v15 }
 0x6cf   :  { %2472 = vmatmul.mubr.bf16.vlgmr.msra.gmra.mrb[40].mxu0 %v2438_v49  ;;  %2513 = vmatmul.mubr.bf16.vlgmr.msra.gmra.mrb[40].mxu1 %v2438_v49  ;;  %v5786_v49 = vld [vmem:[#allocation8 + $0x20] ss:$16 sps:$4 sm:$0xff]  }
 0x6d0   :  { %2556 = vmatpush1.bf16.msra.mxu0 %v5772_v2  ;;  %2597 = vmatpush1.bf16.msra.mxu1 %v5775_v12  ;;  %6907 = vst [vmem:[#allocation59_spill] sm:$0xff] %v5786_v49  ;;  %v5789_v2 = vld [vmem:[#allocation8 + $0x28] ss:$16 sps:$4 sm:$0xff]   ;;  %v5792_v12 = vld [vmem:[#allocation8 + $0x44] ss:$16 sps:$4 sm:$0xff]  }
 0x6d1   :  { %2557 = vmatprep.subr.bf16.mxu0 %v5778_v13  ;;  %2598 = vmatprep.subr.bf16.mxu1 %v5781_v51  ;;  %6908 = vst [vmem:[#allocation60_spill] sm:$0xff] %v5789_v2  ;;  %6909 = vst [vmem:[#allocation61_spill] sm:$0xff] %v5792_v12  ;;  %v5795_v13 = vld [vmem:[#allocation8 + $0x4c] ss:$16 sps:$4 sm:$0xff]   ;;  %v5798_v51 = vld [vmem:[#allocation8 + $0x40] ss:$16 sps:$4 sm:$0xff]  }
 0x6d2   :  { %2587 = vmatprep.mubr.bf16.mxu0 %v6684_v26  ;;  %2628 = vmatprep.mubr.bf16.mxu1 %v6684_v26  ;;  %6910 = vst [vmem:[#allocation41_spill] sm:$0xff] %v5795_v13  ;;  %6911 = vst [vmem:[#allocation42_spill] sm:$0xff] %v5798_v51 }
 0x6d4   :  { %2558 = vmatpush1.bf16.msra.mxu0 %v5786_v49  ;;  %2599 = vmatpush1.bf16.msra.mxu1 %v5789_v2  ;;  %v5804_v49 = vld [vmem:[#allocation8 + $0x64] ss:$16 sps:$4 sm:$0xff]   ;;  %v5807_v2 = vld [vmem:[#allocation8 + $0x6c] ss:$16 sps:$4 sm:$0xff]  }
 0x6d5   :  { %2559 = vmatprep.subr.bf16.mxu0 %v5792_v12  ;;  %2600 = vmatprep.subr.bf16.mxu1 %v5795_v13  ;;  %v5810_v12 = vld [vmem:[#allocation8 + $0x60] ss:$16 sps:$4 sm:$0xff]   ;;  %v5813_v13 = vld [vmem:[#allocation8 + $0x68] ss:$16 sps:$4 sm:$0xff]  }
 0x6d8   :  { %2560 = vmatpush1.bf16.msra.mxu0 %v5798_v51  ;;  %2601 = vmatpush1.bf16.msra.mxu1 %v5801_v15  ;;  %v5816_v51 = vld [vmem:[#allocation8 + $0x84] ss:$16 sps:$4 sm:$0xff]   ;;  %v5819_v15 = vld [vmem:[#allocation8 + $0x8c] ss:$16 sps:$4 sm:$0xff]  }
 0x6d9   :  { %2561 = vmatprep.subr.bf16.mxu0 %v5804_v49  ;;  %2602 = vmatprep.subr.bf16.mxu1 %v5807_v2 }
 0x6dc   :  { %2562 = vmatpush1.bf16.msra.mxu0 %v5810_v12  ;;  %2603 = vmatpush1.bf16.msra.mxu1 %v5813_v13 }
 0x6dd   :  { %2563 = vmatprep.subr.bf16.mxu0 %v5816_v51  ;;  %2604 = vmatprep.subr.bf16.mxu1 %v5819_v15 }
 0x6e0   :  { %2564 = vmatpush1.bf16.msra.mxu0 %v5368_v45  ;;  %2605 = vmatpush1.bf16.msra.mxu1 %v5371_v37  ;;  %v6913_v45 = vld [vmem:[#allocation17_spill] sm:$0xff]  ;;  %v6914_v37 = vld [vmem:[#allocation18_spill] sm:$0xff] }
 0x6e1   :  { %2565 = vmatprep.subr.bf16.mxu0 %v5374_v34  ;;  %2606 = vmatprep.subr.bf16.mxu1 %v5377_v38  ;;  %v6915_v34 = vld [vmem:[#allocation19_spill] sm:$0xff]  ;;  %v6916_v38 = vld [vmem:[#allocation20_spill] sm:$0xff] }
 0x6e4   :  { %2566 = vmatpush1.bf16.msra.mxu0 %v5380_v40  ;;  %2607 = vmatpush1.bf16.msra.mxu1 %v5383_v47  ;;  %v6917_v40 = vld [vmem:[#allocation21_spill] sm:$0xff]  ;;  %v6918_v47 = vld [vmem:[#allocation22_spill] sm:$0xff] }
 0x6e5   :  { %2567 = vmatprep.subr.bf16.mxu0 %v5386_v35  ;;  %2608 = vmatprep.subr.bf16.mxu1 %v5389_v43  ;;  %v6919_v35 = vld [vmem:[#allocation23_spill] sm:$0xff]  ;;  %v6920_v43 = vld [vmem:[#allocation24_spill] sm:$0xff] }
 0x6e8   :  { %2568 = vmatpush1.bf16.msra.mxu0 %v5392_v46  ;;  %2609 = vmatpush1.bf16.msra.mxu1 %v5395_v62  ;;  %v6921_v46 = vld [vmem:[#allocation25_spill] sm:$0xff]  ;;  %v6922_v62 = vld [vmem:[#allocation26_spill] sm:$0xff] }
 0x6e9   :  { %2569 = vmatprep.subr.bf16.mxu0 %v5398_v63  ;;  %2610 = vmatprep.subr.bf16.mxu1 %v5401_v1  ;;  %v6923_v63 = vld [vmem:[#allocation27_spill] sm:$0xff]  ;;  %v6924_v1 = vld [vmem:[#allocation28_spill] sm:$0xff] }
 0x6ec   :  { %2570 = vmatpush1.bf16.msra.mxu0 %v5404_v60  ;;  %2611 = vmatpush1.bf16.msra.mxu1 %v5407_v4  ;;  %v6925_v60 = vld [vmem:[#allocation29_spill] sm:$0xff]  ;;  %v6926_v4 = vld [vmem:[#allocation30_spill] sm:$0xff] }
 0x6ed   :  { %2666 = vmatprep.subr.bf16.mxu0 %v5410_v8  ;;  %2707 = vmatprep.subr.bf16.mxu1 %v5413_v56  ;;  %v6927_v8 = vld [vmem:[#allocation31_spill] sm:$0xff]  ;;  %v6928_v56 = vld [vmem:[#allocation32_spill] sm:$0xff] }
 0x6ef   :  { %2588 = vmatmul.mubr.bf16.vlgmr.msra.gmra.mrb[44].mxu0 %v5730_v14  ;;  %2629 = vmatmul.mubr.bf16.vlgmr.msra.gmra.mrb[44].mxu1 %v5730_v14  ;;  %v6933_v14 = vld [vmem:[#allocation37_spill] sm:$0xff] }
 0x6f0   :  { %2667 = vmatpush1.bf16.msra.mxu0 %v5418_v7  ;;  %2708 = vmatpush1.bf16.msra.mxu1 %v6855_v17  ;;  %v6929_v7 = vld [vmem:[#allocation33_spill] sm:$0xff]  ;;  %v6930_v17 = vld [vmem:[#allocation34_spill] sm:$0xff] }
 0x6f1   :  { %2668 = vmatprep.subr.bf16.mxu0 %v6856_v0  ;;  %2709 = vmatprep.subr.bf16.mxu1 %v6857_v18  ;;  %v6931_v0 = vld [vmem:[#allocation35_spill] sm:$0xff]  ;;  %v6932_v18 = vld [vmem:[#allocation36_spill] sm:$0xff] }
 0x6f2   :  { %2698 = vmatprep.mubr.bf16.mxu0 %v6684_v26  ;;  %2739 = vmatprep.mubr.bf16.mxu1 %v6684_v26 }
 0x6f4   :  { %2669 = vmatpush1.bf16.msra.mxu0 %v6913_v45  ;;  %2710 = vmatpush1.bf16.msra.mxu1 %v6914_v37  ;;  %v6934_v45 = vld [vmem:[#allocation38_spill] sm:$0xff]  ;;  %v6935_v37 = vld [vmem:[#allocation39_spill] sm:$0xff] }
 0x6f5   :  { %2670 = vmatprep.subr.bf16.mxu0 %v6915_v34  ;;  %2711 = vmatprep.subr.bf16.mxu1 %v6916_v38  ;;  %v6936_v34 = vld [vmem:[#allocation40_spill] sm:$0xff]  ;;  %v6937_v38 = vld [vmem:[#allocation63_spill] sm:$0xff] }
 0x6f8   :  { %2671 = vmatpush1.bf16.msra.mxu0 %v6917_v40  ;;  %2712 = vmatpush1.bf16.msra.mxu1 %v6918_v47  ;;  %v6938_v40 = vld [vmem:[#allocation64_spill] sm:$0xff]  ;;  %v6939_v47 = vld [vmem:[#allocation65_spill] sm:$0xff] }
 0x6f9   :  { %2672 = vmatprep.subr.bf16.mxu0 %v6919_v35  ;;  %2713 = vmatprep.subr.bf16.mxu1 %v6920_v43  ;;  %v6940_v35 = vld [vmem:[#allocation43_spill] sm:$0xff] }
 0x6fc   :  { %2673 = vmatpush1.bf16.msra.mxu0 %v6921_v46  ;;  %2714 = vmatpush1.bf16.msra.mxu1 %v6922_v62  ;;  %v6941_v46 = vld [vmem:[#allocation53_spill] sm:$0xff] }
 0x6fd   :  { %2674 = vmatprep.subr.bf16.mxu0 %v6923_v63  ;;  %2715 = vmatprep.subr.bf16.mxu1 %v6924_v1 }
 0x700   :  { %2675 = vmatpush1.bf16.msra.mxu0 %v6925_v60  ;;  %2716 = vmatpush1.bf16.msra.mxu1 %v6926_v4  ;;  %v6942_v60 = vld [vmem:[#allocation62_spill] sm:$0xff] }
 0x701   :  { %2676 = vmatprep.subr.bf16.mxu0 %v6927_v8  ;;  %2717 = vmatprep.subr.bf16.mxu1 %v6928_v56 }
 0x704   :  { %2677 = vmatpush1.bf16.msra.mxu0 %v6929_v7  ;;  %2718 = vmatpush1.bf16.msra.mxu1 %v6930_v17 }
 0x705   :  { %2678 = vmatprep.subr.bf16.mxu0 %v6931_v0  ;;  %2719 = vmatprep.subr.bf16.mxu1 %v6932_v18 }
 0x708   :  { %2679 = vmatpush1.bf16.msra.mxu0 %v6933_v14  ;;  %2720 = vmatpush1.bf16.msra.mxu1 %v6934_v45 }
 0x709   :  { %2680 = vmatprep.subr.bf16.mxu0 %v6935_v37  ;;  %2721 = vmatprep.subr.bf16.mxu1 %v6936_v34 }
 0x70c   :  { %2681 = vmatpush1.bf16.msra.mxu0 %v6937_v38  ;;  %2722 = vmatpush1.bf16.msra.mxu1 %v6938_v40 }
 0x70d   :  { %2749 = vmatprep.subr.bf16.mxu0 %v6939_v47  ;;  %2790 = vmatprep.subr.bf16.mxu1 %v6940_v35 }
 0x71c   :  { %v2241_v43 = vpop.xlane.xlu1 %2240 }
 0x71d   :  { %v2242_v62 = vadd.f32 %v2241_v43, %v6941_v46 }
 0x71f   :  { %2244 = vst.msk [vmem:[#allocation12] sm:$0xff] %vm2243_vm3, %v2242_v62 }
 0x7a2   :  { %v2473_v63 = vpop.f32.mrb[40].mxu0  ;;  %v2514_v1 = vpop.f32.mrb[40].mxu1 }
 0x7a3   :  { %v3695_v4 = vadd.f32 %v2473_v63, %v6942_v60  ;;  %v2475_v8 = vpop.f32.mrb[41].mxu0  ;;  %v2516_v56 = vpop.f32.mrb[41].mxu1  ;;  %v3697_v40 = vadd.f32 %v2514_v1, %v6789_v9 }
 0x7a4   :  { %v3696_v7 = vadd.f32 %v2475_v8, %v6787_v61  ;;  %v2477_v17 = vpop.f32.mrb[42].mxu0  ;;  %v2518_v0 = vpop.f32.mrb[42].mxu1  ;;  %v3698_v34 = vadd.f32 %v2516_v56, %v6788_v6 }
 0x7a5   :  { %v3658_v18 = vmul.f32 -1.442695, %v3695_v4  ;;  %v2478_v14 = vpop.f32.mrb[43].mxu0  ;;  %v2519_v45 = vpop.f32.mrb[43].mxu1 }
 0x7a6   :  { %v3659_v37 = vmul.f32 -1.442695, %v3696_v7  ;;  %v3660_v38 = vmul.f32 -1.442695, %v3698_v34 }
 0x7a7   :  { %4120 = vpow2.f32 %v3658_v18 }
 0x7a8   :  { %4122 = vpow2.f32 %v3659_v37 }
 0x7a9   :  { %4124 = vpow2.f32 %v3660_v38 }
 0x7aa   :  { %4126 = vtanh.f32 %v3697_v40 }
 0x7b1   :  { %v4121_v47 = vpop.eup %4120 }
 0x7b2   :  { %v4123_v35 = vpop.eup %4122  ;;  %v2528_v43 = vadd.f32 1.0, %v4121_v47 }
 0x7b3   :  { %v2534_v62 = vadd.f32 1.0, %v4123_v35  ;;  %v4125_v63 = vpop.eup %4124 }
 0x7b4   :  { %4128 = vrcp.f32 %v2528_v43  ;;  %v4127_v4 = vpop.eup %4126  ;;  %v2541_v0 = vadd.f32 1.0, %v4125_v63 }
 0x7b5   :  { %4130 = vrcp.f32 %v2534_v62 }
 0x7b6   :  { %4132 = vrcp.f32 %v2541_v0 }
 0x7be   :  { %v4129_v8 = vpop.eup %4128 }
 0x7bf   :  { %v4131_v17 = vpop.eup %4130  ;;  %v2545_v7 = vmul.f32 %v4129_v8, %v4127_v4 }
 0x7c0   :  { %v2544_v18 = vmul.f32 %v4131_v17, %v5713_v5  ;;  %v4133_v4 = vpop.eup %4132 }
 0x7c2   :  { %v2589_v56 = vpop.f32.mrb[44].mxu0  ;;  %v2630_v14 = vpop.f32.mrb[44].mxu1  ;;  %v5880_v45 = vadd.f32 %v2545_v7, %v2544_v18 }
 0x7c3   :  { %v2637_v1 = vadd.f32 %v2589_v56, %v6734_v44  ;;  %v2591_v37 = vpop.f32.mrb[45].mxu0  ;;  %v2632_v34 = vpop.f32.mrb[45].mxu1  ;;  %v2639_v7 = vadd.f32 %v2630_v14, %v4929_v24 }
 0x7c4   :  { %v2638_v38 = vadd.f32 %v2591_v37, %v6735_v42  ;;  %v2593_v40 = vpop.f32.mrb[46].mxu0  ;;  %v2634_v47 = vpop.f32.mrb[46].mxu1  ;;  %4134 = vtanh.f32 %v5880_v45  ;;  %v2640_v5 = vadd.f32 %v2632_v34, %v6790_v50 }
 0x7c5   :  { %v3661_v35 = vmul.f32 -1.442695, %v2637_v1  ;;  %v2594_v43 = vpop.f32.mrb[47].mxu0  ;;  %v2635_v62 = vpop.f32.mrb[47].mxu1 }
 0x7c6   :  { %v3662_v63 = vmul.f32 -1.442695, %v2638_v38  ;;  %v3663_v17 = vmul.f32 -1.442695, %v2640_v5 }
 0x7c7   :  { %4136 = vpow2.f32 %v3661_v35 }
 0x7c8   :  { %4138 = vpow2.f32 %v3662_v63 }
 0x7c9   :  { %4140 = vpow2.f32 %v3663_v17 }
 0x7ca   :  { %4142 = vtanh.f32 %v2639_v7  ;;  %v5975_v7 = vld [vmem:[#allocation8 + $0xc8] ss:$16 sps:$4 sm:$0xff]  }
 0x7ce   :  { %v4135_v8 = vpop.eup %4134 }
 0x7cf   :  { %v2548_v0 = vmul.f32 %v4135_v8, %v4133_v4 }
 0x7d1   :  { %v4137_v18 = vpop.eup %4136  ;;  %v2549_v56 = vmul.f32 %v5723_v55, %v2548_v0 }
 0x7d2   :  { %v4139_v37 = vpop.eup %4138  ;;  %v2644_v40 = vadd.f32 1.0, %v4137_v18  ;;  %v5981_v18 = vld [vmem:[#allocation8 + $0xec] ss:$16 sps:$4 sm:$0xff]  }
 0x7d3   :  { %v2650_v1 = vadd.f32 1.0, %v4139_v37  ;;  %2550 = vadd.xlane.f32.xlu0 %v2549_v56  ;;  %v4141_v38 = vpop.eup %4140  ;;  %v5984_v56 = vld [vmem:[#allocation8 + $0xe0] ss:$16 sps:$4 sm:$0xff]   ;;  %v5987_v37 = vld [vmem:[#allocation8 + $0xe8] ss:$16 sps:$4 sm:$0xff]  }
 0x7d4   :  { %4144 = vrcp.f32 %v2644_v40  ;;  %v4143_v47 = vpop.eup %4142  ;;  %v2657_v62 = vadd.f32 1.0, %v4141_v38  ;;  %v5990_v40 = vld [vmem:[#allocation9 + $0x4] ss:$16 sps:$4 sm:$0xff]   ;;  %v5998_v38 = vld [vmem:[#allocation9] ss:$16 sps:$4 sm:$0xff]  }
 0x7d5   :  { %4146 = vrcp.f32 %v2650_v1  ;;  %v5993_v1 = vld [vmem:[#allocation9 + $0xc] ss:$16 sps:$4 sm:$0xff]  }
 0x7d6   :  { %4148 = vrcp.f32 %v2657_v62  ;;  %v6015_v62 = vld [vmem:[#allocation9 + $0x28] ss:$16 sps:$4 sm:$0xff]  }
 0x7d7   :  { %6963 = vst [vmem:[#allocation17_spill] sm:$0xff] %v6015_v62 }
 0x7de   :  { %v4145_v34 = vpop.eup %4144 }
 0x7df   :  { %v4147_v35 = vpop.eup %4146  ;;  %v2661_v43 = vmul.f32 %v4145_v34, %v4143_v47  ;;  %v6001_v47 = vld [vmem:[#allocation9 + $0x8] ss:$16 sps:$4 sm:$0xff]   ;;  %v6004_v34 = vld [vmem:[#allocation9 + $0x24] ss:$16 sps:$4 sm:$0xff]  }
 0x7e0   :  { %v2660_v14 = vmul.f32 %v4147_v35, %v5727_v41  ;;  %v4149_v5 = vpop.eup %4148  ;;  %v6955_v41 = vld [vmem:[#allocation61_spill] sm:$0xff]  ;;  %6959 = vst [vmem:[#allocation45_spill] sm:$0xff] %v6001_v47  ;;  %6960 = vst [vmem:[#allocation47_spill] sm:$0xff] %v6004_v34 }
 0x7e1   :  { %v6007_v35 = vld [vmem:[#allocation9 + $0x2c] ss:$16 sps:$4 sm:$0xff]  }
 0x7e2   :  { %v5889_v63 = vadd.f32 %v2661_v43, %v2660_v14  ;;  %6961 = vst [vmem:[#allocation49_spill] sm:$0xff] %v6007_v35  ;;  %v6012_v43 = vld [vmem:[#allocation9 + $0x20] ss:$16 sps:$4 sm:$0xff]   ;;  %v6018_v14 = vld [vmem:[#allocation9 + $0x44] ss:$16 sps:$4 sm:$0xff]  }
 0x7e3   :  { %6962 = vst [vmem:[#allocation50_spill] sm:$0xff] %v6012_v43  ;;  %6964 = vst [vmem:[#allocation18_spill] sm:$0xff] %v6018_v14 }
 0x7e4   :  { %4150 = vtanh.f32 %v5889_v63 }
 0x7ee   :  { %v4151_v4 = vpop.eup %4150 }
 0x7ef   :  { %v2664_v8 = vmul.f32 %v4151_v4, %v4149_v5  ;;  %v6021_v5 = vld [vmem:[#allocation9 + $0x4c] ss:$16 sps:$4 sm:$0xff]   ;;  %v6024_v4 = vld [vmem:[#allocation9 + $0x40] ss:$16 sps:$4 sm:$0xff]  }
 0x7f0   :  { %6965 = vst [vmem:[#allocation19_spill] sm:$0xff] %v6021_v5  ;;  %6966 = vst [vmem:[#allocation20_spill] sm:$0xff] %v6024_v4 }
 0x7f1   :  { %v5892_v17 = vpack.c.bf16 %v2664_v8, %v2664_v8  ;;  %v6027_v8 = vld [vmem:[#allocation9 + $0x48] ss:$16 sps:$4 sm:$0xff]  }
 0x7f2   :  { %6967 = vst [vmem:[#allocation21_spill] sm:$0xff] %v6027_v8 }
 0x7f3   :  { %2699 = vmatmul.mubr.bf16.vlgmr.msra.gmra.mrb[48].mxu0 %v5892_v17  ;;  %2740 = vmatmul.mubr.bf16.vlgmr.msra.gmra.mrb[48].mxu1 %v5892_v17 }
 0x7f4   :  { %2750 = vmatpush1.bf16.msra.mxu0 %v5541_v33  ;;  %2791 = vmatpush1.bf16.msra.mxu1 %v5544_v54  ;;  %v6943_v33 = vld [vmem:[#allocation46_spill] sm:$0xff]  ;;  %v6944_v54 = vld [vmem:[#allocation48_spill] sm:$0xff] }
 0x7f5   :  { %2751 = vmatprep.subr.bf16.mxu0 %v5547_v53  ;;  %2792 = vmatprep.subr.bf16.mxu1 %v5550_v58  ;;  %v6945_v53 = vld [vmem:[#allocation51_spill] sm:$0xff]  ;;  %v6946_v58 = vld [vmem:[#allocation52_spill] sm:$0xff] }
 0x7f6   :  { %2781 = vmatprep.mubr.bf16.mxu0 %v6684_v26  ;;  %2822 = vmatprep.mubr.bf16.mxu1 %v6684_v26 }
 0x7f8   :  { %2752 = vmatpush1.bf16.msra.mxu0 %v5555_v57  ;;  %2793 = vmatpush1.bf16.msra.mxu1 %v5558_v39  ;;  %v6947_v57 = vld [vmem:[#allocation66_spill] sm:$0xff]  ;;  %v2748_v39 = vpack.c.bf16 %v2548_v0, %v2548_v0 }
 0x7f9   :  { %2753 = vmatprep.subr.bf16.mxu0 %v5561_v10  ;;  %2794 = vmatprep.subr.bf16.mxu1 %v5564_v21  ;;  %v6948_v10 = vld [vmem:[#allocation54_spill] sm:$0xff]  ;;  %v6949_v21 = vld [vmem:[#allocation55_spill] sm:$0xff] }
 0x7fa   :  { %v5978_v0 = vld [vmem:[#allocation8 + $0xe4] ss:$16 sps:$4 sm:$0xff]  }
 0x7fc   :  { %2754 = vmatpush1.bf16.msra.mxu0 %v5567_v16  ;;  %2795 = vmatpush1.bf16.msra.mxu1 %v5570_v20  ;;  %v6950_v16 = vld [vmem:[#allocation56_spill] sm:$0xff]  ;;  %v6951_v20 = vld [vmem:[#allocation57_spill] sm:$0xff] }
 0x7fd   :  { %2755 = vmatprep.subr.bf16.mxu0 %v5573_v59  ;;  %2796 = vmatprep.subr.bf16.mxu1 %v6888_v3  ;;  %v6952_v59 = vld [vmem:[#allocation58_spill] sm:$0xff]  ;;  %v6956_v3 = vld [vmem:[#allocation41_spill] sm:$0xff] }
 0x800   :  { %2756 = vmatpush1.bf16.msra.mxu0 %v6889_v27  ;;  %2797 = vmatpush1.bf16.msra.mxu1 %v6890_v48  ;;  %v6957_v27 = vld [vmem:[#allocation42_spill] sm:$0xff]  ;;  %v6958_v48 = vld [vmem:[#allocation44_spill] sm:$0xff] }
 0x801   :  { %2757 = vmatprep.subr.bf16.mxu0 %v6891_v32  ;;  %2798 = vmatprep.subr.bf16.mxu1 %v6892_v29  ;;  %v5948_v32 = vld [vmem:[#allocation8 + $0x80] ss:$16 sps:$4 sm:$0xff]   ;;  %v5951_v29 = vld [vmem:[#allocation8 + $0x88] ss:$16 sps:$4 sm:$0xff]  }
 0x804   :  { %2758 = vmatpush1.bf16.msra.mxu0 %v6893_v23  ;;  %2799 = vmatpush1.bf16.msra.mxu1 %v6894_v28  ;;  %v5954_v23 = vld [vmem:[#allocation8 + $0xa4] ss:$16 sps:$4 sm:$0xff]   ;;  %v5957_v28 = vld [vmem:[#allocation8 + $0xac] ss:$16 sps:$4 sm:$0xff]  }
 0x805   :  { %2759 = vmatprep.subr.bf16.mxu0 %v6895_v52  ;;  %2800 = vmatprep.subr.bf16.mxu1 %v6896_v31  ;;  %v5960_v52 = vld [vmem:[#allocation8 + $0xa0] ss:$16 sps:$4 sm:$0xff]   ;;  %v5963_v31 = vld [vmem:[#allocation8 + $0xa8] ss:$16 sps:$4 sm:$0xff]  }
 0x808   :  { %2760 = vmatpush1.bf16.msra.mxu0 %v6943_v33  ;;  %2801 = vmatpush1.bf16.msra.mxu1 %v6898_v36  ;;  %v5966_v36 = vld [vmem:[#allocation8 + $0xc4] ss:$16 sps:$4 sm:$0xff]   ;;  %v6033_v33 = vld [vmem:[#allocation9 + $0x6c] ss:$16 sps:$4 sm:$0xff]  }
 0x809   :  { %2761 = vmatprep.subr.bf16.mxu0 %v6944_v54  ;;  %2802 = vmatprep.subr.bf16.mxu1 %v6900_v25  ;;  %v5969_v25 = vld [vmem:[#allocation8 + $0xcc] ss:$16 sps:$4 sm:$0xff]   ;;  %6969 = vst [vmem:[#allocation23_spill] sm:$0xff] %v6033_v33  ;;  %v6036_v54 = vld [vmem:[#allocation9 + $0x60] ss:$16 sps:$4 sm:$0xff]  }
 0x80a   :  { %6970 = vst [vmem:[#allocation24_spill] sm:$0xff] %v6036_v54 }
 0x80c   :  { %2762 = vmatpush1.bf16.msra.mxu0 %v6901_v30  ;;  %2803 = vmatpush1.bf16.msra.mxu1 %v6945_v53  ;;  %v5972_v30 = vld [vmem:[#allocation8 + $0xc0] ss:$16 sps:$4 sm:$0xff]   ;;  %v6039_v53 = vld [vmem:[#allocation9 + $0x68] ss:$16 sps:$4 sm:$0xff]  }
 0x80d   :  { %2763 = vmatprep.subr.bf16.mxu0 %v5621_v22  ;;  %2804 = vmatprep.subr.bf16.mxu1 %v6946_v58  ;;  %v6953_v22 = vld [vmem:[#allocation59_spill] sm:$0xff]  ;;  %6971 = vst [vmem:[#allocation25_spill] sm:$0xff] %v6039_v53  ;;  %v6042_v58 = vld [vmem:[#allocation9 + $0x84] ss:$16 sps:$4 sm:$0xff]  }
 0x80e   :  { %6972 = vst [vmem:[#allocation26_spill] sm:$0xff] %v6042_v58 }
 0x810   :  { %2764 = vmatpush1.bf16.msra.mxu0 %v5627_v11  ;;  %2805 = vmatpush1.bf16.msra.mxu1 %v6947_v57  ;;  %v6954_v11 = vld [vmem:[#allocation60_spill] sm:$0xff]  ;;  %v6045_v57 = vld [vmem:[#allocation9 + $0x8c] ss:$16 sps:$4 sm:$0xff]  }
 0x811   :  { %2865 = vmatprep.subr.bf16.mxu0 %v5766_v19  ;;  %2906 = vmatprep.subr.bf16.mxu1 %v6948_v10  ;;  %6973 = vst [vmem:[#allocation27_spill] sm:$0xff] %v6045_v57 }
 0x813   :  { %2782 = vmatmul.mubr.bf16.vlgmr.msra.gmra.mrb[48].mxu0 %v2748_v39  ;;  %2823 = vmatmul.mubr.bf16.vlgmr.msra.gmra.mrb[48].mxu1 %v2748_v39  ;;  %v6048_v39 = vld [vmem:[#allocation9 + $0x80] ss:$16 sps:$4 sm:$0xff]  }
 0x814   :  { %2866 = vmatpush1.bf16.msra.mxu0 %v6949_v21  ;;  %2907 = vmatpush1.bf16.msra.mxu1 %v6950_v16  ;;  %6974 = vst [vmem:[#allocation28_spill] sm:$0xff] %v6048_v39 }
 0x815   :  { %2867 = vmatprep.subr.bf16.mxu0 %v6951_v20  ;;  %2908 = vmatprep.subr.bf16.mxu1 %v6952_v59 }
 0x816   :  { %2897 = vmatprep.mubr.bf16.mxu0 %v6684_v26  ;;  %2938 = vmatprep.mubr.bf16.mxu1 %v6684_v26 }
 0x818   :  { %2868 = vmatpush1.bf16.msra.mxu0 %v6953_v22  ;;  %2909 = vmatpush1.bf16.msra.mxu1 %v6954_v11 }
 0x819   :  { %2869 = vmatprep.subr.bf16.mxu0 %v6955_v41  ;;  %2910 = vmatprep.subr.bf16.mxu1 %v6956_v3 }
 0x81c   :  { %2870 = vmatpush1.bf16.msra.mxu0 %v6957_v27  ;;  %2911 = vmatpush1.bf16.msra.mxu1 %v6958_v48 }
 0x81d   :  { %2871 = vmatprep.subr.bf16.mxu0 %v5804_v49  ;;  %2912 = vmatprep.subr.bf16.mxu1 %v5807_v2 }
 0x820   :  { %2872 = vmatpush1.bf16.msra.mxu0 %v5810_v12  ;;  %2913 = vmatpush1.bf16.msra.mxu1 %v5813_v13 }
 0x821   :  { %2873 = vmatprep.subr.bf16.mxu0 %v5816_v51  ;;  %2914 = vmatprep.subr.bf16.mxu1 %v5819_v15 }
 0x824   :  { %2874 = vmatpush1.bf16.msra.mxu0 %v5948_v32  ;;  %2915 = vmatpush1.bf16.msra.mxu1 %v5951_v29 }
 0x825   :  { %2875 = vmatprep.subr.bf16.mxu0 %v5954_v23  ;;  %2916 = vmatprep.subr.bf16.mxu1 %v5957_v28 }
 0x828   :  { %2876 = vmatpush1.bf16.msra.mxu0 %v5960_v52  ;;  %2917 = vmatpush1.bf16.msra.mxu1 %v5963_v31 }
 0x829   :  { %2877 = vmatprep.subr.bf16.mxu0 %v5966_v36  ;;  %2918 = vmatprep.subr.bf16.mxu1 %v5969_v25 }
 0x82c   :  { %2878 = vmatpush1.bf16.msra.mxu0 %v5972_v30  ;;  %2919 = vmatpush1.bf16.msra.mxu1 %v5975_v7 }
 0x82d   :  { %2879 = vmatprep.subr.bf16.mxu0 %v5978_v0  ;;  %2920 = vmatprep.subr.bf16.mxu1 %v5981_v18 }
 0x830   :  { %2880 = vmatpush1.bf16.msra.mxu0 %v5984_v56  ;;  %2921 = vmatpush1.bf16.msra.mxu1 %v5987_v37 }
 0x831   :  { %2976 = vmatprep.subr.bf16.mxu0 %v5990_v40  ;;  %3017 = vmatprep.subr.bf16.mxu1 %v5993_v1 }
 0x833   :  { %2898 = vmatmul.mubr.bf16.vlgmr.msra.gmra.mrb[52].mxu0 %v5892_v17  ;;  %2939 = vmatmul.mubr.bf16.vlgmr.msra.gmra.mrb[52].mxu1 %v5892_v17  ;;  %v6030_v17 = vld [vmem:[#allocation9 + $0x64] ss:$16 sps:$4 sm:$0xff]  }
 0x834   :  { %2977 = vmatpush1.bf16.msra.mxu0 %v5998_v38  ;;  %3018 = vmatpush1.bf16.msra.mxu1 %v6001_v47  ;;  %6968 = vst [vmem:[#allocation22_spill] sm:$0xff] %v6030_v17 }
 0x835   :  { %2978 = vmatprep.subr.bf16.mxu0 %v6004_v34  ;;  %3019 = vmatprep.subr.bf16.mxu1 %v6007_v35 }
 0x836   :  { %3008 = vmatprep.mubr.bf16.mxu0 %v6684_v26  ;;  %3049 = vmatprep.mubr.bf16.mxu1 %v6684_v26 }
 0x838   :  { %2979 = vmatpush1.bf16.msra.mxu0 %v6012_v43  ;;  %3020 = vmatpush1.bf16.msra.mxu1 %v6015_v62 }
 0x839   :  { %2980 = vmatprep.subr.bf16.mxu0 %v6018_v14  ;;  %3021 = vmatprep.subr.bf16.mxu1 %v6021_v5 }
 0x83c   :  { %2981 = vmatpush1.bf16.msra.mxu0 %v6024_v4  ;;  %3022 = vmatpush1.bf16.msra.mxu1 %v6027_v8 }
 0x83d   :  { %2982 = vmatprep.subr.bf16.mxu0 %v6030_v17  ;;  %3023 = vmatprep.subr.bf16.mxu1 %v6033_v33  ;;  %v6051_v33 = vld [vmem:[#allocation9 + $0x88] ss:$16 sps:$4 sm:$0xff]  }
 0x83e   :  { %6975 = vst [vmem:[#allocation29_spill] sm:$0xff] %v6051_v33 }
 0x840   :  { %2983 = vmatpush1.bf16.msra.mxu0 %v6036_v54  ;;  %3024 = vmatpush1.bf16.msra.mxu1 %v6039_v53  ;;  %v6054_v54 = vld [vmem:[#allocation9 + $0xa4] ss:$16 sps:$4 sm:$0xff]   ;;  %v6057_v53 = vld [vmem:[#allocation9 + $0xac] ss:$16 sps:$4 sm:$0xff]  }
 0x841   :  { %2984 = vmatprep.subr.bf16.mxu0 %v6042_v58  ;;  %3025 = vmatprep.subr.bf16.mxu1 %v6045_v57  ;;  %6976 = vst [vmem:[#allocation30_spill] sm:$0xff] %v6054_v54  ;;  %6977 = vst [vmem:[#allocation31_spill] sm:$0xff] %v6057_v53  ;;  %v6060_v58 = vld [vmem:[#allocation9 + $0xa0] ss:$16 sps:$4 sm:$0xff]   ;;  %v6063_v57 = vld [vmem:[#allocation9 + $0xa8] ss:$16 sps:$4 sm:$0xff]  }
 0x842   :  { %6978 = vst [vmem:[#allocation32_spill] sm:$0xff] %v6060_v58  ;;  %6979 = vst [vmem:[#allocation33_spill] sm:$0xff] %v6063_v57 }
 0x844   :  { %2985 = vmatpush1.bf16.msra.mxu0 %v6048_v39  ;;  %3026 = vmatpush1.bf16.msra.mxu1 %v6051_v33  ;;  %v6066_v39 = vld [vmem:[#allocation9 + $0xc4] ss:$16 sps:$4 sm:$0xff]   ;;  %v6069_v33 = vld [vmem:[#allocation9 + $0xcc] ss:$16 sps:$4 sm:$0xff]  }
 0x845   :  { %2986 = vmatprep.subr.bf16.mxu0 %v6054_v54  ;;  %3027 = vmatprep.subr.bf16.mxu1 %v6057_v53  ;;  %6980 = vst [vmem:[#allocation34_spill] sm:$0xff] %v6066_v39  ;;  %6981 = vst [vmem:[#allocation35_spill] sm:$0xff] %v6069_v33  ;;  %v6072_v54 = vld [vmem:[#allocation9 + $0xc0] ss:$16 sps:$4 sm:$0xff]   ;;  %v6075_v53 = vld [vmem:[#allocation9 + $0xc8] ss:$16 sps:$4 sm:$0xff]  }
 0x846   :  { %6982 = vst [vmem:[#allocation36_spill] sm:$0xff] %v6072_v54  ;;  %6983 = vst [vmem:[#allocation37_spill] sm:$0xff] %v6075_v53 }
 0x848   :  { %2987 = vmatpush1.bf16.msra.mxu0 %v6060_v58  ;;  %3028 = vmatpush1.bf16.msra.mxu1 %v6063_v57  ;;  %v6078_v58 = vld [vmem:[#allocation9 + $0xe4] ss:$16 sps:$4 sm:$0xff]   ;;  %v6081_v57 = vld [vmem:[#allocation9 + $0xec] ss:$16 sps:$4 sm:$0xff]  }
 0x849   :  { %2988 = vmatprep.subr.bf16.mxu0 %v6066_v39  ;;  %3029 = vmatprep.subr.bf16.mxu1 %v6069_v33  ;;  %6984 = vst [vmem:[#allocation38_spill] sm:$0xff] %v6078_v58  ;;  %6985 = vst [vmem:[#allocation39_spill] sm:$0xff] %v6081_v57  ;;  %v6084_v39 = vld [vmem:[#allocation9 + $0xe0] ss:$16 sps:$4 sm:$0xff]   ;;  %v6087_v33 = vld [vmem:[#allocation9 + $0xe8] ss:$16 sps:$4 sm:$0xff]  }
 0x84a   :  { %6986 = vst [vmem:[#allocation40_spill] sm:$0xff] %v6084_v39  ;;  %6987 = vst [vmem:[#allocation63_spill] sm:$0xff] %v6087_v33 }
 0x84c   :  { %2989 = vmatpush1.bf16.msra.mxu0 %v6072_v54  ;;  %3030 = vmatpush1.bf16.msra.mxu1 %v6075_v53  ;;  %v6090_v54 = vld [vmem:[#allocation11 + $0x4] ss:$16 sps:$4 sm:$0xff]   ;;  %v6093_v53 = vld [vmem:[#allocation11 + $0xc] ss:$16 sps:$4 sm:$0xff]  }
 0x84d   :  { %2990 = vmatprep.subr.bf16.mxu0 %v6078_v58  ;;  %3031 = vmatprep.subr.bf16.mxu1 %v6081_v57  ;;  %6988 = vst [vmem:[#allocation64_spill] sm:$0xff] %v6090_v54  ;;  %6989 = vst [vmem:[#allocation65_spill] sm:$0xff] %v6093_v53 }
 0x850   :  { %2991 = vmatpush1.bf16.msra.mxu0 %v6084_v39  ;;  %3032 = vmatpush1.bf16.msra.mxu1 %v6087_v33 }
 0x851   :  { %3059 = vmatprep.subr.bf16.mxu0 %v6090_v54  ;;  %3100 = vmatprep.subr.bf16.mxu1 %v6093_v53 }
 0x860   :  { %v2551_v58 = vpop.xlane.xlu0 %2550 }
 0x861   :  { %v2552_v57 = vadd.f32 %v2551_v58, %v6941_v46 }
 0x863   :  { %2554 = vst.msk [vmem:[#allocation12] sm:$0xff] %vm2553_vm4, %v2552_v57 }
 0x8e6   :  { %v2783_v17 = vpop.f32.mrb[48].mxu0  ;;  %v2824_v8 = vpop.f32.mrb[48].mxu1 }
 0x8e7   :  { %v3699_v39 = vadd.f32 %v2783_v17, %v6942_v60  ;;  %v2785_v4 = vpop.f32.mrb[49].mxu0  ;;  %v2826_v5 = vpop.f32.mrb[49].mxu1  ;;  %v3701_v57 = vadd.f32 %v2824_v8, %v6789_v9 }
 0x8e8   :  { %v3700_v33 = vadd.f32 %v2785_v4, %v6787_v61  ;;  %v2787_v14 = vpop.f32.mrb[50].mxu0  ;;  %v2828_v62 = vpop.f32.mrb[50].mxu1  ;;  %v3702_v53 = vadd.f32 %v2826_v5, %v6788_v6 }
 0x8e9   :  { %v3664_v54 = vmul.f32 -1.442695, %v3699_v39  ;;  %v2788_v43 = vpop.f32.mrb[51].mxu0  ;;  %v2829_v35 = vpop.f32.mrb[51].mxu1 }
 0x8ea   :  { %v3665_v34 = vmul.f32 -1.442695, %v3700_v33  ;;  %v3666_v58 = vmul.f32 -1.442695, %v3702_v53 }
 0x8eb   :  { %4152 = vpow2.f32 %v3664_v54 }
 0x8ec   :  { %4154 = vpow2.f32 %v3665_v34 }
 0x8ed   :  { %4156 = vpow2.f32 %v3666_v58 }
 0x8ee   :  { %4158 = vtanh.f32 %v3701_v57 }
 0x8f5   :  { %v4153_v46 = vpop.eup %4152 }
 0x8f6   :  { %v4155_v47 = vpop.eup %4154  ;;  %v2838_v17 = vadd.f32 1.0, %v4153_v46 }
 0x8f7   :  { %v2844_v60 = vadd.f32 1.0, %v4155_v47  ;;  %v4157_v62 = vpop.eup %4156 }
 0x8f8   :  { %4160 = vrcp.f32 %v2838_v17  ;;  %v4159_v14 = vpop.eup %4158  ;;  %v2851_v33 = vadd.f32 1.0, %v4157_v62 }
 0x8f9   :  { %4162 = vrcp.f32 %v2844_v60 }
 0x8fa   :  { %4164 = vrcp.f32 %v2851_v33 }
 0x902   :  { %v4161_v43 = vpop.eup %4160 }
 0x903   :  { %v4163_v35 = vpop.eup %4162  ;;  %v2855_v4 = vmul.f32 %v4161_v43, %v4159_v14 }
 0x904   :  { %v2854_v34 = vmul.f32 %v4163_v35, %v5880_v45  ;;  %v4165_v43 = vpop.eup %4164 }
 0x906   :  { %v2899_v5 = vpop.f32.mrb[52].mxu0  ;;  %v2940_v54 = vpop.f32.mrb[52].mxu1  ;;  %v6102_v53 = vadd.f32 %v2855_v4, %v2854_v34 }
 0x907   :  { %v2947_v46 = vadd.f32 %v2899_v5, %v6734_v44  ;;  %v2901_v8 = vpop.f32.mrb[53].mxu0  ;;  %v2942_v39 = vpop.f32.mrb[53].mxu1  ;;  %v2949_v33 = vadd.f32 %v2940_v54, %v4929_v24 }
 0x908   :  { %v2948_v47 = vadd.f32 %v2901_v8, %v6735_v42  ;;  %v2903_v60 = vpop.f32.mrb[54].mxu0  ;;  %v2944_v58 = vpop.f32.mrb[54].mxu1  ;;  %4166 = vtanh.f32 %v6102_v53  ;;  %v2950_v45 = vadd.f32 %v2942_v39, %v6790_v50 }
 0x909   :  { %v3667_v57 = vmul.f32 -1.442695, %v2947_v46  ;;  %v2904_v17 = vpop.f32.mrb[55].mxu0  ;;  %v2945_v62 = vpop.f32.mrb[55].mxu1 }
 0x90a   :  { %v3668_v14 = vmul.f32 -1.442695, %v2948_v47  ;;  %v3669_v4 = vmul.f32 -1.442695, %v2950_v45 }
 0x90b   :  { %4168 = vpow2.f32 %v3667_v57 }
 0x90c   :  { %4170 = vpow2.f32 %v3668_v14 }
 0x90d   :  { %4172 = vpow2.f32 %v3669_v4 }
 0x90e   :  { %4174 = vtanh.f32 %v2949_v33  ;;  %v6121_v33 = vld [vmem:[#allocation11] ss:$16 sps:$4 sm:$0xff]  }
 0x912   :  { %v4167_v35 = vpop.eup %4166 }
 0x913   :  { %v6109_v34 = vmul.f32 %v4167_v35, %v4165_v43 }
 0x915   :  { %v4169_v5 = vpop.eup %4168  ;;  %v2859_v8 = vmul.f32 %v5723_v55, %v6109_v34 }
 0x916   :  { %v4171_v60 = vpop.eup %4170  ;;  %v2954_v46 = vadd.f32 1.0, %v4169_v5  ;;  %v6124_v5 = vld [vmem:[#allocation11 + $0x8] ss:$16 sps:$4 sm:$0xff]  }
 0x917   :  { %v2960_v47 = vadd.f32 1.0, %v4171_v60  ;;  %2860 = vadd.xlane.f32.xlu1 %v2859_v8  ;;  %v4173_v39 = vpop.eup %4172  ;;  %v6130_v8 = vld [vmem:[#allocation11 + $0x2c] ss:$16 sps:$4 sm:$0xff]   ;;  %v6135_v60 = vld [vmem:[#allocation11 + $0x20] ss:$16 sps:$4 sm:$0xff]  }
 0x918   :  { %4176 = vrcp.f32 %v2954_v46  ;;  %v4175_v58 = vpop.eup %4174  ;;  %v2967_v54 = vadd.f32 1.0, %v4173_v39  ;;  %v6138_v46 = vld [vmem:[#allocation11 + $0x28] ss:$16 sps:$4 sm:$0xff]   ;;  %v6144_v39 = vld [vmem:[#allocation11 + $0x4c] ss:$16 sps:$4 sm:$0xff]  }
 0x919   :  { %4178 = vrcp.f32 %v2960_v47  ;;  %v6141_v47 = vld [vmem:[#allocation11 + $0x44] ss:$16 sps:$4 sm:$0xff]  }
 0x91a   :  { %4180 = vrcp.f32 %v2967_v54  ;;  %v6159_v54 = vld [vmem:[#allocation11 + $0x60] ss:$16 sps:$4 sm:$0xff]  }
 0x91b   :  { %6991 = vst [vmem:[#allocation46_spill] sm:$0xff] %v6159_v54 }
 0x922   :  { %v4177_v57 = vpop.eup %4176 }
 0x923   :  { %v4179_v17 = vpop.eup %4178  ;;  %v2971_v62 = vmul.f32 %v4177_v57, %v4175_v58  ;;  %v6147_v58 = vld [vmem:[#allocation11 + $0x40] ss:$16 sps:$4 sm:$0xff]   ;;  %v6150_v57 = vld [vmem:[#allocation11 + $0x48] ss:$16 sps:$4 sm:$0xff]  }
 0x924   :  { %v2970_v14 = vmul.f32 %v4179_v17, %v5889_v63  ;;  %v4181_v55 = vpop.eup %4180  ;;  %v6127_v63 = vld [vmem:[#allocation11 + $0x24] ss:$16 sps:$4 sm:$0xff]  }
 0x925   :  { %v6153_v17 = vld [vmem:[#allocation11 + $0x64] ss:$16 sps:$4 sm:$0xff]  }
 0x926   :  { %v6114_v45 = vadd.f32 %v2971_v62, %v2970_v14  ;;  %v6156_v62 = vld [vmem:[#allocation11 + $0x6c] ss:$16 sps:$4 sm:$0xff]   ;;  %v6162_v14 = vld [vmem:[#allocation11 + $0x68] ss:$16 sps:$4 sm:$0xff]  }
 0x927   :  { %6990 = vst [vmem:[#allocation43_spill] sm:$0xff] %v6156_v62  ;;  %6992 = vst [vmem:[#allocation48_spill] sm:$0xff] %v6162_v14 }
 0x928   :  { %4182 = vtanh.f32 %v6114_v45 }
 0x932   :  { %v4183_v43 = vpop.eup %4182 }
 0x933   :  { %v2974_v35 = vmul.f32 %v4183_v43, %v4181_v55  ;;  %v6165_v55 = vld [vmem:[#allocation11 + $0x84] ss:$16 sps:$4 sm:$0xff]   ;;  %v6168_v43 = vld [vmem:[#allocation11 + $0x8c] ss:$16 sps:$4 sm:$0xff]  }
 0x934   :  { %6993 = vst [vmem:[#allocation51_spill] sm:$0xff] %v6165_v55  ;;  %6994 = vst [vmem:[#allocation52_spill] sm:$0xff] %v6168_v43 }
 0x935   :  { %v6117_v4 = vpack.c.bf16 %v2974_v35, %v2974_v35  ;;  %v6171_v35 = vld [vmem:[#allocation11 + $0x80] ss:$16 sps:$4 sm:$0xff]  }
 0x936   :  { %6995 = vst [vmem:[#allocation66_spill] sm:$0xff] %v6171_v35 }
 0x937   :  { %3009 = vmatmul.mubr.bf16.vlgmr.msra.gmra.mrb[56].mxu0 %v6117_v4  ;;  %3050 = vmatmul.mubr.bf16.vlgmr.msra.gmra.mrb[56].mxu1 %v6117_v4 }
 0x938   :  { %3060 = vmatpush1.bf16.msra.mxu0 %v6121_v33  ;;  %3101 = vmatpush1.bf16.msra.mxu1 %v6124_v5 }
 0x939   :  { %3061 = vmatprep.subr.bf16.mxu0 %v6127_v63  ;;  %3102 = vmatprep.subr.bf16.mxu1 %v6130_v8 }
 0x93a   :  { %3091 = vmatprep.mubr.bf16.mxu0 %v6684_v26  ;;  %3132 = vmatprep.mubr.bf16.mxu1 %v6684_v26 }
 0x93c   :  { %3062 = vmatpush1.bf16.msra.mxu0 %v6135_v60  ;;  %3103 = vmatpush1.bf16.msra.mxu1 %v6138_v46 }
 0x93d   :  { %3063 = vmatprep.subr.bf16.mxu0 %v6141_v47  ;;  %3104 = vmatprep.subr.bf16.mxu1 %v6144_v39 }
 0x940   :  { %3064 = vmatpush1.bf16.msra.mxu0 %v6147_v58  ;;  %3105 = vmatpush1.bf16.msra.mxu1 %v6150_v57 }
 0x941   :  { %3065 = vmatprep.subr.bf16.mxu0 %v6153_v17  ;;  %3106 = vmatprep.subr.bf16.mxu1 %v6156_v62  ;;  %v6174_v62 = vld [vmem:[#allocation11 + $0x88] ss:$16 sps:$4 sm:$0xff]  }
 0x942   :  { %6996 = vst [vmem:[#allocation54_spill] sm:$0xff] %v6174_v62 }
 0x944   :  { %3066 = vmatpush1.bf16.msra.mxu0 %v6159_v54  ;;  %3107 = vmatpush1.bf16.msra.mxu1 %v6162_v14  ;;  %v6177_v54 = vld [vmem:[#allocation11 + $0xa4] ss:$16 sps:$4 sm:$0xff]   ;;  %v6180_v14 = vld [vmem:[#allocation11 + $0xac] ss:$16 sps:$4 sm:$0xff]  }
 0x945   :  { %3067 = vmatprep.subr.bf16.mxu0 %v6165_v55  ;;  %3108 = vmatprep.subr.bf16.mxu1 %v6168_v43  ;;  %6997 = vst [vmem:[#allocation55_spill] sm:$0xff] %v6177_v54  ;;  %6998 = vst [vmem:[#allocation56_spill] sm:$0xff] %v6180_v14  ;;  %v6183_v55 = vld [vmem:[#allocation11 + $0xa0] ss:$16 sps:$4 sm:$0xff]   ;;  %v6186_v43 = vld [vmem:[#allocation11 + $0xa8] ss:$16 sps:$4 sm:$0xff]  }
 0x946   :  { %6999 = vst [vmem:[#allocation57_spill] sm:$0xff] %v6183_v55  ;;  %7000 = vst [vmem:[#allocation58_spill] sm:$0xff] %v6186_v43 }
 0x948   :  { %3068 = vmatpush1.bf16.msra.mxu0 %v6171_v35  ;;  %3109 = vmatpush1.bf16.msra.mxu1 %v6174_v62  ;;  %v6189_v35 = vld [vmem:[#allocation11 + $0xc4] ss:$16 sps:$4 sm:$0xff]   ;;  %v6192_v62 = vld [vmem:[#allocation11 + $0xcc] ss:$16 sps:$4 sm:$0xff]  }
 0x949   :  { %3069 = vmatprep.subr.bf16.mxu0 %v6177_v54  ;;  %3110 = vmatprep.subr.bf16.mxu1 %v6180_v14  ;;  %7001 = vst [vmem:[#allocation59_spill] sm:$0xff] %v6189_v35  ;;  %7002 = vst [vmem:[#allocation60_spill] sm:$0xff] %v6192_v62  ;;  %v6195_v54 = vld [vmem:[#allocation11 + $0xc0] ss:$16 sps:$4 sm:$0xff]   ;;  %v6198_v14 = vld [vmem:[#allocation11 + $0xc8] ss:$16 sps:$4 sm:$0xff]  }
 0x94a   :  { %7003 = vst [vmem:[#allocation61_spill] sm:$0xff] %v6195_v54 }
 0x94c   :  { %3070 = vmatpush1.bf16.msra.mxu0 %v6183_v55  ;;  %3111 = vmatpush1.bf16.msra.mxu1 %v6186_v43  ;;  %v6201_v55 = vld [vmem:[#allocation11 + $0xe4] ss:$16 sps:$4 sm:$0xff]   ;;  %v6204_v43 = vld [vmem:[#allocation11 + $0xec] ss:$16 sps:$4 sm:$0xff]  }
 0x94d   :  { %3071 = vmatprep.subr.bf16.mxu0 %v6189_v35  ;;  %3112 = vmatprep.subr.bf16.mxu1 %v6192_v62  ;;  %v6207_v35 = vld [vmem:[#allocation11 + $0xe0] ss:$16 sps:$4 sm:$0xff]   ;;  %v6210_v62 = vld [vmem:[#allocation11 + $0xe8] ss:$16 sps:$4 sm:$0xff]  }
 0x950   :  { %3072 = vmatpush1.bf16.msra.mxu0 %v6195_v54  ;;  %3113 = vmatpush1.bf16.msra.mxu1 %v6198_v14  ;;  %v3058_v54 = vpack.c.bf16 %v6109_v34, %v6109_v34 }
 0x951   :  { %3073 = vmatprep.subr.bf16.mxu0 %v6201_v55  ;;  %3114 = vmatprep.subr.bf16.mxu1 %v6204_v43 }
 0x954   :  { %3074 = vmatpush1.bf16.msra.mxu0 %v6207_v35  ;;  %3115 = vmatpush1.bf16.msra.mxu1 %v6210_v62 }
 0x955   :  { %3175 = vmatprep.subr.bf16.mxu0 %v5766_v19  ;;  %3216 = vmatprep.subr.bf16.mxu1 %v6948_v10  ;;  %v7007_v19 = vld [vmem:[#allocation50_spill] sm:$0xff]  ;;  %v7011_v10 = vld [vmem:[#allocation20_spill] sm:$0xff] }
 0x957   :  { %3092 = vmatmul.mubr.bf16.vlgmr.msra.gmra.mrb[56].mxu0 %v3058_v54  ;;  %3133 = vmatmul.mubr.bf16.vlgmr.msra.gmra.mrb[56].mxu1 %v3058_v54 }
 0x958   :  { %3176 = vmatpush1.bf16.msra.mxu0 %v6949_v21  ;;  %3217 = vmatpush1.bf16.msra.mxu1 %v6950_v16  ;;  %v7012_v21 = vld [vmem:[#allocation21_spill] sm:$0xff]  ;;  %v7013_v16 = vld [vmem:[#allocation22_spill] sm:$0xff] }
 0x959   :  { %3177 = vmatprep.subr.bf16.mxu0 %v6951_v20  ;;  %3218 = vmatprep.subr.bf16.mxu1 %v6952_v59  ;;  %v7014_v20 = vld [vmem:[#allocation23_spill] sm:$0xff]  ;;  %v7015_v59 = vld [vmem:[#allocation24_spill] sm:$0xff] }
 0x95a   :  { %3207 = vmatprep.mubr.bf16.mxu0 %v6684_v26  ;;  %3248 = vmatprep.mubr.bf16.mxu1 %v6684_v26 }
 0x95c   :  { %3178 = vmatpush1.bf16.msra.mxu0 %v6953_v22  ;;  %3219 = vmatpush1.bf16.msra.mxu1 %v6954_v11  ;;  %v7016_v22 = vld [vmem:[#allocation25_spill] sm:$0xff]  ;;  %v7017_v11 = vld [vmem:[#allocation26_spill] sm:$0xff] }
 0x95d   :  { %3179 = vmatprep.subr.bf16.mxu0 %v6955_v41  ;;  %3220 = vmatprep.subr.bf16.mxu1 %v6956_v3  ;;  %v7018_v41 = vld [vmem:[#allocation27_spill] sm:$0xff]  ;;  %v7019_v3 = vld [vmem:[#allocation28_spill] sm:$0xff] }
 0x960   :  { %3180 = vmatpush1.bf16.msra.mxu0 %v6957_v27  ;;  %3221 = vmatpush1.bf16.msra.mxu1 %v6958_v48  ;;  %v7020_v27 = vld [vmem:[#allocation29_spill] sm:$0xff]  ;;  %v7021_v48 = vld [vmem:[#allocation30_spill] sm:$0xff] }
 0x961   :  { %3181 = vmatprep.subr.bf16.mxu0 %v5804_v49  ;;  %3222 = vmatprep.subr.bf16.mxu1 %v5807_v2  ;;  %v7005_v2 = vld [vmem:[#allocation47_spill] sm:$0xff] }
 0x962   :  { %v7010_v49 = vld [vmem:[#allocation19_spill] sm:$0xff] }
 0x964   :  { %3182 = vmatpush1.bf16.msra.mxu0 %v5810_v12  ;;  %3223 = vmatpush1.bf16.msra.mxu1 %v5813_v13  ;;  %v7004_v13 = vld [vmem:[#allocation45_spill] sm:$0xff] }
 0x965   :  { %3183 = vmatprep.subr.bf16.mxu0 %v5816_v51  ;;  %3224 = vmatprep.subr.bf16.mxu1 %v5819_v15  ;;  %v7006_v12 = vld [vmem:[#allocation49_spill] sm:$0xff]  ;;  %v7009_v51 = vld [vmem:[#allocation18_spill] sm:$0xff] }
 0x966   :  { %v7008_v15 = vld [vmem:[#allocation17_spill] sm:$0xff] }
 0x968   :  { %3184 = vmatpush1.bf16.msra.mxu0 %v5948_v32  ;;  %3225 = vmatpush1.bf16.msra.mxu1 %v5951_v29  ;;  %v7022_v32 = vld [vmem:[#allocation31_spill] sm:$0xff]  ;;  %v7023_v29 = vld [vmem:[#allocation32_spill] sm:$0xff] }
 0x969   :  { %3185 = vmatprep.subr.bf16.mxu0 %v5954_v23  ;;  %3226 = vmatprep.subr.bf16.mxu1 %v5957_v28  ;;  %v7024_v23 = vld [vmem:[#allocation33_spill] sm:$0xff]  ;;  %v7025_v28 = vld [vmem:[#allocation34_spill] sm:$0xff] }
 0x96c   :  { %3186 = vmatpush1.bf16.msra.mxu0 %v5960_v52  ;;  %3227 = vmatpush1.bf16.msra.mxu1 %v5963_v31  ;;  %v7026_v52 = vld [vmem:[#allocation35_spill] sm:$0xff]  ;;  %v7027_v31 = vld [vmem:[#allocation36_spill] sm:$0xff] }
 0x96d   :  { %3187 = vmatprep.subr.bf16.mxu0 %v5966_v36  ;;  %3228 = vmatprep.subr.bf16.mxu1 %v5969_v25  ;;  %v7028_v36 = vld [vmem:[#allocation37_spill] sm:$0xff]  ;;  %v7029_v25 = vld [vmem:[#allocation38_spill] sm:$0xff] }
 0x970   :  { %3188 = vmatpush1.bf16.msra.mxu0 %v5972_v30  ;;  %3229 = vmatpush1.bf16.msra.mxu1 %v5975_v7  ;;  %v7030_v30 = vld [vmem:[#allocation39_spill] sm:$0xff]  ;;  %v7031_v7 = vld [vmem:[#allocation40_spill] sm:$0xff] }
 0x971   :  { %3189 = vmatprep.subr.bf16.mxu0 %v5978_v0  ;;  %3230 = vmatprep.subr.bf16.mxu1 %v5981_v18  ;;  %v7032_v0 = vld [vmem:[#allocation63_spill] sm:$0xff]  ;;  %v7033_v18 = vld [vmem:[#allocation64_spill] sm:$0xff] }
 0x974   :  { %3190 = vmatpush1.bf16.msra.mxu0 %v5984_v56  ;;  %3231 = vmatpush1.bf16.msra.mxu1 %v5987_v37  ;;  %v7034_v56 = vld [vmem:[#allocation65_spill] sm:$0xff] }
 0x975   :  { %3286 = vmatprep.subr.bf16.mxu0 %v5990_v40  ;;  %3327 = vmatprep.subr.bf16.mxu1 %v5993_v1  ;;  %v7035_v40 = vld [vmem:[#allocation53_spill] sm:$0xff] }
 0x977   :  { %3208 = vmatmul.mubr.bf16.vlgmr.msra.gmra.mrb[60].mxu0 %v6117_v4  ;;  %3249 = vmatmul.mubr.bf16.vlgmr.msra.gmra.mrb[60].mxu1 %v6117_v4  ;;  %v7036_v4 = vld [vmem:[#allocation62_spill] sm:$0xff] }
 0x978   :  { %3287 = vmatpush1.bf16.msra.mxu0 %v5998_v38  ;;  %3328 = vmatpush1.bf16.msra.mxu1 %v7004_v13 }
 0x979   :  { %3288 = vmatprep.subr.bf16.mxu0 %v7005_v2  ;;  %3329 = vmatprep.subr.bf16.mxu1 %v7006_v12 }
 0x97a   :  { %3318 = vmatprep.mubr.bf16.mxu0 %v6684_v26  ;;  %3359 = vmatprep.mubr.bf16.mxu1 %v6684_v26 }
 0x97c   :  { %3289 = vmatpush1.bf16.msra.mxu0 %v7007_v19  ;;  %3330 = vmatpush1.bf16.msra.mxu1 %v7008_v15 }
 0x97d   :  { %3290 = vmatprep.subr.bf16.mxu0 %v7009_v51  ;;  %3331 = vmatprep.subr.bf16.mxu1 %v7010_v49 }
 0x980   :  { %3291 = vmatpush1.bf16.msra.mxu0 %v7011_v10  ;;  %3332 = vmatpush1.bf16.msra.mxu1 %v7012_v21 }
 0x981   :  { %3292 = vmatprep.subr.bf16.mxu0 %v7013_v16  ;;  %3333 = vmatprep.subr.bf16.mxu1 %v7014_v20 }
 0x984   :  { %3293 = vmatpush1.bf16.msra.mxu0 %v7015_v59  ;;  %3334 = vmatpush1.bf16.msra.mxu1 %v7016_v22 }
 0x985   :  { %3294 = vmatprep.subr.bf16.mxu0 %v7017_v11  ;;  %3335 = vmatprep.subr.bf16.mxu1 %v7018_v41 }
 0x988   :  { %3295 = vmatpush1.bf16.msra.mxu0 %v7019_v3  ;;  %3336 = vmatpush1.bf16.msra.mxu1 %v7020_v27 }
 0x989   :  { %3296 = vmatprep.subr.bf16.mxu0 %v7021_v48  ;;  %3337 = vmatprep.subr.bf16.mxu1 %v7022_v32 }
 0x98c   :  { %3297 = vmatpush1.bf16.msra.mxu0 %v7023_v29  ;;  %3338 = vmatpush1.bf16.msra.mxu1 %v7024_v23 }
 0x98d   :  { %3298 = vmatprep.subr.bf16.mxu0 %v7025_v28  ;;  %3339 = vmatprep.subr.bf16.mxu1 %v7026_v52 }
 0x990   :  { %3299 = vmatpush1.bf16.msra.mxu0 %v7027_v31  ;;  %3340 = vmatpush1.bf16.msra.mxu1 %v7028_v36 }
 0x991   :  { %3300 = vmatprep.subr.bf16.mxu0 %v7029_v25  ;;  %3341 = vmatprep.subr.bf16.mxu1 %v7030_v30 }
 0x994   :  { %3301 = vmatpush1.bf16.msra.mxu0 %v7031_v7  ;;  %3342 = vmatpush1.bf16.msra.mxu1 %v7032_v0 }
 0x995   :  { %3369 = vmatprep.subr.bf16.mxu0 %v7033_v18  ;;  %3410 = vmatprep.subr.bf16.mxu1 %v7034_v56 }
 0x9a4   :  { %v2861_v37 = vpop.xlane.xlu1 %2860 }
 0x9a5   :  { %v2862_v1 = vadd.f32 %v2861_v37, %v7035_v40 }
 0x9a7   :  { %2864 = vst.msk [vmem:[#allocation12] sm:$0xff] %vm2863_vm5, %v2862_v1 }
 0xa2a   :  { %v3093_v38 = vpop.f32.mrb[56].mxu0  ;;  %v3134_v34 = vpop.f32.mrb[56].mxu1 }
 0xa2b   :  { %v3703_v54 = vadd.f32 %v3093_v38, %v7036_v4  ;;  %v3095_v13 = vpop.f32.mrb[57].mxu0  ;;  %v3136_v2 = vpop.f32.mrb[57].mxu1  ;;  %v3705_v59 = vadd.f32 %v3134_v34, %v6789_v9 }
 0xa2c   :  { %v3704_v12 = vadd.f32 %v3095_v13, %v6787_v61  ;;  %v3097_v19 = vpop.f32.mrb[58].mxu0  ;;  %v3138_v15 = vpop.f32.mrb[58].mxu1  ;;  %v3706_v16 = vadd.f32 %v3136_v2, %v6788_v6 }
 0xa2d   :  { %v3670_v51 = vmul.f32 -1.442695, %v3703_v54  ;;  %v3098_v49 = vpop.f32.mrb[59].mxu0  ;;  %v3139_v10 = vpop.f32.mrb[59].mxu1 }
 0xa2e   :  { %v3671_v21 = vmul.f32 -1.442695, %v3704_v12  ;;  %v3672_v20 = vmul.f32 -1.442695, %v3706_v16 }
 0xa2f   :  { %4184 = vpow2.f32 %v3670_v51 }
 0xa30   :  { %4186 = vpow2.f32 %v3671_v21 }
 0xa31   :  { %4188 = vpow2.f32 %v3672_v20 }
 0xa32   :  { %4190 = vtanh.f32 %v3705_v59 }
 0xa39   :  { %v4185_v22 = vpop.eup %4184 }
 0xa3a   :  { %v4187_v11 = vpop.eup %4186  ;;  %v3148_v41 = vadd.f32 1.0, %v4185_v22 }
 0xa3b   :  { %v3154_v3 = vadd.f32 1.0, %v4187_v11  ;;  %v4189_v27 = vpop.eup %4188 }
 0xa3c   :  { %4192 = vrcp.f32 %v3148_v41  ;;  %v4191_v48 = vpop.eup %4190  ;;  %v3161_v28 = vadd.f32 1.0, %v4189_v27 }
 0xa3d   :  { %4194 = vrcp.f32 %v3154_v3 }
 0xa3e   :  { %4196 = vrcp.f32 %v3161_v28 }
 0xa46   :  { %v4193_v32 = vpop.eup %4192 }
 0xa47   :  { %v4195_v29 = vpop.eup %4194  ;;  %v3165_v23 = vmul.f32 %v4193_v32, %v4191_v48 }
 0xa48   :  { %v3164_v52 = vmul.f32 %v4195_v29, %v6102_v53  ;;  %v4197_v13 = vpop.eup %4196  ;;  %v7050_v29 = vld [vmem:[#allocation61_spill] sm:$0xff] }
 0xa4a   :  { %v3209_v31 = vpop.f32.mrb[60].mxu0  ;;  %v3250_v36 = vpop.f32.mrb[60].mxu1  ;;  %v6293_v25 = vadd.f32 %v3165_v23, %v3164_v52 }
 0xa4b   :  { %v3257_v30 = vadd.f32 %v3209_v31, %v6734_v44  ;;  %v3211_v7 = vpop.f32.mrb[61].mxu0  ;;  %v3252_v0 = vpop.f32.mrb[61].mxu1  ;;  %v3259_v44 = vadd.f32 %v3250_v36, %v4929_v24 }
 0xa4c   :  { %v3258_v18 = vadd.f32 %v3211_v7, %v6735_v42  ;;  %v3213_v56 = vpop.f32.mrb[62].mxu0  ;;  %v3254_v37 = vpop.f32.mrb[62].mxu1  ;;  %4198 = vtanh.f32 %v6293_v25  ;;  %v3260_v53 = vadd.f32 %v3252_v0, %v6790_v50  ;;  %v6303_v42 = vld [vmem:[%s6366_s7] ss:$0 sm:$0xff]  ;;  %s4574_s7 = smov [#allocation12]  }
 0xa4d   :  { %v3673_v1 = vmul.f32 -1.442695, %v3257_v30  ;;  %v3214_v38 = vpop.f32.mrb[63].mxu0  ;;  %v3255_v34 = vpop.f32.mrb[63].mxu1  ;;  %s3491_s1 = sshll.u32 %s4574_s7, 4  ;;  %s3492_s1 = int_to_ptr.vmem [resolvable:$true] %s3491_s1 }
 0xa4e   :  { %v3674_v54 = vmul.f32 -1.442695, %v3258_v18  ;;  %v3675_v12 = vmul.f32 -1.442695, %v3260_v53  ;;  %s4536_s10 = scalar_lea.vmem %s3492_s1, 128  ;;  %p4541_p13 = scmp.lt.s32.totalorder %s3492_s1, %s3492_s1 }
 0xa4f   :  { %4200 = vpow2.f32 %v3673_v1  ;;  %p4537_p12 = scmp.ne.s32.totalorder %s3492_s1, %s4536_s10  ;;  %p4542_p0 = scmp.lt.s32.totalorder %s4536_s10, %s4536_s10 }
 0xa50   :  { %4202 = vpow2.f32 %v3674_v54 }
 0xa51   :  { %4204 = vpow2.f32 %v3675_v12  ;;  %p4543_p1 = por %p4542_p0, %p4541_p13 }
 0xa52   :  { %4206 = vtanh.f32 %v3259_v44 }
 0xa53   :  { %p4544_p2 = pnand %p4543_p1, %p4537_p12 }
 0xa56   :  { %v4199_v2 = vpop.eup %4198 }
 0xa57   :  { %v3168_v19 = vmul.f32 %v4199_v2, %v4197_v13 }
 0xa59   :  { %v4201_v15 = vpop.eup %4200  ;;  %v3169_v51 = vmul.f32 %v6303_v42, %v3168_v19  ;;  %v3368_v23 = vpack.c.bf16 %v3168_v19, %v3168_v19 }
 0xa5a   :  { %v4203_v49 = vpop.eup %4202  ;;  %v3264_v10 = vadd.f32 1.0, %v4201_v15 }
 0xa5b   :  { %v3270_v21 = vadd.f32 1.0, %v4203_v49  ;;  %3170 = vadd.xlane.f32.xlu0 %v3169_v51  ;;  %v4205_v50 = vpop.eup %4204 }
 0xa5c   :  { %4208 = vrcp.f32 %v3264_v10  ;;  %v4207_v16 = vpop.eup %4206  ;;  %v3277_v22 = vadd.f32 1.0, %v4205_v50 }
 0xa5d   :  { %4210 = vrcp.f32 %v3270_v21 }
 0xa5e   :  { %4212 = vrcp.f32 %v3277_v22 }
 0xa66   :  { %v4209_v24 = vpop.eup %4208 }
 0xa67   :  { %v4211_v20 = vpop.eup %4210  ;;  %v3281_v59 = vmul.f32 %v4209_v24, %v4207_v16 }
 0xa68   :  { %v3280_v11 = vmul.f32 %v4211_v20, %v6114_v45  ;;  %v4213_v3 = vpop.eup %4212  ;;  %v7037_v45 = vld [vmem:[#allocation43_spill] sm:$0xff] }
 0xa6a   :  { %v3282_v41 = vadd.f32 %v3281_v59, %v3280_v11 }
 0xa6c   :  { %4214 = vtanh.f32 %v3282_v41 }
 0xa76   :  { %v4215_v27 = vpop.eup %4214 }
 0xa77   :  { %v3284_v48 = vmul.f32 %v4215_v27, %v4213_v3 }
 0xa79   :  { %v3285_v32 = vpack.c.bf16 %v3284_v48, %v3284_v48 }
 0xa7b   :  { %3319 = vmatmul.mubr.bf16.vlgmr.msra.gmra.mrb[64].mxu0 %v3285_v32  ;;  %3360 = vmatmul.mubr.bf16.vlgmr.msra.gmra.mrb[64].mxu1 %v3285_v32 }
 0xa7c   :  { %3370 = vmatpush1.bf16.msra.mxu0 %v6121_v33  ;;  %3411 = vmatpush1.bf16.msra.mxu1 %v6124_v5  ;;  %v7038_v33 = vld [vmem:[#allocation46_spill] sm:$0xff]  ;;  %v7039_v5 = vld [vmem:[#allocation48_spill] sm:$0xff] }
 0xa7d   :  { %3371 = vmatprep.subr.bf16.mxu0 %v6127_v63  ;;  %3412 = vmatprep.subr.bf16.mxu1 %v6130_v8  ;;  %v7041_v63 = vld [vmem:[#allocation52_spill] sm:$0xff]  ;;  %v7042_v8 = vld [vmem:[#allocation66_spill] sm:$0xff] }
 0xa7e   :  { %3401 = vmatprep.mubr.bf16.mxu0 %v6684_v26  ;;  %3442 = vmatprep.mubr.bf16.mxu1 %v6684_v26  ;;  %v7040_v26 = vld [vmem:[#allocation51_spill] sm:$0xff] }
 0xa80   :  { %3372 = vmatpush1.bf16.msra.mxu0 %v6135_v60  ;;  %3413 = vmatpush1.bf16.msra.mxu1 %v6138_v46  ;;  %v7043_v60 = vld [vmem:[#allocation54_spill] sm:$0xff]  ;;  %v7044_v46 = vld [vmem:[#allocation55_spill] sm:$0xff] }
 0xa81   :  { %3373 = vmatprep.subr.bf16.mxu0 %v6141_v47  ;;  %3414 = vmatprep.subr.bf16.mxu1 %v6144_v39  ;;  %v7045_v47 = vld [vmem:[#allocation56_spill] sm:$0xff]  ;;  %v7046_v39 = vld [vmem:[#allocation57_spill] sm:$0xff] }
 0xa84   :  { %3374 = vmatpush1.bf16.msra.mxu0 %v6147_v58  ;;  %3415 = vmatpush1.bf16.msra.mxu1 %v6150_v57  ;;  %v7047_v58 = vld [vmem:[#allocation58_spill] sm:$0xff]  ;;  %v7048_v57 = vld [vmem:[#allocation59_spill] sm:$0xff] }
 0xa85   :  { %3375 = vmatprep.subr.bf16.mxu0 %v6153_v17  ;;  %3416 = vmatprep.subr.bf16.mxu1 %v7037_v45  ;;  %v7049_v17 = vld [vmem:[#allocation60_spill] sm:$0xff] }
 0xa88   :  { %3376 = vmatpush1.bf16.msra.mxu0 %v7038_v33  ;;  %3417 = vmatpush1.bf16.msra.mxu1 %v7039_v5 }
 0xa89   :  { %3377 = vmatprep.subr.bf16.mxu0 %v7040_v26  ;;  %3418 = vmatprep.subr.bf16.mxu1 %v7041_v63 }
 0xa8c   :  { %3378 = vmatpush1.bf16.msra.mxu0 %v7042_v8  ;;  %3419 = vmatpush1.bf16.msra.mxu1 %v7043_v60 }
 0xa8d   :  { %3379 = vmatprep.subr.bf16.mxu0 %v7044_v46  ;;  %3420 = vmatprep.subr.bf16.mxu1 %v7045_v47 }
 0xa90   :  { %3380 = vmatpush1.bf16.msra.mxu0 %v7046_v39  ;;  %3421 = vmatpush1.bf16.msra.mxu1 %v7047_v58 }
 0xa91   :  { %3381 = vmatprep.subr.bf16.mxu0 %v7048_v57  ;;  %3422 = vmatprep.subr.bf16.mxu1 %v7049_v17 }
 0xa94   :  { %3382 = vmatpush1.bf16.msra.mxu0 %v7050_v29  ;;  %3423 = vmatpush1.bf16.msra.mxu1 %v6198_v14 }
 0xa95   :  { %3383 = vmatprep.subr.bf16.mxu0 %v6201_v55  ;;  %3424 = vmatprep.subr.bf16.mxu1 %v6204_v43 }
 0xa98   :  { %3384 = vmatpush1.bf16.msra.mxu0 %v6207_v35  ;;  %3425 = vmatpush1.bf16.msra.mxu1 %v6210_v62 }
 0xa9b   :  { %3402 = vmatmul.mubr.bf16.vlgmr.msra.gmra.mrb[64].mxu0 %v3368_v23  ;;  %3443 = vmatmul.mubr.bf16.vlgmr.msra.gmra.mrb[64].mxu1 %v3368_v23 }
 0xae8   :  { %v3171_v28 = vpop.xlane.xlu0 %3170 }
 0xae9   :  { %v3172_v52 = vadd.f32 %v3171_v28, %v7035_v40 }
 0xaeb   :  { %3174 = vst.msk [vmem:[#allocation12] sm:$0xff] %vm3173_vm6, %v3172_v52 }
 0xb6e   :  { %v3403_v31 = vpop.f32.mrb[64].mxu0  ;;  %v3444_v36 = vpop.f32.mrb[64].mxu1 }
 0xb6f   :  { %v3707_v14 = vadd.f32 %v3403_v31, %v7036_v4  ;;  %v3405_v30 = vpop.f32.mrb[65].mxu0  ;;  %v3446_v55 = vpop.f32.mrb[65].mxu1  ;;  %v3709_v38 = vadd.f32 %v3444_v36, %v6789_v9 }
 0xb70   :  { %v3708_v43 = vadd.f32 %v3405_v30, %v6787_v61  ;;  %v3407_v7 = vpop.f32.mrb[66].mxu0  ;;  %v3448_v35 = vpop.f32.mrb[66].mxu1  ;;  %v3710_v37 = vadd.f32 %v3446_v55, %v6788_v6 }
 0xb71   :  { %v3676_v0 = vmul.f32 -1.442695, %v3707_v14  ;;  %v3408_v62 = vpop.f32.mrb[67].mxu0  ;;  %v3449_v18 = vpop.f32.mrb[67].mxu1 }
 0xb72   :  { %v3677_v56 = vmul.f32 -1.442695, %v3708_v43  ;;  %v3678_v1 = vmul.f32 -1.442695, %v3710_v37 }
 0xb73   :  { %4216 = vpow2.f32 %v3676_v0 }
 0xb74   :  { %4218 = vpow2.f32 %v3677_v56 }
 0xb75   :  { %4220 = vpow2.f32 %v3678_v1 }
 0xb76   :  { %4222 = vtanh.f32 %v3709_v38 }
 0xb7d   :  { %v4217_v34 = vpop.eup %4216 }
 0xb7e   :  { %v4219_v54 = vpop.eup %4218  ;;  %v3458_v4 = vadd.f32 1.0, %v4217_v34 }
 0xb7f   :  { %v3464_v53 = vadd.f32 1.0, %v4219_v54  ;;  %v4221_v61 = vpop.eup %4220 }
 0xb80   :  { %4224 = vrcp.f32 %v3458_v4  ;;  %v4223_v13 = vpop.eup %4222  ;;  %v3471_v19 = vadd.f32 1.0, %v4221_v61 }
 0xb81   :  { %4226 = vrcp.f32 %v3464_v53 }
 0xb82   :  { %4228 = vrcp.f32 %v3471_v19 }
 0xb8a   :  { %v4225_v2 = vpop.eup %4224 }
 0xb8b   :  { %v4227_v12 = vpop.eup %4226  ;;  %v3475_v44 = vmul.f32 %v4225_v2, %v4223_v13 }
 0xb8c   :  { %v3474_v15 = vmul.f32 %v4227_v12, %v6293_v25  ;;  %v4229_v9 = vpop.eup %4228 }
 0xb8e   :  { %v3476_v6 = vadd.f32 %v3475_v44, %v3474_v15 }
 0xb90   :  { %4230 = vtanh.f32 %v3476_v6 }
 0xb9a   :  { %v4231_v51 = vpop.eup %4230 }
 0xb9b   :  { %v3478_v49 = vmul.f32 %v4231_v51, %v4229_v9 }
 0xb9d   :  { %v3479_v10 = vmul.f32 %v6303_v42, %v3478_v49 }
 0xb9f   :  { %3480 = vadd.xlane.f32.xlu1 %v3479_v10 }
 0xc2c   :  { %v3481_v21 = vpop.xlane.xlu1 %3480 }
 0xc2d   :  { %v3482_v50 = vadd.f32 %v3481_v21, %v7035_v40 }
 0xc2f   :  { %3484 = vst.msk [vmem:[#allocation12] sm:$0xff] %vm3483_vm7, %v3482_v50 }
 0xc30   :  { %4547 = shalt.err (!%p4544_p2)
}
 0xc31   :  { %s4548_s0 = scalar_lea.hbm %s6368_s9, 128 }
 0xc32   :  { %p4549_p3 = scmp.ne.s32.totalorder %s6368_s9, %s4548_s0  ;;  %p4552_p4 = scmp.lt.u32.totalorder %s4548_s0, %s6368_s9 }
 0xc34   :  { %p4554_p5 = pnand %p4552_p4, %p4549_p3 }
 0xc36   :  { %4557 = shalt.err (!%p4554_p5)
}
 0xc37   :  { %3494 = dma.vmem_to_hbm [thread:$0]  %s3492_s1, 128, %s6368_s9, [#allocation5]  }
 0xc38   :  { %4564 = dma.done.wait [#allocation5], 128  }
 0xc39   :  { %4565 = vsyncadd [#allocation5], 4294967168 }
 0xc3a   :  { %3498 = vsyncpa [#allocation4], 1 }
 0xc3b   :  { %3499 = vsyncpa [#allocation7], 1 }
 0xc3c   :  { %3500 = vsyncpa [#allocation10], 1 }
 0xc3d   :  { %3501 = vsyncpa [#allocation5], 1 }

</bundles_post_ra>
